<compile_context>
chip_gen: v5e
topology: v5e:2x2
jax: 0.10.0
libtpu: 0.0.40
codegen_flags: <defaults>
</compile_context>

<pallas_src>
import jax
import jax.numpy as jnp
import numpy as np
from jax import lax
from jax.experimental import pallas as pl
from jax.experimental.pallas import tpu as pltpu


# =============================================================================
# Fused seq2seq kernel
# =============================================================================
def seq2seq_kernel(lens_ref, x2d_ref, y2d_ref,
                   w_in_ref, whh_ref, bias_ref, winit_ref, wvoc_ref,
                   out_ref):
    Bp = lens_ref.shape[0]                     # padded batch (8)
    SB, _E = x2d_ref.shape
    TB, _ = y2d_ref.shape
    H = whh_ref.shape[1]
    H2, H3 = 2 * H, 3 * H
    S = SB // Bp
    T = TB // Bp

    lens = lens_ref[...]                       # (Bp, 1) int32

    x2d = x2d_ref[...]                         # (S*Bp, E) time-major flattened
    y2d = y2d_ref[...]                         # (T*Bp, E)
    w_in = w_in_ref[...]                       # (3, E, 3H)   [fwd, bwd, dec]
    whh = whh_ref[...]                         # (3, H, 3H)
    bias = bias_ref[...]                       # (3, 4H) = [bgi_r|bgi_z|bgi_n|bhn] per RNN

    # ---- hoisted input projections: ONE fused (rows, E) @ (E, 3H) per RNN ----
    # bgi already contains b_ih (+ b_hh for the r/z gates); bhn stays inside r*(.)
    gi_f = jnp.dot(x2d, w_in[0], preferred_element_type=jnp.float32) + bias[0:1, :H3]
    gi_b = jnp.dot(x2d, w_in[1], preferred_element_type=jnp.float32) + bias[1:2, :H3]
    gi_d = jnp.dot(y2d, w_in[2], preferred_element_type=jnp.float32) + bias[2:3, :H3]

    whh_f, whh_b, whh_d = whh[0], whh[1], whh[2]
    bhn_f = bias[0:1, H3:H3 + H]               # (1, H)
    bhn_b = bias[1:2, H3:H3 + H]
    bhn_d = bias[2:3, H3:H3 + H]

    def cell(gi_t, h, whh_g, bhn):
        """PyTorch GRU cell, fused-gate layout. gi_t: (Bp, 3H) precomputed (+biases)."""
        gh = jnp.dot(h, whh_g, preferred_element_type=jnp.float32)   # ONE MXU push (Bp, 3H)
        rz = jax.nn.sigmoid(gi_t[:, :H2] + gh[:, :H2])               # ONE sigmoid over r|z slab
        r = rz[:, :H]
        z = rz[:, H:]
        n = jnp.tanh(gi_t[:, H2:] + r * (gh[:, H2:] + bhn))
        return (1.0 - z) * n + z * h

    # ---- fused bidirectional encoder (fully unrolled; S is small and static) ----
    h_f = jnp.zeros((Bp, H), jnp.float32)
    h_b = jnp.zeros((Bp, H), jnp.float32)
    for t in range(S):
        tb = S - 1 - t
        hf_new = cell(gi_f[t * Bp:(t + 1) * Bp], h_f, whh_f, bhn_f)
        hb_new = cell(gi_b[tb * Bp:(tb + 1) * Bp], h_b, whh_b, bhn_b)
        # packed-sequence semantics: freeze the state at padded positions
        h_f = jnp.where(lens > t, hf_new, h_f)
        h_b = jnp.where(lens > tb, hb_new, h_b)

    # ---- decoder initial hidden: single (Bp, 2H) @ (2H, H) on [h_f | h_b] ----
    h = jnp.dot(jnp.concatenate([h_f, h_b], axis=1), winit_ref[...],
                preferred_element_type=jnp.float32)

    # ---- decoder recurrence: hidden states kept as values (no scratch round-trip) ----
    dec_states = []
    for t in range(T):
        h = cell(gi_d[t * Bp:(t + 1) * Bp], h, whh_d, bhn_d)
        dec_states.append(h)
    hdec = jnp.concatenate(dec_states, axis=0)                        # (T*Bp, H)

    # ---- single batched vocab projection + one contiguous store ----
    out_ref[...] = jnp.dot(hdec, wvoc_ref[...], preferred_element_type=jnp.float32)


# =============================================================================
# Wrapper
# =============================================================================
def simple_seq2seq_forward(src_sents, tgt_sents, src_lens, kp):
    """Matches Simple_seq2seq.forward: returns (B, tgt_seq_len-1, tgt_vocab_size)."""
    B, S = src_sents.shape
    T = tgt_sents.shape[1] - 1
    E = kp["src_emb"].shape[1]
    H = kp["whh"].shape[1]
    V = kp["wvoc"].shape[1]
    Bp = max(8, ((B + 7) // 8) * 8)            # pad batch to a full sublane tile
    pad = Bp - B

    # embedding lookups + batch padding + time-major flattening (XLA side)
    src_embeds = jnp.take(kp["src_emb"], src_sents, axis=0)                # (B, S, E)
    tgt_embeds = jnp.take(kp["tgt_emb"], tgt_sents[:, :-1], axis=0)        # (B, T, E)
    src_embeds = jnp.pad(src_embeds, ((0, pad), (0, 0), (0, 0)))           # (Bp, S, E)
    tgt_embeds = jnp.pad(tgt_embeds, ((0, pad), (0, 0), (0, 0)))           # (Bp, T, E)
    lens = jnp.pad(src_lens.astype(jnp.int32), (0, pad)).reshape(Bp, 1)    # (Bp, 1), zeros for pad

    x2d = jnp.transpose(src_embeds, (1, 0, 2)).reshape(S * Bp, E)          # (S*Bp, E)
    y2d = jnp.transpose(tgt_embeds, (1, 0, 2)).reshape(T * Bp, E)          # (T*Bp, E)

    inputs = (lens, x2d, y2d, kp["w_in"], kp["whh"], kp["bias"], kp["winit"], kp["wvoc"])

    vmem = pl.BlockSpec(memory_space=pltpu.MemorySpace.VMEM)
    out2d = pl.pallas_call(
        seq2seq_kernel,
        out_shape=jax.ShapeDtypeStruct((T * Bp, V), jnp.float32),
        in_specs=[vmem] * len(inputs),          # built from len(inputs): counts always match
        out_specs=vmem,
    )(*inputs)

    out = jnp.transpose(out2d.reshape(T, Bp, V), (1, 0, 2))                # (Bp, T, V)
    return out[:B]                                                         # drop phantom rows


# =============================================================================
# Parameter conversion: PyTorch-layout GRU/Linear weights -> packed kernel layout
# =============================================================================
def prepare_kernel_params(tp):
    H = tp["enc_w_hh_f"].shape[1]

    def pack_one(w_ih, w_hh, b_ih, b_hh):
        # PyTorch gate order r, z, n stacked along rows of (3H, *); transpose -> fused columns.
        w_in = w_ih.T                                                  # (E, 3H)
        whh = w_hh.T                                                   # (H, 3H)
        bgi = jnp.concatenate([b_ih[:2 * H] + b_hh[:2 * H],            # r,z: b_ih + b_hh
                               b_ih[2 * H:]])                          # n: b_ih only
        bhn = b_hh[2 * H:]                                             # stays inside r*(.)
        return w_in, whh, jnp.concatenate([bgi, bhn])                  # bias row (4H,)

    w_in_f, whh_f, bias_f = pack_one(tp["enc_w_ih_f"], tp["enc_w_hh_f"],
                                     tp["enc_b_ih_f"], tp["enc_b_hh_f"])
    w_in_b, whh_b, bias_b = pack_one(tp["enc_w_ih_b"], tp["enc_w_hh_b"],
                                     tp["enc_b_ih_b"], tp["enc_b_hh_b"])
    w_in_d, whh_d, bias_d = pack_one(tp["dec_w_ih"], tp["dec_w_hh"],
                                     tp["dec_b_ih"], tp["dec_b_hh"])

    return {
        "src_emb": tp["src_emb"], "tgt_emb": tp["tgt_emb"],
        "w_in": jnp.stack([w_in_f, w_in_b, w_in_d], axis=0),           # (3, E, 3H)
        "whh":  jnp.stack([whh_f, whh_b, whh_d], axis=0),              # (3, H, 3H)
        "bias": jnp.stack([bias_f, bias_b, bias_d], axis=0),           # (3, 4H) == (3, 128)
        "winit": tp["w_init"].T,                                       # (2H, H)
        "wvoc": tp["w_voc"].T,                                         # (H, V)
    }


# =============================================================================
# Pure-JAX reference (PyTorch-layout weights, standard GRU equations)
# =============================================================================
def _gru_cell_ref(x, h, w_ih, w_hh, b_ih, b_hh):
    H = h.shape[1]
    gi = x @ w_ih.T + b_ih
    gh = h @ w_hh.T + b_hh
    r = jax.nn.sigmoid(gi[:, :H] + gh[:, :H])
    z = jax.nn.sigmoid(gi[:, H:2 * H] + gh[:, H:2 * H])
    n = jnp.tanh(gi[:, 2 * H:] + r * gh[:, 2 * H:])
    return (1.0 - z) * n + z * h


def _reference_forward(src_sents, tgt_sents, src_lens, tp):
    B, S = src_sents.shape
    H = tp["enc_w_hh_f"].shape[1]
    x = jnp.transpose(jnp.take(tp["src_emb"], src_sents, axis=0), (1, 0, 2))   # (S,B,E)
    mask = (jnp.arange(S)[:, None] < src_lens[None, :]).astype(jnp.float32)[..., None]

    def make_step(w_ih, w_hh, b_ih, b_hh):
        def f(h, xm):
            xt, mt = xm
            hn = _gru_cell_ref(xt, h, w_ih, w_hh, b_ih, b_hh)
            return mt * hn + (1.0 - mt) * h, None
        return f

    h0z = jnp.zeros((B, H), jnp.float32)
    h_f, _ = lax.scan(make_step(tp["enc_w_ih_f"], tp["enc_w_hh_f"],
                                tp["enc_b_ih_f"], tp["enc_b_hh_f"]), h0z, (x, mask))
    h_b, _ = lax.scan(make_step(tp["enc_w_ih_b"], tp["enc_w_hh_b"],
                                tp["enc_b_ih_b"], tp["enc_b_hh_b"]), h0z,
                      (x[::-1], mask[::-1]))
    h0 = jnp.concatenate([h_f, h_b], axis=1) @ tp["w_init"].T

    y = jnp.transpose(jnp.take(tp["tgt_emb"], tgt_sents[:, :-1], axis=0), (1, 0, 2))

    def dstep(h, xt):
        hn = _gru_cell_ref(xt, h, tp["dec_w_ih"], tp["dec_w_hh"],
                           tp["dec_b_ih"], tp["dec_b_hh"])
        return hn, hn @ tp["w_voc"].T

    _, outs = lax.scan(dstep, h0, y)
    return jnp.transpose(outs, (1, 0, 2))


# =============================================================================
# Main
# =============================================================================
if __name__ == "__main__":
    EMBED, HIDDEN = 16, 32
    SRC_VOCAB, TGT_VOCAB = 40, 48
    SRC_PAD_ID, TGT_PAD_ID = 0, 0
    B, SRC_SEQ, TGT_SEQ = 2, 8, 8

    key = jax.random.PRNGKey(0)
    ks = list(jax.random.split(key, 20))
    u = lambda k, shape, s: jax.random.uniform(k, shape, jnp.float32, -s, s)
    kH = 1.0 / np.sqrt(HIDDEN)

    src_emb = jax.random.normal(ks[0], (SRC_VOCAB, EMBED), jnp.float32).at[SRC_PAD_ID].set(0.0)
    tgt_emb = jax.random.normal(ks[1], (TGT_VOCAB, EMBED), jnp.float32).at[TGT_PAD_ID].set(0.0)

    # Parameters in PyTorch nn.GRU / nn.Linear layout
    torch_params = {
        "src_emb": src_emb, "tgt_emb": tgt_emb,
        "enc_w_ih_f": u(ks[2], (3 * HIDDEN, EMBED), kH),
        "enc_w_hh_f": u(ks[3], (3 * HIDDEN, HIDDEN), kH),
        "enc_b_ih_f": u(ks[4], (3 * HIDDEN,), kH),
        "enc_b_hh_f": u(ks[5], (3 * HIDDEN,), kH),
        "enc_w_ih_b": u(ks[6], (3 * HIDDEN, EMBED), kH),
        "enc_w_hh_b": u(ks[7], (3 * HIDDEN, HIDDEN), kH),
        "enc_b_ih_b": u(ks[8], (3 * HIDDEN,), kH),
        "enc_b_hh_b": u(ks[9], (3 * HIDDEN,), kH),
        "w_init": u(ks[10], (HIDDEN, 2 * HIDDEN), 1.0 / np.sqrt(2 * HIDDEN)),
        "dec_w_ih": u(ks[11], (3 * HIDDEN, EMBED), kH),
        "dec_w_hh": u(ks[12], (3 * HIDDEN, HIDDEN), kH),
        "dec_b_ih": u(ks[13], (3 * HIDDEN,), kH),
        "dec_b_hh": u(ks[14], (3 * HIDDEN,), kH),
        "w_voc": u(ks[15], (TGT_VOCAB, HIDDEN), kH),
    }
    kernel_params = prepare_kernel_params(torch_params)

    # deterministic batch (sorted descending by src length, as enforce_sorted=True)
    src_lens = jnp.array([8, 5], dtype=jnp.int32)
    src_sents = jax.random.randint(ks[16], (B, SRC_SEQ), 1, SRC_VOCAB, dtype=jnp.int32)
    pad_mask = jnp.arange(SRC_SEQ)[None, :] >= src_lens[:, None]
    src_sents = jnp.where(pad_mask, SRC_PAD_ID, src_sents)
    tgt_sents = jax.random.randint(ks[17], (B, TGT_SEQ), 1, TGT_VOCAB, dtype=jnp.int32)

    out = jax.block_until_ready(
        simple_seq2seq_forward(src_sents, tgt_sents, src_lens, kernel_params))
    assert out.shape == (B, TGT_SEQ - 1, TGT_VOCAB), out.shape

    ref = jax.block_until_ready(
        _reference_forward(src_sents, tgt_sents, src_lens, torch_params))
    np.testing.assert_allclose(np.asarray(out), np.asarray(ref), rtol=1e-4, atol=1e-4)

    print("KERNEL_OK")
</pallas_src>

<mosaic_0001>
module attributes {stable_mosaic.version = 11 : i64} {
  func.func @seq2seq_kernel(%arg0: memref<8x1xi32, #tpu.memory_space<vmem>>, %arg1: memref<64x16xf32, #tpu.memory_space<vmem>>, %arg2: memref<56x16xf32, #tpu.memory_space<vmem>>, %arg3: memref<3x16x96xf32, #tpu.memory_space<vmem>>, %arg4: memref<3x32x96xf32, #tpu.memory_space<vmem>>, %arg5: memref<3x128xf32, #tpu.memory_space<vmem>>, %arg6: memref<64x32xf32, #tpu.memory_space<vmem>>, %arg7: memref<32x48xf32, #tpu.memory_space<vmem>>, %arg8: memref<56x48xf32, #tpu.memory_space<vmem>>) attributes {dimension_semantics = [], scalar_prefetch = 0 : i64, scratch_operands = 0 : i64, tpu.core_type = #tpu.core_type<tc>} {
    %c0 = arith.constant 0 : index
    %c0_0 = arith.constant 0 : index
    %0 = vector.load %arg0[%c0, %c0_0] : memref<8x1xi32, #tpu.memory_space<vmem>>, vector<8x1xi32>
    %c0_1 = arith.constant 0 : index
    %c0_2 = arith.constant 0 : index
    %1 = vector.load %arg1[%c0_1, %c0_2] : memref<64x16xf32, #tpu.memory_space<vmem>>, vector<64x16xf32>
    %c0_3 = arith.constant 0 : index
    %c0_4 = arith.constant 0 : index
    %2 = vector.load %arg2[%c0_3, %c0_4] : memref<56x16xf32, #tpu.memory_space<vmem>>, vector<56x16xf32>
    %c0_5 = arith.constant 0 : index
    %c0_6 = arith.constant 0 : index
    %c0_7 = arith.constant 0 : index
    %3 = vector.load %arg3[%c0_5, %c0_6, %c0_7] : memref<3x16x96xf32, #tpu.memory_space<vmem>>, vector<3x16x96xf32>
    %c0_8 = arith.constant 0 : index
    %c0_9 = arith.constant 0 : index
    %c0_10 = arith.constant 0 : index
    %4 = vector.load %arg4[%c0_8, %c0_9, %c0_10] : memref<3x32x96xf32, #tpu.memory_space<vmem>>, vector<3x32x96xf32>
    %c0_11 = arith.constant 0 : index
    %c0_12 = arith.constant 0 : index
    %5 = vector.load %arg5[%c0_11, %c0_12] : memref<3x128xf32, #tpu.memory_space<vmem>>, vector<3x128xf32>
    %6 = vector.extract_strided_slice %3 {offsets = [0, 0, 0], sizes = [1, 16, 96], strides = [1, 1, 1]} : vector<3x16x96xf32> to vector<1x16x96xf32>
    %7 = vector.shape_cast %6 : vector<1x16x96xf32> to vector<16x96xf32>
    %cst = arith.constant dense<0.000000e+00> : vector<64x96xf32>
    %8 = tpu.matmul %1, %7, %cst {dimension_numbers = #tpu.dot_dimension_numbers<[1], [0], [0], [1], [0, 0, 1, 1], [], []>} : vector<64x16xf32>, vector<16x96xf32>, vector<64x96xf32> -> vector<64x96xf32>
    %9 = vector.extract_strided_slice %5 {offsets = [0, 0], sizes = [1, 96], strides = [1, 1]} : vector<3x128xf32> to vector<1x96xf32>
    %10 = vector.broadcast %9 : vector<1x96xf32> to vector<64x96xf32>
    %11 = arith.addf %8, %10 : vector<64x96xf32>
    %12 = vector.extract_strided_slice %3 {offsets = [1, 0, 0], sizes = [1, 16, 96], strides = [1, 1, 1]} : vector<3x16x96xf32> to vector<1x16x96xf32>
    %13 = vector.shape_cast %12 : vector<1x16x96xf32> to vector<16x96xf32>
    %cst_13 = arith.constant dense<0.000000e+00> : vector<64x96xf32>
    %14 = tpu.matmul %1, %13, %cst_13 {dimension_numbers = #tpu.dot_dimension_numbers<[1], [0], [0], [1], [0, 0, 1, 1], [], []>} : vector<64x16xf32>, vector<16x96xf32>, vector<64x96xf32> -> vector<64x96xf32>
    %15 = vector.extract_strided_slice %5 {offsets = [1, 0], sizes = [1, 96], strides = [1, 1]} : vector<3x128xf32> to vector<1x96xf32>
    %16 = vector.broadcast %15 : vector<1x96xf32> to vector<64x96xf32>
    %17 = arith.addf %14, %16 : vector<64x96xf32>
    %18 = vector.extract_strided_slice %3 {offsets = [2, 0, 0], sizes = [1, 16, 96], strides = [1, 1, 1]} : vector<3x16x96xf32> to vector<1x16x96xf32>
    %19 = vector.shape_cast %18 : vector<1x16x96xf32> to vector<16x96xf32>
    %cst_14 = arith.constant dense<0.000000e+00> : vector<56x96xf32>
    %20 = tpu.matmul %2, %19, %cst_14 {dimension_numbers = #tpu.dot_dimension_numbers<[1], [0], [0], [1], [0, 0, 1, 1], [], []>} : vector<56x16xf32>, vector<16x96xf32>, vector<56x96xf32> -> vector<56x96xf32>
    %21 = vector.extract_strided_slice %5 {offsets = [2, 0], sizes = [1, 96], strides = [1, 1]} : vector<3x128xf32> to vector<1x96xf32>
    %22 = vector.broadcast %21 : vector<1x96xf32> to vector<56x96xf32>
    %23 = arith.addf %20, %22 : vector<56x96xf32>
    %24 = vector.extract_strided_slice %4 {offsets = [0, 0, 0], sizes = [1, 32, 96], strides = [1, 1, 1]} : vector<3x32x96xf32> to vector<1x32x96xf32>
    %25 = vector.shape_cast %24 : vector<1x32x96xf32> to vector<32x96xf32>
    %26 = vector.extract_strided_slice %4 {offsets = [1, 0, 0], sizes = [1, 32, 96], strides = [1, 1, 1]} : vector<3x32x96xf32> to vector<1x32x96xf32>
    %27 = vector.shape_cast %26 : vector<1x32x96xf32> to vector<32x96xf32>
    %28 = vector.extract_strided_slice %4 {offsets = [2, 0, 0], sizes = [1, 32, 96], strides = [1, 1, 1]} : vector<3x32x96xf32> to vector<1x32x96xf32>
    %29 = vector.shape_cast %28 : vector<1x32x96xf32> to vector<32x96xf32>
    %30 = vector.extract_strided_slice %5 {offsets = [0, 96], sizes = [1, 32], strides = [1, 1]} : vector<3x128xf32> to vector<1x32xf32>
    %31 = vector.extract_strided_slice %5 {offsets = [1, 96], sizes = [1, 32], strides = [1, 1]} : vector<3x128xf32> to vector<1x32xf32>
    %32 = vector.extract_strided_slice %5 {offsets = [2, 96], sizes = [1, 32], strides = [1, 1]} : vector<3x128xf32> to vector<1x32xf32>
    %cst_15 = arith.constant 0.000000e+00 : f32
    %33 = vector.broadcast %cst_15 : f32 to vector<8x32xf32>
    %cst_16 = arith.constant 0.000000e+00 : f32
    %34 = vector.broadcast %cst_16 : f32 to vector<8x32xf32>
    %35 = vector.extract_strided_slice %11 {offsets = [0, 0], sizes = [8, 96], strides = [1, 1]} : vector<64x96xf32> to vector<8x96xf32>
    %cst_17 = arith.constant dense<0.000000e+00> : vector<8x96xf32>
    %36 = tpu.matmul %33, %25, %cst_17 {dimension_numbers = #tpu.dot_dimension_numbers<[1], [0], [0], [1], [0, 0, 1, 1], [], []>} : vector<8x32xf32>, vector<32x96xf32>, vector<8x96xf32> -> vector<8x96xf32>
    %37 = vector.extract_strided_slice %35 {offsets = [0, 0], sizes = [8, 64], strides = [1, 1]} : vector<8x96xf32> to vector<8x64xf32>
    %38 = vector.extract_strided_slice %36 {offsets = [0, 0], sizes = [8, 64], strides = [1, 1]} : vector<8x96xf32> to vector<8x64xf32>
    %39 = arith.addf %37, %38 : vector<8x64xf32>
    %40 = arith.negf %39 : vector<8x64xf32>
    %41 = math.exp %40 : vector<8x64xf32>
    %cst_18 = arith.constant 1.000000e+00 : f32
    %42 = vector.broadcast %cst_18 : f32 to vector<8x64xf32>
    %43 = arith.addf %42, %41 : vector<8x64xf32>
    %44 = arith.divf %42, %43 : vector<8x64xf32>
    %45 = vector.extract_strided_slice %44 {offsets = [0, 0], sizes = [8, 32], strides = [1, 1]} : vector<8x64xf32> to vector<8x32xf32>
    %46 = vector.extract_strided_slice %44 {offsets = [0, 32], sizes = [8, 32], strides = [1, 1]} : vector<8x64xf32> to vector<8x32xf32>
    %47 = vector.extract_strided_slice %35 {offsets = [0, 64], sizes = [8, 32], strides = [1, 1]} : vector<8x96xf32> to vector<8x32xf32>
    %48 = vector.extract_strided_slice %36 {offsets = [0, 64], sizes = [8, 32], strides = [1, 1]} : vector<8x96xf32> to vector<8x32xf32>
    %49 = vector.broadcast %30 : vector<1x32xf32> to vector<8x32xf32>
    %50 = arith.addf %48, %49 : vector<8x32xf32>
    %51 = arith.mulf %45, %50 : vector<8x32xf32>
    %52 = arith.addf %47, %51 : vector<8x32xf32>
    %53 = math.tanh %52 : vector<8x32xf32>
    %cst_19 = arith.constant 1.000000e+00 : f32
    %54 = vector.broadcast %cst_19 : f32 to vector<8x32xf32>
    %55 = arith.subf %54, %46 : vector<8x32xf32>
    %56 = arith.mulf %55, %53 : vector<8x32xf32>
    %57 = arith.mulf %46, %33 : vector<8x32xf32>
    %58 = arith.addf %56, %57 : vector<8x32xf32>
    %59 = vector.extract_strided_slice %17 {offsets = [56, 0], sizes = [8, 96], strides = [1, 1]} : vector<64x96xf32> to vector<8x96xf32>
    %cst_20 = arith.constant dense<0.000000e+00> : vector<8x96xf32>
    %60 = tpu.matmul %34, %27, %cst_20 {dimension_numbers = #tpu.dot_dimension_numbers<[1], [0], [0], [1], [0, 0, 1, 1], [], []>} : vector<8x32xf32>, vector<32x96xf32>, vector<8x96xf32> -> vector<8x96xf32>
    %61 = vector.extract_strided_slice %59 {offsets = [0, 0], sizes = [8, 64], strides = [1, 1]} : vector<8x96xf32> to vector<8x64xf32>
    %62 = vector.extract_strided_slice %60 {offsets = [0, 0], sizes = [8, 64], strides = [1, 1]} : vector<8x96xf32> to vector<8x64xf32>
    %63 = arith.addf %61, %62 : vector<8x64xf32>
    %64 = arith.negf %63 : vector<8x64xf32>
    %65 = math.exp %64 : vector<8x64xf32>
    %cst_21 = arith.constant 1.000000e+00 : f32
    %66 = vector.broadcast %cst_21 : f32 to vector<8x64xf32>
    %67 = arith.addf %66, %65 : vector<8x64xf32>
    %68 = arith.divf %66, %67 : vector<8x64xf32>
    %69 = vector.extract_strided_slice %68 {offsets = [0, 0], sizes = [8, 32], strides = [1, 1]} : vector<8x64xf32> to vector<8x32xf32>
    %70 = vector.extract_strided_slice %68 {offsets = [0, 32], sizes = [8, 32], strides = [1, 1]} : vector<8x64xf32> to vector<8x32xf32>
    %71 = vector.extract_strided_slice %59 {offsets = [0, 64], sizes = [8, 32], strides = [1, 1]} : vector<8x96xf32> to vector<8x32xf32>
    %72 = vector.extract_strided_slice %60 {offsets = [0, 64], sizes = [8, 32], strides = [1, 1]} : vector<8x96xf32> to vector<8x32xf32>
    %73 = vector.broadcast %31 : vector<1x32xf32> to vector<8x32xf32>
    %74 = arith.addf %72, %73 : vector<8x32xf32>
    %75 = arith.mulf %69, %74 : vector<8x32xf32>
    %76 = arith.addf %71, %75 : vector<8x32xf32>
    %77 = math.tanh %76 : vector<8x32xf32>
    %cst_22 = arith.constant 1.000000e+00 : f32
    %78 = vector.broadcast %cst_22 : f32 to vector<8x32xf32>
    %79 = arith.subf %78, %70 : vector<8x32xf32>
    %80 = arith.mulf %79, %77 : vector<8x32xf32>
    %81 = arith.mulf %70, %34 : vector<8x32xf32>
    %82 = arith.addf %80, %81 : vector<8x32xf32>
    %c0_i32 = arith.constant 0 : i32
    %83 = vector.broadcast %c0_i32 : i32 to vector<8x1xi32>
    %84 = arith.cmpi sgt, %0, %83 : vector<8x1xi32>
    %85 = vector.shape_cast %84 : vector<8x1xi1> to vector<8x1xi1>
    %86 = vector.broadcast %85 : vector<8x1xi1> to vector<8x32xi1>
    %87 = arith.select %86, %58, %33 : vector<8x32xi1>, vector<8x32xf32>
    %c7_i32 = arith.constant 7 : i32
    %88 = vector.broadcast %c7_i32 : i32 to vector<8x1xi32>
    %89 = arith.cmpi sgt, %0, %88 : vector<8x1xi32>
    %90 = vector.shape_cast %89 : vector<8x1xi1> to vector<8x1xi1>
    %91 = vector.broadcast %90 : vector<8x1xi1> to vector<8x32xi1>
    %92 = arith.select %91, %82, %34 : vector<8x32xi1>, vector<8x32xf32>
    %93 = vector.extract_strided_slice %11 {offsets = [8, 0], sizes = [8, 96], strides = [1, 1]} : vector<64x96xf32> to vector<8x96xf32>
    %cst_23 = arith.constant dense<0.000000e+00> : vector<8x96xf32>
    %94 = tpu.matmul %87, %25, %cst_23 {dimension_numbers = #tpu.dot_dimension_numbers<[1], [0], [0], [1], [0, 0, 1, 1], [], []>} : vector<8x32xf32>, vector<32x96xf32>, vector<8x96xf32> -> vector<8x96xf32>
    %95 = vector.extract_strided_slice %93 {offsets = [0, 0], sizes = [8, 64], strides = [1, 1]} : vector<8x96xf32> to vector<8x64xf32>
    %96 = vector.extract_strided_slice %94 {offsets = [0, 0], sizes = [8, 64], strides = [1, 1]} : vector<8x96xf32> to vector<8x64xf32>
    %97 = arith.addf %95, %96 : vector<8x64xf32>
    %98 = arith.negf %97 : vector<8x64xf32>
    %99 = math.exp %98 : vector<8x64xf32>
    %cst_24 = arith.constant 1.000000e+00 : f32
    %100 = vector.broadcast %cst_24 : f32 to vector<8x64xf32>
    %101 = arith.addf %100, %99 : vector<8x64xf32>
    %102 = arith.divf %100, %101 : vector<8x64xf32>
    %103 = vector.extract_strided_slice %102 {offsets = [0, 0], sizes = [8, 32], strides = [1, 1]} : vector<8x64xf32> to vector<8x32xf32>
    %104 = vector.extract_strided_slice %102 {offsets = [0, 32], sizes = [8, 32], strides = [1, 1]} : vector<8x64xf32> to vector<8x32xf32>
    %105 = vector.extract_strided_slice %93 {offsets = [0, 64], sizes = [8, 32], strides = [1, 1]} : vector<8x96xf32> to vector<8x32xf32>
    %106 = vector.extract_strided_slice %94 {offsets = [0, 64], sizes = [8, 32], strides = [1, 1]} : vector<8x96xf32> to vector<8x32xf32>
    %107 = vector.broadcast %30 : vector<1x32xf32> to vector<8x32xf32>
    %108 = arith.addf %106, %107 : vector<8x32xf32>
    %109 = arith.mulf %103, %108 : vector<8x32xf32>
    %110 = arith.addf %105, %109 : vector<8x32xf32>
    %111 = math.tanh %110 : vector<8x32xf32>
    %cst_25 = arith.constant 1.000000e+00 : f32
    %112 = vector.broadcast %cst_25 : f32 to vector<8x32xf32>
    %113 = arith.subf %112, %104 : vector<8x32xf32>
    %114 = arith.mulf %113, %111 : vector<8x32xf32>
    %115 = arith.mulf %104, %87 : vector<8x32xf32>
    %116 = arith.addf %114, %115 : vector<8x32xf32>
    %117 = vector.extract_strided_slice %17 {offsets = [48, 0], sizes = [8, 96], strides = [1, 1]} : vector<64x96xf32> to vector<8x96xf32>
    %cst_26 = arith.constant dense<0.000000e+00> : vector<8x96xf32>
    %118 = tpu.matmul %92, %27, %cst_26 {dimension_numbers = #tpu.dot_dimension_numbers<[1], [0], [0], [1], [0, 0, 1, 1], [], []>} : vector<8x32xf32>, vector<32x96xf32>, vector<8x96xf32> -> vector<8x96xf32>
    %119 = vector.extract_strided_slice %117 {offsets = [0, 0], sizes = [8, 64], strides = [1, 1]} : vector<8x96xf32> to vector<8x64xf32>
    %120 = vector.extract_strided_slice %118 {offsets = [0, 0], sizes = [8, 64], strides = [1, 1]} : vector<8x96xf32> to vector<8x64xf32>
    %121 = arith.addf %119, %120 : vector<8x64xf32>
    %122 = arith.negf %121 : vector<8x64xf32>
    %123 = math.exp %122 : vector<8x64xf32>
    %cst_27 = arith.constant 1.000000e+00 : f32
    %124 = vector.broadcast %cst_27 : f32 to vector<8x64xf32>
    %125 = arith.addf %124, %123 : vector<8x64xf32>
    %126 = arith.divf %124, %125 : vector<8x64xf32>
    %127 = vector.extract_strided_slice %126 {offsets = [0, 0], sizes = [8, 32], strides = [1, 1]} : vector<8x64xf32> to vector<8x32xf32>
    %128 = vector.extract_strided_slice %126 {offsets = [0, 32], sizes = [8, 32], strides = [1, 1]} : vector<8x64xf32> to vector<8x32xf32>
    %129 = vector.extract_strided_slice %117 {offsets = [0, 64], sizes = [8, 32], strides = [1, 1]} : vector<8x96xf32> to vector<8x32xf32>
    %130 = vector.extract_strided_slice %118 {offsets = [0, 64], sizes = [8, 32], strides = [1, 1]} : vector<8x96xf32> to vector<8x32xf32>
    %131 = vector.broadcast %31 : vector<1x32xf32> to vector<8x32xf32>
    %132 = arith.addf %130, %131 : vector<8x32xf32>
    %133 = arith.mulf %127, %132 : vector<8x32xf32>
    %134 = arith.addf %129, %133 : vector<8x32xf32>
    %135 = math.tanh %134 : vector<8x32xf32>
    %cst_28 = arith.constant 1.000000e+00 : f32
    %136 = vector.broadcast %cst_28 : f32 to vector<8x32xf32>
    %137 = arith.subf %136, %128 : vector<8x32xf32>
    %138 = arith.mulf %137, %135 : vector<8x32xf32>
    %139 = arith.mulf %128, %92 : vector<8x32xf32>
    %140 = arith.addf %138, %139 : vector<8x32xf32>
    %c1_i32 = arith.constant 1 : i32
    %141 = vector.broadcast %c1_i32 : i32 to vector<8x1xi32>
    %142 = arith.cmpi sgt, %0, %141 : vector<8x1xi32>
    %143 = vector.shape_cast %142 : vector<8x1xi1> to vector<8x1xi1>
    %144 = vector.broadcast %143 : vector<8x1xi1> to vector<8x32xi1>
    %145 = arith.select %144, %116, %87 : vector<8x32xi1>, vector<8x32xf32>
    %c6_i32 = arith.constant 6 : i32
    %146 = vector.broadcast %c6_i32 : i32 to vector<8x1xi32>
    %147 = arith.cmpi sgt, %0, %146 : vector<8x1xi32>
    %148 = vector.shape_cast %147 : vector<8x1xi1> to vector<8x1xi1>
    %149 = vector.broadcast %148 : vector<8x1xi1> to vector<8x32xi1>
    %150 = arith.select %149, %140, %92 : vector<8x32xi1>, vector<8x32xf32>
    %151 = vector.extract_strided_slice %11 {offsets = [16, 0], sizes = [8, 96], strides = [1, 1]} : vector<64x96xf32> to vector<8x96xf32>
    %cst_29 = arith.constant dense<0.000000e+00> : vector<8x96xf32>
    %152 = tpu.matmul %145, %25, %cst_29 {dimension_numbers = #tpu.dot_dimension_numbers<[1], [0], [0], [1], [0, 0, 1, 1], [], []>} : vector<8x32xf32>, vector<32x96xf32>, vector<8x96xf32> -> vector<8x96xf32>
    %153 = vector.extract_strided_slice %151 {offsets = [0, 0], sizes = [8, 64], strides = [1, 1]} : vector<8x96xf32> to vector<8x64xf32>
    %154 = vector.extract_strided_slice %152 {offsets = [0, 0], sizes = [8, 64], strides = [1, 1]} : vector<8x96xf32> to vector<8x64xf32>
    %155 = arith.addf %153, %154 : vector<8x64xf32>
    %156 = arith.negf %155 : vector<8x64xf32>
    %157 = math.exp %156 : vector<8x64xf32>
    %cst_30 = arith.constant 1.000000e+00 : f32
    %158 = vector.broadcast %cst_30 : f32 to vector<8x64xf32>
    %159 = arith.addf %158, %157 : vector<8x64xf32>
    %160 = arith.divf %158, %159 : vector<8x64xf32>
    %161 = vector.extract_strided_slice %160 {offsets = [0, 0], sizes = [8, 32], strides = [1, 1]} : vector<8x64xf32> to vector<8x32xf32>
    %162 = vector.extract_strided_slice %160 {offsets = [0, 32], sizes = [8, 32], strides = [1, 1]} : vector<8x64xf32> to vector<8x32xf32>
    %163 = vector.extract_strided_slice %151 {offsets = [0, 64], sizes = [8, 32], strides = [1, 1]} : vector<8x96xf32> to vector<8x32xf32>
    %164 = vector.extract_strided_slice %152 {offsets = [0, 64], sizes = [8, 32], strides = [1, 1]} : vector<8x96xf32> to vector<8x32xf32>
    %165 = vector.broadcast %30 : vector<1x32xf32> to vector<8x32xf32>
    %166 = arith.addf %164, %165 : vector<8x32xf32>
    %167 = arith.mulf %161, %166 : vector<8x32xf32>
    %168 = arith.addf %163, %167 : vector<8x32xf32>
    %169 = math.tanh %168 : vector<8x32xf32>
    %cst_31 = arith.constant 1.000000e+00 : f32
    %170 = vector.broadcast %cst_31 : f32 to vector<8x32xf32>
    %171 = arith.subf %170, %162 : vector<8x32xf32>
    %172 = arith.mulf %171, %169 : vector<8x32xf32>
    %173 = arith.mulf %162, %145 : vector<8x32xf32>
    %174 = arith.addf %172, %173 : vector<8x32xf32>
    %175 = vector.extract_strided_slice %17 {offsets = [40, 0], sizes = [8, 96], strides = [1, 1]} : vector<64x96xf32> to vector<8x96xf32>
    %cst_32 = arith.constant dense<0.000000e+00> : vector<8x96xf32>
    %176 = tpu.matmul %150, %27, %cst_32 {dimension_numbers = #tpu.dot_dimension_numbers<[1], [0], [0], [1], [0, 0, 1, 1], [], []>} : vector<8x32xf32>, vector<32x96xf32>, vector<8x96xf32> -> vector<8x96xf32>
    %177 = vector.extract_strided_slice %175 {offsets = [0, 0], sizes = [8, 64], strides = [1, 1]} : vector<8x96xf32> to vector<8x64xf32>
    %178 = vector.extract_strided_slice %176 {offsets = [0, 0], sizes = [8, 64], strides = [1, 1]} : vector<8x96xf32> to vector<8x64xf32>
    %179 = arith.addf %177, %178 : vector<8x64xf32>
    %180 = arith.negf %179 : vector<8x64xf32>
    %181 = math.exp %180 : vector<8x64xf32>
    %cst_33 = arith.constant 1.000000e+00 : f32
    %182 = vector.broadcast %cst_33 : f32 to vector<8x64xf32>
    %183 = arith.addf %182, %181 : vector<8x64xf32>
    %184 = arith.divf %182, %183 : vector<8x64xf32>
    %185 = vector.extract_strided_slice %184 {offsets = [0, 0], sizes = [8, 32], strides = [1, 1]} : vector<8x64xf32> to vector<8x32xf32>
    %186 = vector.extract_strided_slice %184 {offsets = [0, 32], sizes = [8, 32], strides = [1, 1]} : vector<8x64xf32> to vector<8x32xf32>
    %187 = vector.extract_strided_slice %175 {offsets = [0, 64], sizes = [8, 32], strides = [1, 1]} : vector<8x96xf32> to vector<8x32xf32>
    %188 = vector.extract_strided_slice %176 {offsets = [0, 64], sizes = [8, 32], strides = [1, 1]} : vector<8x96xf32> to vector<8x32xf32>
    %189 = vector.broadcast %31 : vector<1x32xf32> to vector<8x32xf32>
    %190 = arith.addf %188, %189 : vector<8x32xf32>
    %191 = arith.mulf %185, %190 : vector<8x32xf32>
    %192 = arith.addf %187, %191 : vector<8x32xf32>
    %193 = math.tanh %192 : vector<8x32xf32>
    %cst_34 = arith.constant 1.000000e+00 : f32
    %194 = vector.broadcast %cst_34 : f32 to vector<8x32xf32>
    %195 = arith.subf %194, %186 : vector<8x32xf32>
    %196 = arith.mulf %195, %193 : vector<8x32xf32>
    %197 = arith.mulf %186, %150 : vector<8x32xf32>
    %198 = arith.addf %196, %197 : vector<8x32xf32>
    %c2_i32 = arith.constant 2 : i32
    %199 = vector.broadcast %c2_i32 : i32 to vector<8x1xi32>
    %200 = arith.cmpi sgt, %0, %199 : vector<8x1xi32>
    %201 = vector.shape_cast %200 : vector<8x1xi1> to vector<8x1xi1>
    %202 = vector.broadcast %201 : vector<8x1xi1> to vector<8x32xi1>
    %203 = arith.select %202, %174, %145 : vector<8x32xi1>, vector<8x32xf32>
    %c5_i32 = arith.constant 5 : i32
    %204 = vector.broadcast %c5_i32 : i32 to vector<8x1xi32>
    %205 = arith.cmpi sgt, %0, %204 : vector<8x1xi32>
    %206 = vector.shape_cast %205 : vector<8x1xi1> to vector<8x1xi1>
    %207 = vector.broadcast %206 : vector<8x1xi1> to vector<8x32xi1>
    %208 = arith.select %207, %198, %150 : vector<8x32xi1>, vector<8x32xf32>
    %209 = vector.extract_strided_slice %11 {offsets = [24, 0], sizes = [8, 96], strides = [1, 1]} : vector<64x96xf32> to vector<8x96xf32>
    %cst_35 = arith.constant dense<0.000000e+00> : vector<8x96xf32>
    %210 = tpu.matmul %203, %25, %cst_35 {dimension_numbers = #tpu.dot_dimension_numbers<[1], [0], [0], [1], [0, 0, 1, 1], [], []>} : vector<8x32xf32>, vector<32x96xf32>, vector<8x96xf32> -> vector<8x96xf32>
    %211 = vector.extract_strided_slice %209 {offsets = [0, 0], sizes = [8, 64], strides = [1, 1]} : vector<8x96xf32> to vector<8x64xf32>
    %212 = vector.extract_strided_slice %210 {offsets = [0, 0], sizes = [8, 64], strides = [1, 1]} : vector<8x96xf32> to vector<8x64xf32>
    %213 = arith.addf %211, %212 : vector<8x64xf32>
    %214 = arith.negf %213 : vector<8x64xf32>
    %215 = math.exp %214 : vector<8x64xf32>
    %cst_36 = arith.constant 1.000000e+00 : f32
    %216 = vector.broadcast %cst_36 : f32 to vector<8x64xf32>
    %217 = arith.addf %216, %215 : vector<8x64xf32>
    %218 = arith.divf %216, %217 : vector<8x64xf32>
    %219 = vector.extract_strided_slice %218 {offsets = [0, 0], sizes = [8, 32], strides = [1, 1]} : vector<8x64xf32> to vector<8x32xf32>
    %220 = vector.extract_strided_slice %218 {offsets = [0, 32], sizes = [8, 32], strides = [1, 1]} : vector<8x64xf32> to vector<8x32xf32>
    %221 = vector.extract_strided_slice %209 {offsets = [0, 64], sizes = [8, 32], strides = [1, 1]} : vector<8x96xf32> to vector<8x32xf32>
    %222 = vector.extract_strided_slice %210 {offsets = [0, 64], sizes = [8, 32], strides = [1, 1]} : vector<8x96xf32> to vector<8x32xf32>
    %223 = vector.broadcast %30 : vector<1x32xf32> to vector<8x32xf32>
    %224 = arith.addf %222, %223 : vector<8x32xf32>
    %225 = arith.mulf %219, %224 : vector<8x32xf32>
    %226 = arith.addf %221, %225 : vector<8x32xf32>
    %227 = math.tanh %226 : vector<8x32xf32>
    %cst_37 = arith.constant 1.000000e+00 : f32
    %228 = vector.broadcast %cst_37 : f32 to vector<8x32xf32>
    %229 = arith.subf %228, %220 : vector<8x32xf32>
    %230 = arith.mulf %229, %227 : vector<8x32xf32>
    %231 = arith.mulf %220, %203 : vector<8x32xf32>
    %232 = arith.addf %230, %231 : vector<8x32xf32>
    %233 = vector.extract_strided_slice %17 {offsets = [32, 0], sizes = [8, 96], strides = [1, 1]} : vector<64x96xf32> to vector<8x96xf32>
    %cst_38 = arith.constant dense<0.000000e+00> : vector<8x96xf32>
    %234 = tpu.matmul %208, %27, %cst_38 {dimension_numbers = #tpu.dot_dimension_numbers<[1], [0], [0], [1], [0, 0, 1, 1], [], []>} : vector<8x32xf32>, vector<32x96xf32>, vector<8x96xf32> -> vector<8x96xf32>
    %235 = vector.extract_strided_slice %233 {offsets = [0, 0], sizes = [8, 64], strides = [1, 1]} : vector<8x96xf32> to vector<8x64xf32>
    %236 = vector.extract_strided_slice %234 {offsets = [0, 0], sizes = [8, 64], strides = [1, 1]} : vector<8x96xf32> to vector<8x64xf32>
    %237 = arith.addf %235, %236 : vector<8x64xf32>
    %238 = arith.negf %237 : vector<8x64xf32>
    %239 = math.exp %238 : vector<8x64xf32>
    %cst_39 = arith.constant 1.000000e+00 : f32
    %240 = vector.broadcast %cst_39 : f32 to vector<8x64xf32>
    %241 = arith.addf %240, %239 : vector<8x64xf32>
    %242 = arith.divf %240, %241 : vector<8x64xf32>
    %243 = vector.extract_strided_slice %242 {offsets = [0, 0], sizes = [8, 32], strides = [1, 1]} : vector<8x64xf32> to vector<8x32xf32>
    %244 = vector.extract_strided_slice %242 {offsets = [0, 32], sizes = [8, 32], strides = [1, 1]} : vector<8x64xf32> to vector<8x32xf32>
    %245 = vector.extract_strided_slice %233 {offsets = [0, 64], sizes = [8, 32], strides = [1, 1]} : vector<8x96xf32> to vector<8x32xf32>
    %246 = vector.extract_strided_slice %234 {offsets = [0, 64], sizes = [8, 32], strides = [1, 1]} : vector<8x96xf32> to vector<8x32xf32>
    %247 = vector.broadcast %31 : vector<1x32xf32> to vector<8x32xf32>
    %248 = arith.addf %246, %247 : vector<8x32xf32>
    %249 = arith.mulf %243, %248 : vector<8x32xf32>
    %250 = arith.addf %245, %249 : vector<8x32xf32>
    %251 = math.tanh %250 : vector<8x32xf32>
    %cst_40 = arith.constant 1.000000e+00 : f32
    %252 = vector.broadcast %cst_40 : f32 to vector<8x32xf32>
    %253 = arith.subf %252, %244 : vector<8x32xf32>
    %254 = arith.mulf %253, %251 : vector<8x32xf32>
    %255 = arith.mulf %244, %208 : vector<8x32xf32>
    %256 = arith.addf %254, %255 : vector<8x32xf32>
    %c3_i32 = arith.constant 3 : i32
    %257 = vector.broadcast %c3_i32 : i32 to vector<8x1xi32>
    %258 = arith.cmpi sgt, %0, %257 : vector<8x1xi32>
    %259 = vector.shape_cast %258 : vector<8x1xi1> to vector<8x1xi1>
    %260 = vector.broadcast %259 : vector<8x1xi1> to vector<8x32xi1>
    %261 = arith.select %260, %232, %203 : vector<8x32xi1>, vector<8x32xf32>
    %c4_i32 = arith.constant 4 : i32
    %262 = vector.broadcast %c4_i32 : i32 to vector<8x1xi32>
    %263 = arith.cmpi sgt, %0, %262 : vector<8x1xi32>
    %264 = vector.shape_cast %263 : vector<8x1xi1> to vector<8x1xi1>
    %265 = vector.broadcast %264 : vector<8x1xi1> to vector<8x32xi1>
    %266 = arith.select %265, %256, %208 : vector<8x32xi1>, vector<8x32xf32>
    %267 = vector.extract_strided_slice %11 {offsets = [32, 0], sizes = [8, 96], strides = [1, 1]} : vector<64x96xf32> to vector<8x96xf32>
    %cst_41 = arith.constant dense<0.000000e+00> : vector<8x96xf32>
    %268 = tpu.matmul %261, %25, %cst_41 {dimension_numbers = #tpu.dot_dimension_numbers<[1], [0], [0], [1], [0, 0, 1, 1], [], []>} : vector<8x32xf32>, vector<32x96xf32>, vector<8x96xf32> -> vector<8x96xf32>
    %269 = vector.extract_strided_slice %267 {offsets = [0, 0], sizes = [8, 64], strides = [1, 1]} : vector<8x96xf32> to vector<8x64xf32>
    %270 = vector.extract_strided_slice %268 {offsets = [0, 0], sizes = [8, 64], strides = [1, 1]} : vector<8x96xf32> to vector<8x64xf32>
    %271 = arith.addf %269, %270 : vector<8x64xf32>
    %272 = arith.negf %271 : vector<8x64xf32>
    %273 = math.exp %272 : vector<8x64xf32>
    %cst_42 = arith.constant 1.000000e+00 : f32
    %274 = vector.broadcast %cst_42 : f32 to vector<8x64xf32>
    %275 = arith.addf %274, %273 : vector<8x64xf32>
    %276 = arith.divf %274, %275 : vector<8x64xf32>
    %277 = vector.extract_strided_slice %276 {offsets = [0, 0], sizes = [8, 32], strides = [1, 1]} : vector<8x64xf32> to vector<8x32xf32>
    %278 = vector.extract_strided_slice %276 {offsets = [0, 32], sizes = [8, 32], strides = [1, 1]} : vector<8x64xf32> to vector<8x32xf32>
    %279 = vector.extract_strided_slice %267 {offsets = [0, 64], sizes = [8, 32], strides = [1, 1]} : vector<8x96xf32> to vector<8x32xf32>
    %280 = vector.extract_strided_slice %268 {offsets = [0, 64], sizes = [8, 32], strides = [1, 1]} : vector<8x96xf32> to vector<8x32xf32>
    %281 = vector.broadcast %30 : vector<1x32xf32> to vector<8x32xf32>
    %282 = arith.addf %280, %281 : vector<8x32xf32>
    %283 = arith.mulf %277, %282 : vector<8x32xf32>
    %284 = arith.addf %279, %283 : vector<8x32xf32>
    %285 = math.tanh %284 : vector<8x32xf32>
    %cst_43 = arith.constant 1.000000e+00 : f32
    %286 = vector.broadcast %cst_43 : f32 to vector<8x32xf32>
    %287 = arith.subf %286, %278 : vector<8x32xf32>
    %288 = arith.mulf %287, %285 : vector<8x32xf32>
    %289 = arith.mulf %278, %261 : vector<8x32xf32>
    %290 = arith.addf %288, %289 : vector<8x32xf32>
    %291 = vector.extract_strided_slice %17 {offsets = [24, 0], sizes = [8, 96], strides = [1, 1]} : vector<64x96xf32> to vector<8x96xf32>
    %cst_44 = arith.constant dense<0.000000e+00> : vector<8x96xf32>
    %292 = tpu.matmul %266, %27, %cst_44 {dimension_numbers = #tpu.dot_dimension_numbers<[1], [0], [0], [1], [0, 0, 1, 1], [], []>} : vector<8x32xf32>, vector<32x96xf32>, vector<8x96xf32> -> vector<8x96xf32>
    %293 = vector.extract_strided_slice %291 {offsets = [0, 0], sizes = [8, 64], strides = [1, 1]} : vector<8x96xf32> to vector<8x64xf32>
    %294 = vector.extract_strided_slice %292 {offsets = [0, 0], sizes = [8, 64], strides = [1, 1]} : vector<8x96xf32> to vector<8x64xf32>
    %295 = arith.addf %293, %294 : vector<8x64xf32>
    %296 = arith.negf %295 : vector<8x64xf32>
    %297 = math.exp %296 : vector<8x64xf32>
    %cst_45 = arith.constant 1.000000e+00 : f32
    %298 = vector.broadcast %cst_45 : f32 to vector<8x64xf32>
    %299 = arith.addf %298, %297 : vector<8x64xf32>
    %300 = arith.divf %298, %299 : vector<8x64xf32>
    %301 = vector.extract_strided_slice %300 {offsets = [0, 0], sizes = [8, 32], strides = [1, 1]} : vector<8x64xf32> to vector<8x32xf32>
    %302 = vector.extract_strided_slice %300 {offsets = [0, 32], sizes = [8, 32], strides = [1, 1]} : vector<8x64xf32> to vector<8x32xf32>
    %303 = vector.extract_strided_slice %291 {offsets = [0, 64], sizes = [8, 32], strides = [1, 1]} : vector<8x96xf32> to vector<8x32xf32>
    %304 = vector.extract_strided_slice %292 {offsets = [0, 64], sizes = [8, 32], strides = [1, 1]} : vector<8x96xf32> to vector<8x32xf32>
    %305 = vector.broadcast %31 : vector<1x32xf32> to vector<8x32xf32>
    %306 = arith.addf %304, %305 : vector<8x32xf32>
    %307 = arith.mulf %301, %306 : vector<8x32xf32>
    %308 = arith.addf %303, %307 : vector<8x32xf32>
    %309 = math.tanh %308 : vector<8x32xf32>
    %cst_46 = arith.constant 1.000000e+00 : f32
    %310 = vector.broadcast %cst_46 : f32 to vector<8x32xf32>
    %311 = arith.subf %310, %302 : vector<8x32xf32>
    %312 = arith.mulf %311, %309 : vector<8x32xf32>
    %313 = arith.mulf %302, %266 : vector<8x32xf32>
    %314 = arith.addf %312, %313 : vector<8x32xf32>
    %c4_i32_47 = arith.constant 4 : i32
    %315 = vector.broadcast %c4_i32_47 : i32 to vector<8x1xi32>
    %316 = arith.cmpi sgt, %0, %315 : vector<8x1xi32>
    %317 = vector.shape_cast %316 : vector<8x1xi1> to vector<8x1xi1>
    %318 = vector.broadcast %317 : vector<8x1xi1> to vector<8x32xi1>
    %319 = arith.select %318, %290, %261 : vector<8x32xi1>, vector<8x32xf32>
    %c3_i32_48 = arith.constant 3 : i32
    %320 = vector.broadcast %c3_i32_48 : i32 to vector<8x1xi32>
    %321 = arith.cmpi sgt, %0, %320 : vector<8x1xi32>
    %322 = vector.shape_cast %321 : vector<8x1xi1> to vector<8x1xi1>
    %323 = vector.broadcast %322 : vector<8x1xi1> to vector<8x32xi1>
    %324 = arith.select %323, %314, %266 : vector<8x32xi1>, vector<8x32xf32>
    %325 = vector.extract_strided_slice %11 {offsets = [40, 0], sizes = [8, 96], strides = [1, 1]} : vector<64x96xf32> to vector<8x96xf32>
    %cst_49 = arith.constant dense<0.000000e+00> : vector<8x96xf32>
    %326 = tpu.matmul %319, %25, %cst_49 {dimension_numbers = #tpu.dot_dimension_numbers<[1], [0], [0], [1], [0, 0, 1, 1], [], []>} : vector<8x32xf32>, vector<32x96xf32>, vector<8x96xf32> -> vector<8x96xf32>
    %327 = vector.extract_strided_slice %325 {offsets = [0, 0], sizes = [8, 64], strides = [1, 1]} : vector<8x96xf32> to vector<8x64xf32>
    %328 = vector.extract_strided_slice %326 {offsets = [0, 0], sizes = [8, 64], strides = [1, 1]} : vector<8x96xf32> to vector<8x64xf32>
    %329 = arith.addf %327, %328 : vector<8x64xf32>
    %330 = arith.negf %329 : vector<8x64xf32>
    %331 = math.exp %330 : vector<8x64xf32>
    %cst_50 = arith.constant 1.000000e+00 : f32
    %332 = vector.broadcast %cst_50 : f32 to vector<8x64xf32>
    %333 = arith.addf %332, %331 : vector<8x64xf32>
    %334 = arith.divf %332, %333 : vector<8x64xf32>
    %335 = vector.extract_strided_slice %334 {offsets = [0, 0], sizes = [8, 32], strides = [1, 1]} : vector<8x64xf32> to vector<8x32xf32>
    %336 = vector.extract_strided_slice %334 {offsets = [0, 32], sizes = [8, 32], strides = [1, 1]} : vector<8x64xf32> to vector<8x32xf32>
    %337 = vector.extract_strided_slice %325 {offsets = [0, 64], sizes = [8, 32], strides = [1, 1]} : vector<8x96xf32> to vector<8x32xf32>
    %338 = vector.extract_strided_slice %326 {offsets = [0, 64], sizes = [8, 32], strides = [1, 1]} : vector<8x96xf32> to vector<8x32xf32>
    %339 = vector.broadcast %30 : vector<1x32xf32> to vector<8x32xf32>
    %340 = arith.addf %338, %339 : vector<8x32xf32>
    %341 = arith.mulf %335, %340 : vector<8x32xf32>
    %342 = arith.addf %337, %341 : vector<8x32xf32>
    %343 = math.tanh %342 : vector<8x32xf32>
    %cst_51 = arith.constant 1.000000e+00 : f32
    %344 = vector.broadcast %cst_51 : f32 to vector<8x32xf32>
    %345 = arith.subf %344, %336 : vector<8x32xf32>
    %346 = arith.mulf %345, %343 : vector<8x32xf32>
    %347 = arith.mulf %336, %319 : vector<8x32xf32>
    %348 = arith.addf %346, %347 : vector<8x32xf32>
    %349 = vector.extract_strided_slice %17 {offsets = [16, 0], sizes = [8, 96], strides = [1, 1]} : vector<64x96xf32> to vector<8x96xf32>
    %cst_52 = arith.constant dense<0.000000e+00> : vector<8x96xf32>
    %350 = tpu.matmul %324, %27, %cst_52 {dimension_numbers = #tpu.dot_dimension_numbers<[1], [0], [0], [1], [0, 0, 1, 1], [], []>} : vector<8x32xf32>, vector<32x96xf32>, vector<8x96xf32> -> vector<8x96xf32>
    %351 = vector.extract_strided_slice %349 {offsets = [0, 0], sizes = [8, 64], strides = [1, 1]} : vector<8x96xf32> to vector<8x64xf32>
    %352 = vector.extract_strided_slice %350 {offsets = [0, 0], sizes = [8, 64], strides = [1, 1]} : vector<8x96xf32> to vector<8x64xf32>
    %353 = arith.addf %351, %352 : vector<8x64xf32>
    %354 = arith.negf %353 : vector<8x64xf32>
    %355 = math.exp %354 : vector<8x64xf32>
    %cst_53 = arith.constant 1.000000e+00 : f32
    %356 = vector.broadcast %cst_53 : f32 to vector<8x64xf32>
    %357 = arith.addf %356, %355 : vector<8x64xf32>
    %358 = arith.divf %356, %357 : vector<8x64xf32>
    %359 = vector.extract_strided_slice %358 {offsets = [0, 0], sizes = [8, 32], strides = [1, 1]} : vector<8x64xf32> to vector<8x32xf32>
    %360 = vector.extract_strided_slice %358 {offsets = [0, 32], sizes = [8, 32], strides = [1, 1]} : vector<8x64xf32> to vector<8x32xf32>
    %361 = vector.extract_strided_slice %349 {offsets = [0, 64], sizes = [8, 32], strides = [1, 1]} : vector<8x96xf32> to vector<8x32xf32>
    %362 = vector.extract_strided_slice %350 {offsets = [0, 64], sizes = [8, 32], strides = [1, 1]} : vector<8x96xf32> to vector<8x32xf32>
    %363 = vector.broadcast %31 : vector<1x32xf32> to vector<8x32xf32>
    %364 = arith.addf %362, %363 : vector<8x32xf32>
    %365 = arith.mulf %359, %364 : vector<8x32xf32>
    %366 = arith.addf %361, %365 : vector<8x32xf32>
    %367 = math.tanh %366 : vector<8x32xf32>
    %cst_54 = arith.constant 1.000000e+00 : f32
    %368 = vector.broadcast %cst_54 : f32 to vector<8x32xf32>
    %369 = arith.subf %368, %360 : vector<8x32xf32>
    %370 = arith.mulf %369, %367 : vector<8x32xf32>
    %371 = arith.mulf %360, %324 : vector<8x32xf32>
    %372 = arith.addf %370, %371 : vector<8x32xf32>
    %c5_i32_55 = arith.constant 5 : i32
    %373 = vector.broadcast %c5_i32_55 : i32 to vector<8x1xi32>
    %374 = arith.cmpi sgt, %0, %373 : vector<8x1xi32>
    %375 = vector.shape_cast %374 : vector<8x1xi1> to vector<8x1xi1>
    %376 = vector.broadcast %375 : vector<8x1xi1> to vector<8x32xi1>
    %377 = arith.select %376, %348, %319 : vector<8x32xi1>, vector<8x32xf32>
    %c2_i32_56 = arith.constant 2 : i32
    %378 = vector.broadcast %c2_i32_56 : i32 to vector<8x1xi32>
    %379 = arith.cmpi sgt, %0, %378 : vector<8x1xi32>
    %380 = vector.shape_cast %379 : vector<8x1xi1> to vector<8x1xi1>
    %381 = vector.broadcast %380 : vector<8x1xi1> to vector<8x32xi1>
    %382 = arith.select %381, %372, %324 : vector<8x32xi1>, vector<8x32xf32>
    %383 = vector.extract_strided_slice %11 {offsets = [48, 0], sizes = [8, 96], strides = [1, 1]} : vector<64x96xf32> to vector<8x96xf32>
    %cst_57 = arith.constant dense<0.000000e+00> : vector<8x96xf32>
    %384 = tpu.matmul %377, %25, %cst_57 {dimension_numbers = #tpu.dot_dimension_numbers<[1], [0], [0], [1], [0, 0, 1, 1], [], []>} : vector<8x32xf32>, vector<32x96xf32>, vector<8x96xf32> -> vector<8x96xf32>
    %385 = vector.extract_strided_slice %383 {offsets = [0, 0], sizes = [8, 64], strides = [1, 1]} : vector<8x96xf32> to vector<8x64xf32>
    %386 = vector.extract_strided_slice %384 {offsets = [0, 0], sizes = [8, 64], strides = [1, 1]} : vector<8x96xf32> to vector<8x64xf32>
    %387 = arith.addf %385, %386 : vector<8x64xf32>
    %388 = arith.negf %387 : vector<8x64xf32>
    %389 = math.exp %388 : vector<8x64xf32>
    %cst_58 = arith.constant 1.000000e+00 : f32
    %390 = vector.broadcast %cst_58 : f32 to vector<8x64xf32>
    %391 = arith.addf %390, %389 : vector<8x64xf32>
    %392 = arith.divf %390, %391 : vector<8x64xf32>
    %393 = vector.extract_strided_slice %392 {offsets = [0, 0], sizes = [8, 32], strides = [1, 1]} : vector<8x64xf32> to vector<8x32xf32>
    %394 = vector.extract_strided_slice %392 {offsets = [0, 32], sizes = [8, 32], strides = [1, 1]} : vector<8x64xf32> to vector<8x32xf32>
    %395 = vector.extract_strided_slice %383 {offsets = [0, 64], sizes = [8, 32], strides = [1, 1]} : vector<8x96xf32> to vector<8x32xf32>
    %396 = vector.extract_strided_slice %384 {offsets = [0, 64], sizes = [8, 32], strides = [1, 1]} : vector<8x96xf32> to vector<8x32xf32>
    %397 = vector.broadcast %30 : vector<1x32xf32> to vector<8x32xf32>
    %398 = arith.addf %396, %397 : vector<8x32xf32>
    %399 = arith.mulf %393, %398 : vector<8x32xf32>
    %400 = arith.addf %395, %399 : vector<8x32xf32>
    %401 = math.tanh %400 : vector<8x32xf32>
    %cst_59 = arith.constant 1.000000e+00 : f32
    %402 = vector.broadcast %cst_59 : f32 to vector<8x32xf32>
    %403 = arith.subf %402, %394 : vector<8x32xf32>
    %404 = arith.mulf %403, %401 : vector<8x32xf32>
    %405 = arith.mulf %394, %377 : vector<8x32xf32>
    %406 = arith.addf %404, %405 : vector<8x32xf32>
    %407 = vector.extract_strided_slice %17 {offsets = [8, 0], sizes = [8, 96], strides = [1, 1]} : vector<64x96xf32> to vector<8x96xf32>
    %cst_60 = arith.constant dense<0.000000e+00> : vector<8x96xf32>
    %408 = tpu.matmul %382, %27, %cst_60 {dimension_numbers = #tpu.dot_dimension_numbers<[1], [0], [0], [1], [0, 0, 1, 1], [], []>} : vector<8x32xf32>, vector<32x96xf32>, vector<8x96xf32> -> vector<8x96xf32>
    %409 = vector.extract_strided_slice %407 {offsets = [0, 0], sizes = [8, 64], strides = [1, 1]} : vector<8x96xf32> to vector<8x64xf32>
    %410 = vector.extract_strided_slice %408 {offsets = [0, 0], sizes = [8, 64], strides = [1, 1]} : vector<8x96xf32> to vector<8x64xf32>
    %411 = arith.addf %409, %410 : vector<8x64xf32>
    %412 = arith.negf %411 : vector<8x64xf32>
    %413 = math.exp %412 : vector<8x64xf32>
    %cst_61 = arith.constant 1.000000e+00 : f32
    %414 = vector.broadcast %cst_61 : f32 to vector<8x64xf32>
    %415 = arith.addf %414, %413 : vector<8x64xf32>
    %416 = arith.divf %414, %415 : vector<8x64xf32>
    %417 = vector.extract_strided_slice %416 {offsets = [0, 0], sizes = [8, 32], strides = [1, 1]} : vector<8x64xf32> to vector<8x32xf32>
    %418 = vector.extract_strided_slice %416 {offsets = [0, 32], sizes = [8, 32], strides = [1, 1]} : vector<8x64xf32> to vector<8x32xf32>
    %419 = vector.extract_strided_slice %407 {offsets = [0, 64], sizes = [8, 32], strides = [1, 1]} : vector<8x96xf32> to vector<8x32xf32>
    %420 = vector.extract_strided_slice %408 {offsets = [0, 64], sizes = [8, 32], strides = [1, 1]} : vector<8x96xf32> to vector<8x32xf32>
    %421 = vector.broadcast %31 : vector<1x32xf32> to vector<8x32xf32>
    %422 = arith.addf %420, %421 : vector<8x32xf32>
    %423 = arith.mulf %417, %422 : vector<8x32xf32>
    %424 = arith.addf %419, %423 : vector<8x32xf32>
    %425 = math.tanh %424 : vector<8x32xf32>
    %cst_62 = arith.constant 1.000000e+00 : f32
    %426 = vector.broadcast %cst_62 : f32 to vector<8x32xf32>
    %427 = arith.subf %426, %418 : vector<8x32xf32>
    %428 = arith.mulf %427, %425 : vector<8x32xf32>
    %429 = arith.mulf %418, %382 : vector<8x32xf32>
    %430 = arith.addf %428, %429 : vector<8x32xf32>
    %c6_i32_63 = arith.constant 6 : i32
    %431 = vector.broadcast %c6_i32_63 : i32 to vector<8x1xi32>
    %432 = arith.cmpi sgt, %0, %431 : vector<8x1xi32>
    %433 = vector.shape_cast %432 : vector<8x1xi1> to vector<8x1xi1>
    %434 = vector.broadcast %433 : vector<8x1xi1> to vector<8x32xi1>
    %435 = arith.select %434, %406, %377 : vector<8x32xi1>, vector<8x32xf32>
    %c1_i32_64 = arith.constant 1 : i32
    %436 = vector.broadcast %c1_i32_64 : i32 to vector<8x1xi32>
    %437 = arith.cmpi sgt, %0, %436 : vector<8x1xi32>
    %438 = vector.shape_cast %437 : vector<8x1xi1> to vector<8x1xi1>
    %439 = vector.broadcast %438 : vector<8x1xi1> to vector<8x32xi1>
    %440 = arith.select %439, %430, %382 : vector<8x32xi1>, vector<8x32xf32>
    %441 = vector.extract_strided_slice %11 {offsets = [56, 0], sizes = [8, 96], strides = [1, 1]} : vector<64x96xf32> to vector<8x96xf32>
    %cst_65 = arith.constant dense<0.000000e+00> : vector<8x96xf32>
    %442 = tpu.matmul %435, %25, %cst_65 {dimension_numbers = #tpu.dot_dimension_numbers<[1], [0], [0], [1], [0, 0, 1, 1], [], []>} : vector<8x32xf32>, vector<32x96xf32>, vector<8x96xf32> -> vector<8x96xf32>
    %443 = vector.extract_strided_slice %441 {offsets = [0, 0], sizes = [8, 64], strides = [1, 1]} : vector<8x96xf32> to vector<8x64xf32>
    %444 = vector.extract_strided_slice %442 {offsets = [0, 0], sizes = [8, 64], strides = [1, 1]} : vector<8x96xf32> to vector<8x64xf32>
    %445 = arith.addf %443, %444 : vector<8x64xf32>
    %446 = arith.negf %445 : vector<8x64xf32>
    %447 = math.exp %446 : vector<8x64xf32>
    %cst_66 = arith.constant 1.000000e+00 : f32
    %448 = vector.broadcast %cst_66 : f32 to vector<8x64xf32>
    %449 = arith.addf %448, %447 : vector<8x64xf32>
    %450 = arith.divf %448, %449 : vector<8x64xf32>
    %451 = vector.extract_strided_slice %450 {offsets = [0, 0], sizes = [8, 32], strides = [1, 1]} : vector<8x64xf32> to vector<8x32xf32>
    %452 = vector.extract_strided_slice %450 {offsets = [0, 32], sizes = [8, 32], strides = [1, 1]} : vector<8x64xf32> to vector<8x32xf32>
    %453 = vector.extract_strided_slice %441 {offsets = [0, 64], sizes = [8, 32], strides = [1, 1]} : vector<8x96xf32> to vector<8x32xf32>
    %454 = vector.extract_strided_slice %442 {offsets = [0, 64], sizes = [8, 32], strides = [1, 1]} : vector<8x96xf32> to vector<8x32xf32>
    %455 = vector.broadcast %30 : vector<1x32xf32> to vector<8x32xf32>
    %456 = arith.addf %454, %455 : vector<8x32xf32>
    %457 = arith.mulf %451, %456 : vector<8x32xf32>
    %458 = arith.addf %453, %457 : vector<8x32xf32>
    %459 = math.tanh %458 : vector<8x32xf32>
    %cst_67 = arith.constant 1.000000e+00 : f32
    %460 = vector.broadcast %cst_67 : f32 to vector<8x32xf32>
    %461 = arith.subf %460, %452 : vector<8x32xf32>
    %462 = arith.mulf %461, %459 : vector<8x32xf32>
    %463 = arith.mulf %452, %435 : vector<8x32xf32>
    %464 = arith.addf %462, %463 : vector<8x32xf32>
    %465 = vector.extract_strided_slice %17 {offsets = [0, 0], sizes = [8, 96], strides = [1, 1]} : vector<64x96xf32> to vector<8x96xf32>
    %cst_68 = arith.constant dense<0.000000e+00> : vector<8x96xf32>
    %466 = tpu.matmul %440, %27, %cst_68 {dimension_numbers = #tpu.dot_dimension_numbers<[1], [0], [0], [1], [0, 0, 1, 1], [], []>} : vector<8x32xf32>, vector<32x96xf32>, vector<8x96xf32> -> vector<8x96xf32>
    %467 = vector.extract_strided_slice %465 {offsets = [0, 0], sizes = [8, 64], strides = [1, 1]} : vector<8x96xf32> to vector<8x64xf32>
    %468 = vector.extract_strided_slice %466 {offsets = [0, 0], sizes = [8, 64], strides = [1, 1]} : vector<8x96xf32> to vector<8x64xf32>
    %469 = arith.addf %467, %468 : vector<8x64xf32>
    %470 = arith.negf %469 : vector<8x64xf32>
    %471 = math.exp %470 : vector<8x64xf32>
    %cst_69 = arith.constant 1.000000e+00 : f32
    %472 = vector.broadcast %cst_69 : f32 to vector<8x64xf32>
    %473 = arith.addf %472, %471 : vector<8x64xf32>
    %474 = arith.divf %472, %473 : vector<8x64xf32>
    %475 = vector.extract_strided_slice %474 {offsets = [0, 0], sizes = [8, 32], strides = [1, 1]} : vector<8x64xf32> to vector<8x32xf32>
    %476 = vector.extract_strided_slice %474 {offsets = [0, 32], sizes = [8, 32], strides = [1, 1]} : vector<8x64xf32> to vector<8x32xf32>
    %477 = vector.extract_strided_slice %465 {offsets = [0, 64], sizes = [8, 32], strides = [1, 1]} : vector<8x96xf32> to vector<8x32xf32>
    %478 = vector.extract_strided_slice %466 {offsets = [0, 64], sizes = [8, 32], strides = [1, 1]} : vector<8x96xf32> to vector<8x32xf32>
    %479 = vector.broadcast %31 : vector<1x32xf32> to vector<8x32xf32>
    %480 = arith.addf %478, %479 : vector<8x32xf32>
    %481 = arith.mulf %475, %480 : vector<8x32xf32>
    %482 = arith.addf %477, %481 : vector<8x32xf32>
    %483 = math.tanh %482 : vector<8x32xf32>
    %cst_70 = arith.constant 1.000000e+00 : f32
    %484 = vector.broadcast %cst_70 : f32 to vector<8x32xf32>
    %485 = arith.subf %484, %476 : vector<8x32xf32>
    %486 = arith.mulf %485, %483 : vector<8x32xf32>
    %487 = arith.mulf %476, %440 : vector<8x32xf32>
    %488 = arith.addf %486, %487 : vector<8x32xf32>
    %c7_i32_71 = arith.constant 7 : i32
    %489 = vector.broadcast %c7_i32_71 : i32 to vector<8x1xi32>
    %490 = arith.cmpi sgt, %0, %489 : vector<8x1xi32>
    %491 = vector.shape_cast %490 : vector<8x1xi1> to vector<8x1xi1>
    %492 = vector.broadcast %491 : vector<8x1xi1> to vector<8x32xi1>
    %493 = arith.select %492, %464, %435 : vector<8x32xi1>, vector<8x32xf32>
    %c0_i32_72 = arith.constant 0 : i32
    %494 = vector.broadcast %c0_i32_72 : i32 to vector<8x1xi32>
    %495 = arith.cmpi sgt, %0, %494 : vector<8x1xi32>
    %496 = vector.shape_cast %495 : vector<8x1xi1> to vector<8x1xi1>
    %497 = vector.broadcast %496 : vector<8x1xi1> to vector<8x32xi1>
    %498 = arith.select %497, %488, %440 : vector<8x32xi1>, vector<8x32xf32>
    %499 = tpu.concatenate %493, %498 in 1 : vector<8x32xf32>, vector<8x32xf32> -> vector<8x64xf32>
    %c0_73 = arith.constant 0 : index
    %c0_74 = arith.constant 0 : index
    %500 = vector.load %arg6[%c0_73, %c0_74] : memref<64x32xf32, #tpu.memory_space<vmem>>, vector<64x32xf32>
    %cst_75 = arith.constant dense<0.000000e+00> : vector<8x32xf32>
    %501 = tpu.matmul %499, %500, %cst_75 {dimension_numbers = #tpu.dot_dimension_numbers<[1], [0], [0], [1], [0, 0, 1, 1], [], []>} : vector<8x64xf32>, vector<64x32xf32>, vector<8x32xf32> -> vector<8x32xf32>
    %502 = vector.extract_strided_slice %23 {offsets = [0, 0], sizes = [8, 96], strides = [1, 1]} : vector<56x96xf32> to vector<8x96xf32>
    %cst_76 = arith.constant dense<0.000000e+00> : vector<8x96xf32>
    %503 = tpu.matmul %501, %29, %cst_76 {dimension_numbers = #tpu.dot_dimension_numbers<[1], [0], [0], [1], [0, 0, 1, 1], [], []>} : vector<8x32xf32>, vector<32x96xf32>, vector<8x96xf32> -> vector<8x96xf32>
    %504 = vector.extract_strided_slice %502 {offsets = [0, 0], sizes = [8, 64], strides = [1, 1]} : vector<8x96xf32> to vector<8x64xf32>
    %505 = vector.extract_strided_slice %503 {offsets = [0, 0], sizes = [8, 64], strides = [1, 1]} : vector<8x96xf32> to vector<8x64xf32>
    %506 = arith.addf %504, %505 : vector<8x64xf32>
    %507 = arith.negf %506 : vector<8x64xf32>
    %508 = math.exp %507 : vector<8x64xf32>
    %cst_77 = arith.constant 1.000000e+00 : f32
    %509 = vector.broadcast %cst_77 : f32 to vector<8x64xf32>
    %510 = arith.addf %509, %508 : vector<8x64xf32>
    %511 = arith.divf %509, %510 : vector<8x64xf32>
    %512 = vector.extract_strided_slice %511 {offsets = [0, 0], sizes = [8, 32], strides = [1, 1]} : vector<8x64xf32> to vector<8x32xf32>
    %513 = vector.extract_strided_slice %511 {offsets = [0, 32], sizes = [8, 32], strides = [1, 1]} : vector<8x64xf32> to vector<8x32xf32>
    %514 = vector.extract_strided_slice %502 {offsets = [0, 64], sizes = [8, 32], strides = [1, 1]} : vector<8x96xf32> to vector<8x32xf32>
    %515 = vector.extract_strided_slice %503 {offsets = [0, 64], sizes = [8, 32], strides = [1, 1]} : vector<8x96xf32> to vector<8x32xf32>
    %516 = vector.broadcast %32 : vector<1x32xf32> to vector<8x32xf32>
    %517 = arith.addf %515, %516 : vector<8x32xf32>
    %518 = arith.mulf %512, %517 : vector<8x32xf32>
    %519 = arith.addf %514, %518 : vector<8x32xf32>
    %520 = math.tanh %519 : vector<8x32xf32>
    %cst_78 = arith.constant 1.000000e+00 : f32
    %521 = vector.broadcast %cst_78 : f32 to vector<8x32xf32>
    %522 = arith.subf %521, %513 : vector<8x32xf32>
    %523 = arith.mulf %522, %520 : vector<8x32xf32>
    %524 = arith.mulf %513, %501 : vector<8x32xf32>
    %525 = arith.addf %523, %524 : vector<8x32xf32>
    %526 = vector.extract_strided_slice %23 {offsets = [8, 0], sizes = [8, 96], strides = [1, 1]} : vector<56x96xf32> to vector<8x96xf32>
    %cst_79 = arith.constant dense<0.000000e+00> : vector<8x96xf32>
    %527 = tpu.matmul %525, %29, %cst_79 {dimension_numbers = #tpu.dot_dimension_numbers<[1], [0], [0], [1], [0, 0, 1, 1], [], []>} : vector<8x32xf32>, vector<32x96xf32>, vector<8x96xf32> -> vector<8x96xf32>
    %528 = vector.extract_strided_slice %526 {offsets = [0, 0], sizes = [8, 64], strides = [1, 1]} : vector<8x96xf32> to vector<8x64xf32>
    %529 = vector.extract_strided_slice %527 {offsets = [0, 0], sizes = [8, 64], strides = [1, 1]} : vector<8x96xf32> to vector<8x64xf32>
    %530 = arith.addf %528, %529 : vector<8x64xf32>
    %531 = arith.negf %530 : vector<8x64xf32>
    %532 = math.exp %531 : vector<8x64xf32>
    %cst_80 = arith.constant 1.000000e+00 : f32
    %533 = vector.broadcast %cst_80 : f32 to vector<8x64xf32>
    %534 = arith.addf %533, %532 : vector<8x64xf32>
    %535 = arith.divf %533, %534 : vector<8x64xf32>
    %536 = vector.extract_strided_slice %535 {offsets = [0, 0], sizes = [8, 32], strides = [1, 1]} : vector<8x64xf32> to vector<8x32xf32>
    %537 = vector.extract_strided_slice %535 {offsets = [0, 32], sizes = [8, 32], strides = [1, 1]} : vector<8x64xf32> to vector<8x32xf32>
    %538 = vector.extract_strided_slice %526 {offsets = [0, 64], sizes = [8, 32], strides = [1, 1]} : vector<8x96xf32> to vector<8x32xf32>
    %539 = vector.extract_strided_slice %527 {offsets = [0, 64], sizes = [8, 32], strides = [1, 1]} : vector<8x96xf32> to vector<8x32xf32>
    %540 = vector.broadcast %32 : vector<1x32xf32> to vector<8x32xf32>
    %541 = arith.addf %539, %540 : vector<8x32xf32>
    %542 = arith.mulf %536, %541 : vector<8x32xf32>
    %543 = arith.addf %538, %542 : vector<8x32xf32>
    %544 = math.tanh %543 : vector<8x32xf32>
    %cst_81 = arith.constant 1.000000e+00 : f32
    %545 = vector.broadcast %cst_81 : f32 to vector<8x32xf32>
    %546 = arith.subf %545, %537 : vector<8x32xf32>
    %547 = arith.mulf %546, %544 : vector<8x32xf32>
    %548 = arith.mulf %537, %525 : vector<8x32xf32>
    %549 = arith.addf %547, %548 : vector<8x32xf32>
    %550 = vector.extract_strided_slice %23 {offsets = [16, 0], sizes = [8, 96], strides = [1, 1]} : vector<56x96xf32> to vector<8x96xf32>
    %cst_82 = arith.constant dense<0.000000e+00> : vector<8x96xf32>
    %551 = tpu.matmul %549, %29, %cst_82 {dimension_numbers = #tpu.dot_dimension_numbers<[1], [0], [0], [1], [0, 0, 1, 1], [], []>} : vector<8x32xf32>, vector<32x96xf32>, vector<8x96xf32> -> vector<8x96xf32>
    %552 = vector.extract_strided_slice %550 {offsets = [0, 0], sizes = [8, 64], strides = [1, 1]} : vector<8x96xf32> to vector<8x64xf32>
    %553 = vector.extract_strided_slice %551 {offsets = [0, 0], sizes = [8, 64], strides = [1, 1]} : vector<8x96xf32> to vector<8x64xf32>
    %554 = arith.addf %552, %553 : vector<8x64xf32>
    %555 = arith.negf %554 : vector<8x64xf32>
    %556 = math.exp %555 : vector<8x64xf32>
    %cst_83 = arith.constant 1.000000e+00 : f32
    %557 = vector.broadcast %cst_83 : f32 to vector<8x64xf32>
    %558 = arith.addf %557, %556 : vector<8x64xf32>
    %559 = arith.divf %557, %558 : vector<8x64xf32>
    %560 = vector.extract_strided_slice %559 {offsets = [0, 0], sizes = [8, 32], strides = [1, 1]} : vector<8x64xf32> to vector<8x32xf32>
    %561 = vector.extract_strided_slice %559 {offsets = [0, 32], sizes = [8, 32], strides = [1, 1]} : vector<8x64xf32> to vector<8x32xf32>
    %562 = vector.extract_strided_slice %550 {offsets = [0, 64], sizes = [8, 32], strides = [1, 1]} : vector<8x96xf32> to vector<8x32xf32>
    %563 = vector.extract_strided_slice %551 {offsets = [0, 64], sizes = [8, 32], strides = [1, 1]} : vector<8x96xf32> to vector<8x32xf32>
    %564 = vector.broadcast %32 : vector<1x32xf32> to vector<8x32xf32>
    %565 = arith.addf %563, %564 : vector<8x32xf32>
    %566 = arith.mulf %560, %565 : vector<8x32xf32>
    %567 = arith.addf %562, %566 : vector<8x32xf32>
    %568 = math.tanh %567 : vector<8x32xf32>
    %cst_84 = arith.constant 1.000000e+00 : f32
    %569 = vector.broadcast %cst_84 : f32 to vector<8x32xf32>
    %570 = arith.subf %569, %561 : vector<8x32xf32>
    %571 = arith.mulf %570, %568 : vector<8x32xf32>
    %572 = arith.mulf %561, %549 : vector<8x32xf32>
    %573 = arith.addf %571, %572 : vector<8x32xf32>
    %574 = vector.extract_strided_slice %23 {offsets = [24, 0], sizes = [8, 96], strides = [1, 1]} : vector<56x96xf32> to vector<8x96xf32>
    %cst_85 = arith.constant dense<0.000000e+00> : vector<8x96xf32>
    %575 = tpu.matmul %573, %29, %cst_85 {dimension_numbers = #tpu.dot_dimension_numbers<[1], [0], [0], [1], [0, 0, 1, 1], [], []>} : vector<8x32xf32>, vector<32x96xf32>, vector<8x96xf32> -> vector<8x96xf32>
    %576 = vector.extract_strided_slice %574 {offsets = [0, 0], sizes = [8, 64], strides = [1, 1]} : vector<8x96xf32> to vector<8x64xf32>
    %577 = vector.extract_strided_slice %575 {offsets = [0, 0], sizes = [8, 64], strides = [1, 1]} : vector<8x96xf32> to vector<8x64xf32>
    %578 = arith.addf %576, %577 : vector<8x64xf32>
    %579 = arith.negf %578 : vector<8x64xf32>
    %580 = math.exp %579 : vector<8x64xf32>
    %cst_86 = arith.constant 1.000000e+00 : f32
    %581 = vector.broadcast %cst_86 : f32 to vector<8x64xf32>
    %582 = arith.addf %581, %580 : vector<8x64xf32>
    %583 = arith.divf %581, %582 : vector<8x64xf32>
    %584 = vector.extract_strided_slice %583 {offsets = [0, 0], sizes = [8, 32], strides = [1, 1]} : vector<8x64xf32> to vector<8x32xf32>
    %585 = vector.extract_strided_slice %583 {offsets = [0, 32], sizes = [8, 32], strides = [1, 1]} : vector<8x64xf32> to vector<8x32xf32>
    %586 = vector.extract_strided_slice %574 {offsets = [0, 64], sizes = [8, 32], strides = [1, 1]} : vector<8x96xf32> to vector<8x32xf32>
    %587 = vector.extract_strided_slice %575 {offsets = [0, 64], sizes = [8, 32], strides = [1, 1]} : vector<8x96xf32> to vector<8x32xf32>
    %588 = vector.broadcast %32 : vector<1x32xf32> to vector<8x32xf32>
    %589 = arith.addf %587, %588 : vector<8x32xf32>
    %590 = arith.mulf %584, %589 : vector<8x32xf32>
    %591 = arith.addf %586, %590 : vector<8x32xf32>
    %592 = math.tanh %591 : vector<8x32xf32>
    %cst_87 = arith.constant 1.000000e+00 : f32
    %593 = vector.broadcast %cst_87 : f32 to vector<8x32xf32>
    %594 = arith.subf %593, %585 : vector<8x32xf32>
    %595 = arith.mulf %594, %592 : vector<8x32xf32>
    %596 = arith.mulf %585, %573 : vector<8x32xf32>
    %597 = arith.addf %595, %596 : vector<8x32xf32>
    %598 = vector.extract_strided_slice %23 {offsets = [32, 0], sizes = [8, 96], strides = [1, 1]} : vector<56x96xf32> to vector<8x96xf32>
    %cst_88 = arith.constant dense<0.000000e+00> : vector<8x96xf32>
    %599 = tpu.matmul %597, %29, %cst_88 {dimension_numbers = #tpu.dot_dimension_numbers<[1], [0], [0], [1], [0, 0, 1, 1], [], []>} : vector<8x32xf32>, vector<32x96xf32>, vector<8x96xf32> -> vector<8x96xf32>
    %600 = vector.extract_strided_slice %598 {offsets = [0, 0], sizes = [8, 64], strides = [1, 1]} : vector<8x96xf32> to vector<8x64xf32>
    %601 = vector.extract_strided_slice %599 {offsets = [0, 0], sizes = [8, 64], strides = [1, 1]} : vector<8x96xf32> to vector<8x64xf32>
    %602 = arith.addf %600, %601 : vector<8x64xf32>
    %603 = arith.negf %602 : vector<8x64xf32>
    %604 = math.exp %603 : vector<8x64xf32>
    %cst_89 = arith.constant 1.000000e+00 : f32
    %605 = vector.broadcast %cst_89 : f32 to vector<8x64xf32>
    %606 = arith.addf %605, %604 : vector<8x64xf32>
    %607 = arith.divf %605, %606 : vector<8x64xf32>
    %608 = vector.extract_strided_slice %607 {offsets = [0, 0], sizes = [8, 32], strides = [1, 1]} : vector<8x64xf32> to vector<8x32xf32>
    %609 = vector.extract_strided_slice %607 {offsets = [0, 32], sizes = [8, 32], strides = [1, 1]} : vector<8x64xf32> to vector<8x32xf32>
    %610 = vector.extract_strided_slice %598 {offsets = [0, 64], sizes = [8, 32], strides = [1, 1]} : vector<8x96xf32> to vector<8x32xf32>
    %611 = vector.extract_strided_slice %599 {offsets = [0, 64], sizes = [8, 32], strides = [1, 1]} : vector<8x96xf32> to vector<8x32xf32>
    %612 = vector.broadcast %32 : vector<1x32xf32> to vector<8x32xf32>
    %613 = arith.addf %611, %612 : vector<8x32xf32>
    %614 = arith.mulf %608, %613 : vector<8x32xf32>
    %615 = arith.addf %610, %614 : vector<8x32xf32>
    %616 = math.tanh %615 : vector<8x32xf32>
    %cst_90 = arith.constant 1.000000e+00 : f32
    %617 = vector.broadcast %cst_90 : f32 to vector<8x32xf32>
    %618 = arith.subf %617, %609 : vector<8x32xf32>
    %619 = arith.mulf %618, %616 : vector<8x32xf32>
    %620 = arith.mulf %609, %597 : vector<8x32xf32>
    %621 = arith.addf %619, %620 : vector<8x32xf32>
    %622 = vector.extract_strided_slice %23 {offsets = [40, 0], sizes = [8, 96], strides = [1, 1]} : vector<56x96xf32> to vector<8x96xf32>
    %cst_91 = arith.constant dense<0.000000e+00> : vector<8x96xf32>
    %623 = tpu.matmul %621, %29, %cst_91 {dimension_numbers = #tpu.dot_dimension_numbers<[1], [0], [0], [1], [0, 0, 1, 1], [], []>} : vector<8x32xf32>, vector<32x96xf32>, vector<8x96xf32> -> vector<8x96xf32>
    %624 = vector.extract_strided_slice %622 {offsets = [0, 0], sizes = [8, 64], strides = [1, 1]} : vector<8x96xf32> to vector<8x64xf32>
    %625 = vector.extract_strided_slice %623 {offsets = [0, 0], sizes = [8, 64], strides = [1, 1]} : vector<8x96xf32> to vector<8x64xf32>
    %626 = arith.addf %624, %625 : vector<8x64xf32>
    %627 = arith.negf %626 : vector<8x64xf32>
    %628 = math.exp %627 : vector<8x64xf32>
    %cst_92 = arith.constant 1.000000e+00 : f32
    %629 = vector.broadcast %cst_92 : f32 to vector<8x64xf32>
    %630 = arith.addf %629, %628 : vector<8x64xf32>
    %631 = arith.divf %629, %630 : vector<8x64xf32>
    %632 = vector.extract_strided_slice %631 {offsets = [0, 0], sizes = [8, 32], strides = [1, 1]} : vector<8x64xf32> to vector<8x32xf32>
    %633 = vector.extract_strided_slice %631 {offsets = [0, 32], sizes = [8, 32], strides = [1, 1]} : vector<8x64xf32> to vector<8x32xf32>
    %634 = vector.extract_strided_slice %622 {offsets = [0, 64], sizes = [8, 32], strides = [1, 1]} : vector<8x96xf32> to vector<8x32xf32>
    %635 = vector.extract_strided_slice %623 {offsets = [0, 64], sizes = [8, 32], strides = [1, 1]} : vector<8x96xf32> to vector<8x32xf32>
    %636 = vector.broadcast %32 : vector<1x32xf32> to vector<8x32xf32>
    %637 = arith.addf %635, %636 : vector<8x32xf32>
    %638 = arith.mulf %632, %637 : vector<8x32xf32>
    %639 = arith.addf %634, %638 : vector<8x32xf32>
    %640 = math.tanh %639 : vector<8x32xf32>
    %cst_93 = arith.constant 1.000000e+00 : f32
    %641 = vector.broadcast %cst_93 : f32 to vector<8x32xf32>
    %642 = arith.subf %641, %633 : vector<8x32xf32>
    %643 = arith.mulf %642, %640 : vector<8x32xf32>
    %644 = arith.mulf %633, %621 : vector<8x32xf32>
    %645 = arith.addf %643, %644 : vector<8x32xf32>
    %646 = vector.extract_strided_slice %23 {offsets = [48, 0], sizes = [8, 96], strides = [1, 1]} : vector<56x96xf32> to vector<8x96xf32>
    %cst_94 = arith.constant dense<0.000000e+00> : vector<8x96xf32>
    %647 = tpu.matmul %645, %29, %cst_94 {dimension_numbers = #tpu.dot_dimension_numbers<[1], [0], [0], [1], [0, 0, 1, 1], [], []>} : vector<8x32xf32>, vector<32x96xf32>, vector<8x96xf32> -> vector<8x96xf32>
    %648 = vector.extract_strided_slice %646 {offsets = [0, 0], sizes = [8, 64], strides = [1, 1]} : vector<8x96xf32> to vector<8x64xf32>
    %649 = vector.extract_strided_slice %647 {offsets = [0, 0], sizes = [8, 64], strides = [1, 1]} : vector<8x96xf32> to vector<8x64xf32>
    %650 = arith.addf %648, %649 : vector<8x64xf32>
    %651 = arith.negf %650 : vector<8x64xf32>
    %652 = math.exp %651 : vector<8x64xf32>
    %cst_95 = arith.constant 1.000000e+00 : f32
    %653 = vector.broadcast %cst_95 : f32 to vector<8x64xf32>
    %654 = arith.addf %653, %652 : vector<8x64xf32>
    %655 = arith.divf %653, %654 : vector<8x64xf32>
    %656 = vector.extract_strided_slice %655 {offsets = [0, 0], sizes = [8, 32], strides = [1, 1]} : vector<8x64xf32> to vector<8x32xf32>
    %657 = vector.extract_strided_slice %655 {offsets = [0, 32], sizes = [8, 32], strides = [1, 1]} : vector<8x64xf32> to vector<8x32xf32>
    %658 = vector.extract_strided_slice %646 {offsets = [0, 64], sizes = [8, 32], strides = [1, 1]} : vector<8x96xf32> to vector<8x32xf32>
    %659 = vector.extract_strided_slice %647 {offsets = [0, 64], sizes = [8, 32], strides = [1, 1]} : vector<8x96xf32> to vector<8x32xf32>
    %660 = vector.broadcast %32 : vector<1x32xf32> to vector<8x32xf32>
    %661 = arith.addf %659, %660 : vector<8x32xf32>
    %662 = arith.mulf %656, %661 : vector<8x32xf32>
    %663 = arith.addf %658, %662 : vector<8x32xf32>
    %664 = math.tanh %663 : vector<8x32xf32>
    %cst_96 = arith.constant 1.000000e+00 : f32
    %665 = vector.broadcast %cst_96 : f32 to vector<8x32xf32>
    %666 = arith.subf %665, %657 : vector<8x32xf32>
    %667 = arith.mulf %666, %664 : vector<8x32xf32>
    %668 = arith.mulf %657, %645 : vector<8x32xf32>
    %669 = arith.addf %667, %668 : vector<8x32xf32>
    %670 = tpu.concatenate %525, %549, %573, %597, %621, %645, %669 in 0 : vector<8x32xf32>, vector<8x32xf32>, vector<8x32xf32>, vector<8x32xf32>, vector<8x32xf32>, vector<8x32xf32>, vector<8x32xf32> -> vector<56x32xf32>
    %c0_97 = arith.constant 0 : index
    %c0_98 = arith.constant 0 : index
    %671 = vector.load %arg7[%c0_97, %c0_98] : memref<32x48xf32, #tpu.memory_space<vmem>>, vector<32x48xf32>
    %cst_99 = arith.constant dense<0.000000e+00> : vector<56x48xf32>
    %672 = tpu.matmul %670, %671, %cst_99 {dimension_numbers = #tpu.dot_dimension_numbers<[1], [0], [0], [1], [0, 0, 1, 1], [], []>} : vector<56x32xf32>, vector<32x48xf32>, vector<56x48xf32> -> vector<56x48xf32>
    %c0_100 = arith.constant 0 : index
    %c0_101 = arith.constant 0 : index
    %673 = vector.load %arg8[%c0_100, %c0_101] : memref<56x48xf32, #tpu.memory_space<vmem>>, vector<56x48xf32>
    tpu.vector_store %arg8[%c0_100, %c0_101], %672 {strides = array<i32>} : memref<56x48xf32, #tpu.memory_space<vmem>>, vector<56x48xf32>,
    return
  }
}

</mosaic_0001>

<bundles_post_ra>
// kernel: tpu_custom_call.1
= control target key start
LH: loop header
LB: loop body
LE: loop exit
PB: predicated region body
PF: predicated region fallthrough
CT: control target
= control target key end

     0   :  { %vm65_vm0 = vcmask 130048   ;;  %s2123_s27 = smov 96   ;;  %v2124_v22 = vmov 0.0   ;;  %vm233_vm13 = vcmask 261120   ;;  %s2853_s3 = inlined_call_operand.vmem [shape: f32[3,16,96], index: 3, kind: input, shape index: {}]   ;;  %s2854_s1 = inlined_call_operand.vmem [shape: f32[64,16], index: 1, kind: input, shape index: {}]   ;;  %s2855_s4 = inlined_call_operand.vmem [shape: f32[3,32,96], index: 4, kind: input, shape index: {}]   ;;  %s2856_s5 = inlined_call_operand.vmem [shape: f32[3,128], index: 5, kind: input, shape index: {}]   ;;  %s2857_s0 = inlined_call_operand.vmem [shape: s32[8,1], index: 0, kind: input, shape index: {}]   ;;  %s2858_s2 = inlined_call_operand.vmem [shape: f32[56,16], index: 2, kind: input, shape index: {}]   ;;  %s2859_s6 = inlined_call_operand.vmem [shape: f32[64,32], index: 6, kind: input, shape index: {}]   ;;  %s2860_s7 = inlined_call_operand.vmem [shape: f32[32,48], index: 7, kind: input, shape index: {}]   ;;  %s2861_s8 = inlined_call_operand.vmem [shape: f32[56,48], index: 8, kind: output, shape index: {}]  }
   0x1   :  { %v46_v0 = vld [vmem:[%s2853_s3 + $0x8] sm:$0xff]  ;;  %v45_v1 = vld [vmem:[%s2853_s3] sm:$0xff]  ;;  %v2182_v2 = vld [vmem:[%s2854_s1 + $0x30] sm:$0xff] }
   0x2   :  { %1972 = vmatpush.msra.mxu3 %v46_v0  ;;  %104 = vmatpush.msra.mxu0 %v46_v0  ;;  %v2187_v3 = vld [vmem:[%s2855_s4 + $0x18] sm:$0xff]  ;;  %v30_v4 = vld [vmem:[%s2854_s1] sm:$0xff]  ;;  %v2197_v5 = vld [vmem:[%s2855_s4 + $0x10] sm:$0xff] }
   0x3   :  { %1970 = vmatpush.msra.mxu1 %v46_v0  ;;  %1971 = vmatpush.msra.mxu2 %v46_v0  ;;  %v63_v6 = vld [vmem:[%s2856_s5] sm:$0x7]  ;;  %v2206_v7 = vld [vmem:[%s2854_s1 + $0x18] sm:$0xff]  ;;  %v2217_v10 = vld [vmem:[%s2855_s4 + $0x8] sm:$0xff] }
   0x4   :  { %1975 = vmatpush.msra.mxu3 %v45_v1  ;;  %105 = vmatpush.msra.mxu0 %v45_v1  ;;  %v2209_v8 = vperm.slane %v63_v6, 0  ;;  %v48_v9 = vld [vmem:[%s2853_s3 + $0x18] sm:$0xff]  ;;  %v47_v12 = vld [vmem:[%s2853_s3 + $0x10] sm:$0xff]  ;;  %v2235_v13 = vld [vmem:[%s2855_s4] sm:$0xff]  ;;  %v2249_v16 = vperm.slane %v63_v6, 1 }
   0x5   :  { %1901 = vmatmul.msk.f32.vlgmr.msra.gmra.mxu3 %vm65_vm0, %v2182_v2  ;;  %1895 = vmatmul.msk.f32.vlgmr.msra.gmra.mxu0 %vm65_vm0, %v30_v4  ;;  %v2225_v11 = vld [vmem:[%s2855_s4 + $0x38] sm:$0xff]  ;;  %v2245_v15 = vld [vmem:[%s2855_s4 + $0x30] sm:$0xff]  ;;  %v34_v17 = vld [vmem:[%s2854_s1 + $0x20] sm:$0xff] }
   0x6   :  { %249 = vmatpush.msrb.mxu3 %v2187_v3  ;;  %1973 = vmatpush.msra.mxu1 %v45_v1  ;;  %v37_v14 = vld [vmem:[%s2854_s1 + $0x38] sm:$0xff]  ;;  %v31_v18 = vld [vmem:[%s2854_s1 + $0x8] sm:$0xff]  ;;  %v2272_v20 = vld [vmem:[%s2855_s4 + $0x20] sm:$0xff] }
   0x7   :  { %1898 = vmatmul.msk.f32.vlgmr.msra.gmra.mxu1 %vm65_vm0, %v2206_v7  ;;  %1974 = vmatpush.msra.mxu2 %v45_v1  ;;  %v2262_v19 = vld [vmem:[%s2855_s4 + $0x28] sm:$0xff]  ;;  %v32_v21 = vld [vmem:[%s2854_s1 + $0x10] sm:$0xff] }
   0x8   :  { %250 = vmatpush.msrb.mxu3 %v2197_v5  ;;  %278 = vrot.lane.b32.xlu0 %v2209_v8, %s2123_s27  ;;  %v35_v23 = vld [vmem:[%s2854_s1 + $0x28] sm:$0xff]  ;;  %s2125_s1 = smov 64  }
   0x9   :  { %146 = vmatpush.msrb.mxu1 %v48_v9  ;;  %893 = vmatpush.msrb.mxu0 %v2225_v11 }
   0xa   :  { %251 = vmatpush.msrb.mxu3 %v2217_v10  ;;  %1900 = vmatmul.msk.f32.vlgmr.msra.gmra.mxu2 %vm65_vm0, %v35_v23 }
   0xb   :  { %147 = vmatpush.msrb.mxu1 %v47_v12  ;;  %894 = vmatpush.msrb.mxu0 %v2245_v15 }
   0xc   :  { %252 = vmatpush.msrb.mxu3 %v2235_v13 }
   0xd   :  { %960 = vmatpush.msra.mxu1 %v2187_v3  ;;  %1902 = vmatmul.msk.f32.gmra.mxu3 %vm65_vm0, %v37_v14 }
   0xe   :  { %1896 = vmatmul.msk.f32.gmra.mxu0 %vm65_vm0, %v31_v18  ;;  %313 = vmatpush.msra.mxu3 %v2225_v11 }
   0xf   :  { %895 = vmatpush.msrb.mxu0 %v2262_v19  ;;  %1899 = vmatmul.msk.f32.gmra.mxu1 %vm65_vm0, %v34_v17 }
  0x10   :  { %314 = vmatpush.msra.mxu3 %v2245_v15  ;;  %342 = vrot.lane.b32.xlu0 %v2249_v16, %s2123_s27 }
  0x11   :  { %896 = vmatpush.msrb.mxu0 %v2272_v20  ;;  %961 = vmatpush.msra.mxu1 %v2197_v5 }
  0x12   :  { %315 = vmatpush.msra.mxu3 %v2262_v19 }
  0x13   :  { %1157 = vmatpush.msra.mxu0 %v2225_v11  ;;  %962 = vmatpush.msra.mxu1 %v2217_v10 }
  0x14   :  { %316 = vmatpush.msra.mxu3 %v2272_v20 }
  0x15   :  { %1158 = vmatpush.msra.mxu0 %v2245_v15  ;;  %253 = vmatmul.f32.vlgmr.msrb.gmra.mxu3 %v2124_v22 }
  0x16   :  { %1897 = vmatmul.msk.f32.gmra.mxu0 %vm65_vm0, %v32_v21  ;;  %396 = vmatpush.msrb.mxu3 %v2187_v3 }
  0x17   :  { %963 = vmatpush.msra.mxu1 %v2235_v13  ;;  %1159 = vmatpush.msra.mxu0 %v2262_v19 }
  0x18   :  { %1903 = vmatmul.msk.f32.vlgmr.msrb.gmra.mxu1 %vm65_vm0, %v30_v4  ;;  %397 = vmatpush.msrb.mxu3 %v2197_v5 }
  0x19   :  { %1160 = vmatpush.msra.mxu0 %v2272_v20  ;;  %1224 = vmatpush.msrb.mxu1 %v2187_v3 }
  0x1a   :  { %398 = vmatpush.msrb.mxu3 %v2217_v10 }
  0x1b   :  { %1225 = vmatpush.msrb.mxu1 %v2197_v5 }
  0x1c   :  { %399 = vmatpush.msrb.mxu3 %v2235_v13 }
  0x1d   :  { %317 = vmatmul.f32.vlgmr.msra.gmra.mxu3 %v2124_v22  ;;  %1226 = vmatpush.msrb.mxu1 %v2217_v10 }
  0x1e   :  { %461 = vmatpush.msra.mxu3 %v2225_v11 }
  0x1f   :  { %1227 = vmatpush.msrb.mxu1 %v2235_v13 }
  0x20   :  { %1904 = vmatmul.msk.f32.gmra.mxu1 %vm65_vm0, %v31_v18  ;;  %462 = vmatpush.msra.mxu3 %v2245_v15 }
  0x22   :  { %463 = vmatpush.msra.mxu3 %v2262_v19 }
  0x24   :  { %464 = vmatpush.msra.mxu3 %v2272_v20 }
  0x28   :  { %1905 = vmatmul.msk.f32.gmra.mxu1 %vm65_vm0, %v32_v21 }
  0x30   :  { %1906 = vmatmul.msk.f32.gmra.mxu1 %vm65_vm0, %v2206_v7 }
  0x38   :  { %1907 = vmatmul.msk.f32.gmra.mxu1 %vm65_vm0, %v34_v17 }
  0x40   :  { %1908 = vmatmul.msk.f32.gmra.mxu1 %vm65_vm0, %v35_v23  ;;  %v2353_v23 = vld [vmem:[%s2857_s0] sm:$0xff] }
  0x41   :  { %vm365_vm9 = vcmp.gt.s32.totalorder %v2353_v23, 0  ;;  %vm372_vm10 = vcmp.gt.s32.totalorder %v2353_v23, 7 }
  0x48   :  { %1909 = vmatmul.msk.f32.gmra.mxu1 %vm65_vm0, %v2182_v2 }
  0x50   :  { %1910 = vmatmul.msk.f32.gmra.mxu1 %vm65_vm0, %v37_v14 }
  0x7a   :  { %v2324_v28 = vpop.permute.xlu0 %278 }
  0x82   :  { %v2330_v32 = vpop.permute.xlu0 %342  ;;  %v107_v41 = vpop.f32.mrf.mxu0 }
  0x83   :  { %v108_v42 = vadd.f32 %v107_v41, %v2209_v8 }
  0x84   :  { %v2316_v24 = vpop.f32.mrf.mxu1 }
  0x88   :  { %v2318_v25 = vpop.f32.mrf.mxu3 }
  0x8c   :  { %v2320_v26 = vpop.f32.mrf.mxu1 }
  0x90   :  { %v2322_v27 = vpop.f32.mrf.mxu3 }
  0x95   :  { %v2326_v29 = vpop.f32.mrf.mxu1 }
  0x98   :  { %v254_v30 = vpop.f32.mrf.mxu3 }
  0x99   :  { %v281_v31 = vadd.f32 %v2324_v28, %v254_v30  ;;  %v257_v44 = vadd.f32 %v254_v30, %v108_v42  ;;  %v2126_v30 = vmov 0  }
  0x9a   :  { %1981 = vset.pattern.permute.xlu1 %v2126_v30  ;;  %1982 = vset.pattern.permute.xlu0 %v2126_v30 }
  0x9b   :  { %283 = vrot.lane.b32.xlu1 %v281_v31, %s2125_s1  ;;  %v1918_v46 = vmul.f32 -1.442695, %v257_v44  ;;  %v366_v31 = vsel %vm365_vm9, 1, %v2126_v30  ;;  %1983 = vset.pattern.permute.xlu2 %v2126_v30 }
  0x9d   :  { %v2332_v33 = vpop.f32.mrf.mxu1  ;;  %1984 = vpow2.f32 %v1918_v46  ;;  %v373_v46 = vsel %vm372_vm10, 1, %v2126_v30 }
  0xa0   :  { %v318_v34 = vpop.f32.mrf.mxu3 }
  0xa1   :  { %v345_v35 = vadd.f32 %v2330_v32, %v318_v34 }
  0xa3   :  { %347 = vrot.lane.b32.xlu1 %v345_v35, %s2125_s1  ;;  %v1985_v49 = vpop.eup %1984 }
  0xa4   :  { %v261_v50 = vadd.f32 1.0, %v1985_v49 }
  0xa5   :  { %v2336_v36 = vpop.f32.mrf.mxu1 }
  0xa6   :  { %v273_v61 = vand.u32 2147483648, %v261_v50  ;;  %vm267_vm2 = vweird.f32 %v261_v50  ;;  %v271_v62 = vand.u32 2147483647, %v261_v50 }
  0xa8   :  { %v274_v1 = vor.u32 1.1754944e-38, %v273_v61  ;;  %vm272_vm6 = vcmp.eq.f32.partialorder %v271_v62, 8.507059e+37 }
  0xab   :  { %368 = vperm.xlu1 %1981, %v366_v31  }
  0xad   :  { %v2338_v37 = vpop.f32.mrf.mxu1 }
  0xb5   :  { %v2340_v38 = vpop.f32.mrf.mxu1 }
  0xbd   :  { %v2342_v39 = vpop.f32.mrf.mxu1 }
  0xc5   :  { %v2344_v40 = vpop.f32.mrf.mxu1 }
  0xcd   :  { %v170_v43 = vpop.f32.mrf.mxu1 }
  0xce   :  { %v171_v45 = vadd.f32 %v170_v43, %v2249_v16 }
  0xd0   :  { %v321_v47 = vadd.f32 %v318_v34, %v171_v45 }
  0xd2   :  { %v1919_v48 = vmul.f32 -1.442695, %v321_v47 }
  0xd4   :  { %1986 = vpow2.f32 %v1919_v48 }
  0xd5   :  { %1988 = vrcp.f32 %v261_v50 }
  0xda   :  { %v1987_v51 = vpop.eup %1986 }
  0xdb   :  { %v325_v52 = vadd.f32 1.0, %v1987_v51  ;;  %v1989_v53 = vpop.eup %1988 }
  0xdc   :  { %v263_v54 = vmul.f32 %v1989_v53, %v261_v50  ;;  %vm268_vm1 = vweird.f32 %v1989_v53 }
  0xdd   :  { %1990 = vrcp.f32 %v325_v52  ;;  %vm269_vm3 = vmor %vm267_vm2, %vm268_vm1  ;;  %vm331_vm4 = vweird.f32 %v325_v52  ;;  %v337_v2 = vand.u32 2147483648, %v325_v52  ;;  %v335_v6 = vand.u32 2147483647, %v325_v52 }
  0xde   :  { %v264_v56 = vsub.f32 1.0, %v263_v54 }
  0xdf   :  { %v338_v14 = vor.u32 1.1754944e-38, %v337_v2  ;;  %vm336_vm8 = vcmp.eq.f32.partialorder %v335_v6, 8.507059e+37  ;;  %v168_v2 = vadd.f32 %v2344_v40, %v2249_v16 }
  0xe0   :  { %v265_v58 = vmul.f32 %v1989_v53, %v264_v56 }
  0xe2   :  { %v266_v60 = vadd.f32 %v1989_v53, %v265_v58 }
  0xe3   :  { %v1991_v55 = vpop.eup %1990 }
  0xe4   :  { %v327_v57 = vmul.f32 %v1991_v55, %v325_v52  ;;  %v270_v0 = vsel %vm269_vm3, %v1989_v53, %v266_v60  ;;  %vm332_vm5 = vweird.f32 %v1991_v55 }
  0xe5   :  { %v275_v9 = vsel %vm272_vm6, %v274_v1, %v270_v0  ;;  %vm333_vm7 = vmor %vm331_vm4, %vm332_vm5 }
  0xe6   :  { %v328_v59 = vsub.f32 1.0, %v327_v57  ;;  %v293_v48 = vsub.f32 1.0, %v275_v9  ;;  %v299_v51 = vmul.f32 0.0, %v275_v9 }
  0xe8   :  { %v329_v63 = vmul.f32 %v1991_v55, %v328_v59 }
  0xea   :  { %v330_v4 = vadd.f32 %v1991_v55, %v329_v63 }
  0xec   :  { %v334_v17 = vsel %vm333_vm7, %v1991_v55, %v330_v4  ;;  %vm509_vm7 = vcmp.gt.s32.totalorder %v2353_v23, 1 }
  0xed   :  { %v339_v18 = vsel %vm336_vm8, %v338_v14, %v334_v17  ;;  %vm516_vm8 = vcmp.gt.s32.totalorder %v2353_v23, 6 }
  0xee   :  { %v357_v53 = vsub.f32 1.0, %v339_v18  ;;  %v363_v56 = vmul.f32 0.0, %v339_v18 }
 0x10d   :  { %v284_v7 = vpop.permute.xlu1 %283 }
 0x10e   :  { %v286_v12 = vmul.f32 %v284_v7, %v275_v9  ;;  %v110_v7 = vpop.f32.mrf.mxu0 }
 0x10f   :  { %v111_v9 = vadd.f32 %v110_v7, %v2209_v8 }
 0x110   :  { %288 = vrot.lane.b32.xlu2 %v286_v12, %s2125_s1 }
 0x115   :  { %v348_v21 = vpop.permute.xlu1 %347 }
 0x116   :  { %v350_v22 = vmul.f32 %v348_v21, %v339_v18 }
 0x118   :  { %352 = vrot.lane.b32.xlu2 %v350_v22, %s2125_s1 }
 0x11d   :  { %v2364_v49 = vpop.permute.xlu1 %368 }
 0x11e   :  { %vm2862_vm11 = vcmp.eq.s32.totalorder %v2364_v49, 1 }
 0x16a   :  { %v289_v34 = vpop.permute.xlu2 %288 }
 0x16b   :  { %v291_v35 = vadd.f32 %v289_v34, %v108_v42 }
 0x16d   :  { %1992 = vtanh.f32 %v291_v35 }
 0x172   :  { %v353_v41 = vpop.permute.xlu2 %352 }
 0x173   :  { %v1993_v43 = vpop.eup %1992  ;;  %v355_v44 = vadd.f32 %v353_v41, %v171_v45 }
 0x174   :  { %295 = vrot.lane.b32.xlu0 %v1993_v43, %s2123_s27 }
 0x175   :  { %1994 = vtanh.f32 %v355_v44 }
 0x17b   :  { %v1995_v47 = vpop.eup %1994 }
 0x17c   :  { %359 = vrot.lane.b32.xlu2 %v1995_v47, %s2123_s27  ;;  %375 = vperm.xlu0 %1982, %v373_v46  }
 0x1d6   :  { %v360_v42 = vpop.permute.xlu2 %359 }
 0x1d7   :  { %v362_v54 = vmul.f32 %v360_v42, %v357_v53 }
 0x1d9   :  { %v364_v57 = vadd.f32 %v363_v56, %v362_v54 }
 0x1e6   :  { %v296_v50 = vpop.permute.xlu0 %295 }
 0x1e7   :  { %v298_v52 = vmul.f32 %v296_v50, %v293_v48 }
 0x1e9   :  { %v300_v45 = vadd.f32 %v299_v51, %v298_v52 }
 0x1eb   :  { %v2369_v55 = vsel %vm2862_vm11, %v300_v45, 0.0 }
 0x1ec   :  { %380 = vrot.lane.b32.xlu1 %v2369_v55, %s2123_s27 }
 0x1ee   :  { %v2373_v58 = vpop.permute.xlu0 %375 }
 0x1ef   :  { %vm377_vm12 = vcmp.eq.s32.totalorder %v2373_v58, 1  ;;  %v1344_v58 = vld [vmem:[%s2859_s6] sm:$0xff] }
 0x1f0   :  { %v2378_v59 = vsel %vm377_vm12, %v364_v57, 0.0 }
 0x1f1   :  { %445 = vrot.lane.b32.xlu2 %v2378_v59, %s2123_s27 }
 0x24b   :  { %v446_v61 = vpop.permute.xlu2 %445 }
 0x25e   :  { %v381_v60 = vpop.permute.xlu1 %380 }
 0x25f   :  { %1920 = vmatmul.msk.f32.vlgmr.msrb.gmra.mxu3 %vm233_vm13, %v381_v60 }
 0x260   :  { %540 = vmatpush.msrb.mxu3 %v2187_v3 }
 0x262   :  { %541 = vmatpush.msrb.mxu3 %v2197_v5 }
 0x264   :  { %542 = vmatpush.msrb.mxu3 %v2217_v10 }
 0x266   :  { %543 = vmatpush.msrb.mxu3 %v2235_v13 }
 0x267   :  { %1922 = vmatmul.msk.f32.vlgmr.msra.gmra.mxu3 %vm233_vm13, %v446_v61 }
 0x268   :  { %605 = vmatpush.msra.mxu3 %v2225_v11 }
 0x26a   :  { %606 = vmatpush.msra.mxu3 %v2245_v15 }
 0x26c   :  { %607 = vmatpush.msra.mxu3 %v2262_v19 }
 0x26e   :  { %608 = vmatpush.msra.mxu3 %v2272_v20 }
 0x2e2   :  { %v401_v62 = vpop.f32.mrf.mxu3 }
 0x2e3   :  { %v424_v63 = vadd.f32 %v401_v62, %v2324_v28  ;;  %v404_v14 = vadd.f32 %v401_v62, %v111_v9 }
 0x2e5   :  { %426 = vrot.lane.b32.xlu1 %v424_v63, %s2125_s1  ;;  %v1921_v18 = vmul.f32 -1.442695, %v404_v14 }
 0x2ea   :  { %v466_v0 = vpop.f32.mrf.mxu3 }
 0x2eb   :  { %v489_v1 = vadd.f32 %v466_v0, %v2330_v32  ;;  %v469_v4 = vadd.f32 %v466_v0, %v168_v2 }
 0x2ed   :  { %491 = vrot.lane.b32.xlu2 %v489_v1, %s2125_s1  ;;  %v1923_v6 = vmul.f32 -1.442695, %v469_v4  ;;  %v510_v1 = vsel %vm509_vm7, 1, %v2126_v30 }
 0x2ef   :  { %1996 = vpow2.f32 %v1923_v6 }
 0x2f5   :  { %v1997_v12 = vpop.eup %1996 }
 0x2f6   :  { %v473_v17 = vadd.f32 1.0, %v1997_v12 }
 0x2f8   :  { %1998 = vrcp.f32 %v473_v17  ;;  %v485_v44 = vand.u32 2147483648, %v473_v17  ;;  %vm479_vm15 = vweird.f32 %v473_v17  ;;  %v483_v46 = vand.u32 2147483647, %v473_v17 }
 0x2f9   :  { %2000 = vpow2.f32 %v1921_v18  ;;  %v517_v18 = vsel %vm516_vm8, 1, %v2126_v30  ;;  %vm660_vm8 = vcmp.gt.s32.totalorder %v2353_v23, 5 }
 0x2fa   :  { %v486_v50 = vor.u32 1.1754944e-38, %v485_v44  ;;  %vm484_vm2 = vcmp.eq.f32.partialorder %v483_v46, 8.507059e+37 }
 0x2fe   :  { %v1999_v21 = vpop.eup %1998 }
 0x2ff   :  { %v2001_v22 = vpop.eup %2000  ;;  %v475_v31 = vmul.f32 %v1999_v21, %v473_v17  ;;  %vm480_vm14 = vweird.f32 %v1999_v21 }
 0x300   :  { %v408_v34 = vadd.f32 1.0, %v2001_v22  ;;  %vm481_vm1 = vmor %vm479_vm15, %vm480_vm14 }
 0x301   :  { %v476_v35 = vsub.f32 1.0, %v475_v31 }
 0x302   :  { %2002 = vrcp.f32 %v408_v34  ;;  %v420_v56 = vand.u32 2147483648, %v408_v34  ;;  %vm414_vm4 = vweird.f32 %v408_v34  ;;  %v418_v57 = vand.u32 2147483647, %v408_v34 }
 0x303   :  { %v477_v41 = vmul.f32 %v1999_v21, %v476_v35 }
 0x304   :  { %v421_v61 = vor.u32 1.1754944e-38, %v420_v56  ;;  %vm419_vm6 = vcmp.eq.f32.partialorder %v418_v57, 8.507059e+37 }
 0x305   :  { %v478_v40 = vadd.f32 %v1999_v21, %v477_v41 }
 0x307   :  { %v482_v47 = vsel %vm481_vm1, %v1999_v21, %v478_v40 }
 0x308   :  { %v2003_v43 = vpop.eup %2002  ;;  %v487_v51 = vsel %vm484_vm2, %v486_v50, %v482_v47 }
 0x309   :  { %v410_v48 = vmul.f32 %v2003_v43, %v408_v34  ;;  %vm415_vm3 = vweird.f32 %v2003_v43  ;;  %v501_v41 = vsub.f32 1.0, %v487_v51  ;;  %v507_v44 = vmul.f32 %v487_v51, %v2378_v59 }
 0x30a   :  { %vm416_vm5 = vmor %vm414_vm4, %vm415_vm3  ;;  %vm653_vm3 = vcmp.gt.s32.totalorder %v2353_v23, 2 }
 0x30b   :  { %v411_v53 = vsub.f32 1.0, %v410_v48 }
 0x30d   :  { %v412_v45 = vmul.f32 %v2003_v43, %v411_v53  ;;  %v113_v53 = vpop.f32.mrf.mxu0 }
 0x30f   :  { %v413_v54 = vadd.f32 %v2003_v43, %v412_v45  ;;  %v114_v45 = vadd.f32 %v113_v53, %v2209_v8 }
 0x311   :  { %v417_v60 = vsel %vm416_vm5, %v2003_v43, %v413_v54 }
 0x312   :  { %v422_v63 = vsel %vm419_vm6, %v421_v61, %v417_v60 }
 0x313   :  { %v436_v21 = vsub.f32 1.0, %v422_v63 }
 0x347   :  { %v492_v42 = vpop.permute.xlu2 %491 }
 0x348   :  { %v494_v52 = vmul.f32 %v492_v42, %v487_v51 }
 0x34a   :  { %496 = vrot.lane.b32.xlu1 %v494_v52, %s2125_s1 }
 0x357   :  { %v427_v62 = vpop.permute.xlu1 %426 }
 0x358   :  { %v429_v0 = vmul.f32 %v427_v62, %v422_v63  ;;  %v165_v62 = vadd.f32 %v2342_v39, %v2249_v16 }
 0x35a   :  { %431 = vrot.lane.b32.xlu0 %v429_v0, %s2125_s1 }
 0x362   :  { %512 = vperm.xlu0 %1982, %v510_v1  }
 0x3bc   :  { %v497_v4 = vpop.permute.xlu1 %496 }
 0x3bd   :  { %v499_v6 = vadd.f32 %v497_v4, %v168_v2  ;;  %v442_v2 = vmul.f32 %v422_v63, %v2369_v55 }
 0x3bf   :  { %2004 = vtanh.f32 %v499_v6 }
 0x3c5   :  { %v2005_v7 = vpop.eup %2004 }
 0x3c6   :  { %503 = vrot.lane.b32.xlu1 %v2005_v7, %s2123_s27 }
 0x3cc   :  { %v432_v12 = vpop.permute.xlu0 %431 }
 0x3cd   :  { %v434_v14 = vadd.f32 %v432_v12, %v111_v9 }
 0x3cf   :  { %2006 = vtanh.f32 %v434_v14 }
 0x3d4   :  { %v2407_v31 = vpop.permute.xlu0 %512 }
 0x3d5   :  { %v2007_v17 = vpop.eup %2006  ;;  %vm514_vm9 = vcmp.eq.s32.totalorder %v2407_v31, 1 }
 0x3d6   :  { %438 = vrot.lane.b32.xlu2 %v2007_v17, %s2123_s27 }
 0x3de   :  { %519 = vperm.xlu2 %1983, %v517_v18  }
 0x430   :  { %v439_v22 = vpop.permute.xlu2 %438 }
 0x431   :  { %v441_v34 = vmul.f32 %v439_v22, %v436_v21 }
 0x433   :  { %v443_v35 = vadd.f32 %v442_v2, %v441_v34 }
 0x435   :  { %v2414_v9 = vsel %vm514_vm9, %v443_v35, %v2369_v55  ;;  %v654_v35 = vsel %vm653_vm3, 1, %v2126_v30 }
 0x436   :  { %524 = vrot.lane.b32.xlu0 %v2414_v9, %s2123_s27 }
 0x438   :  { %v504_v40 = vpop.permute.xlu1 %503  ;;  %v2418_v43 = vpop.permute.xlu2 %519 }
 0x439   :  { %v506_v46 = vmul.f32 %v504_v40, %v501_v41  ;;  %vm521_vm10 = vcmp.eq.s32.totalorder %v2418_v43, 1  ;;  %v129_v43 = vadd.f32 %v2322_v27, %v2209_v8 }
 0x43b   :  { %v508_v47 = vadd.f32 %v507_v44, %v506_v46 }
 0x43d   :  { %v2425_v48 = vsel %vm521_vm10, %v508_v47, %v2378_v59 }
 0x43e   :  { %589 = vrot.lane.b32.xlu1 %v2425_v48, %s2123_s27 }
 0x4a8   :  { %v525_v55 = vpop.permute.xlu0 %524 }
 0x4a9   :  { %1924 = vmatmul.msk.f32.vlgmr.msrb.gmra.mxu3 %vm233_vm13, %v525_v55 }
 0x4aa   :  { %684 = vmatpush.msrb.mxu3 %v2187_v3 }
 0x4ac   :  { %685 = vmatpush.msrb.mxu3 %v2197_v5 }
 0x4ae   :  { %686 = vmatpush.msrb.mxu3 %v2217_v10 }
 0x4b0   :  { %v590_v50 = vpop.permute.xlu1 %589  ;;  %687 = vmatpush.msrb.mxu3 %v2235_v13 }
 0x4b1   :  { %1926 = vmatmul.msk.f32.vlgmr.msra.gmra.mxu3 %vm233_vm13, %v590_v50 }
 0x4b2   :  { %828 = vmatpush.msra.mxu3 %v2187_v3 }
 0x4b4   :  { %829 = vmatpush.msra.mxu3 %v2197_v5 }
 0x4b6   :  { %830 = vmatpush.msra.mxu3 %v2217_v10 }
 0x4b8   :  { %831 = vmatpush.msra.mxu3 %v2235_v13 }
 0x52c   :  { %v545_v59 = vpop.f32.mrf.mxu3 }
 0x52d   :  { %v568_v42 = vadd.f32 %v545_v59, %v2324_v28  ;;  %v548_v54 = vadd.f32 %v545_v59, %v114_v45 }
 0x52f   :  { %570 = vrot.lane.b32.xlu2 %v568_v42, %s2125_s1  ;;  %v1925_v56 = vmul.f32 -1.442695, %v548_v54 }
 0x531   :  { %2008 = vpow2.f32 %v1925_v56 }
 0x534   :  { %v610_v51 = vpop.f32.mrf.mxu3 }
 0x535   :  { %v633_v52 = vadd.f32 %v610_v51, %v2330_v32  ;;  %v613_v0 = vadd.f32 %v610_v51, %v165_v62 }
 0x537   :  { %635 = vrot.lane.b32.xlu0 %v633_v52, %s2125_s1  ;;  %v2009_v57 = vpop.eup %2008  ;;  %v1927_v4 = vmul.f32 -1.442695, %v613_v0 }
 0x538   :  { %v552_v60 = vadd.f32 1.0, %v2009_v57 }
 0x53a   :  { %2010 = vrcp.f32 %v552_v60  ;;  %v564_v12 = vand.u32 2147483648, %v552_v60  ;;  %vm558_vm15 = vweird.f32 %v552_v60  ;;  %v562_v14 = vand.u32 2147483647, %v552_v60 }
 0x53b   :  { %2012 = vpow2.f32 %v1927_v4  ;;  %v39_v4 = vld [vmem:[%s2858_s2 + $0x8] sm:$0xff] }
 0x53c   :  { %v565_v21 = vor.u32 1.1754944e-38, %v564_v12  ;;  %vm563_vm2 = vcmp.eq.f32.partialorder %v562_v14, 8.507059e+37 }
 0x540   :  { %v2011_v61 = vpop.eup %2010 }
 0x541   :  { %v554_v63 = vmul.f32 %v2011_v61, %v552_v60  ;;  %vm559_vm14 = vweird.f32 %v2011_v61  ;;  %v2013_v17 = vpop.eup %2012 }
 0x542   :  { %vm560_vm1 = vmor %vm558_vm15, %vm559_vm14  ;;  %v617_v22 = vadd.f32 1.0, %v2013_v17 }
 0x543   :  { %v555_v1 = vsub.f32 1.0, %v554_v63  ;;  %v661_v63 = vsel %vm660_vm8, 1, %v2126_v30  ;;  %vm797_vm8 = vcmp.gt.s32.totalorder %v2353_v23, 3 }
 0x544   :  { %2014 = vrcp.f32 %v617_v22  ;;  %v629_v55 = vand.u32 2147483648, %v617_v22  ;;  %vm623_vm5 = vweird.f32 %v617_v22  ;;  %v627_v50 = vand.u32 2147483647, %v617_v22 }
 0x545   :  { %v556_v6 = vmul.f32 %v2011_v61, %v555_v1  ;;  %v50_v1 = vld [vmem:[%s2853_s3 + $0x28] sm:$0xff] }
 0x546   :  { %v630_v42 = vor.u32 1.1754944e-38, %v629_v55  ;;  %vm628_vm7 = vcmp.eq.f32.partialorder %v627_v50, 8.507059e+37  ;;  %209 = vmatpush.msrb.mxu2 %v50_v1 }
 0x547   :  { %v557_v7 = vadd.f32 %v2011_v61, %v556_v6  ;;  %v40_v6 = vld [vmem:[%s2858_s2 + $0x10] sm:$0xff] }
 0x549   :  { %v561_v18 = vsel %vm560_vm1, %v2011_v61, %v557_v7 }
 0x54a   :  { %v566_v34 = vsel %vm563_vm2, %v565_v21, %v561_v18  ;;  %v2015_v41 = vpop.eup %2014 }
 0x54b   :  { %v619_v40 = vmul.f32 %v2015_v41, %v617_v22  ;;  %vm624_vm4 = vweird.f32 %v2015_v41  ;;  %v580_v7 = vsub.f32 1.0, %v566_v34  ;;  %v586_v18 = vmul.f32 %v566_v34, %v2414_v9 }
 0x54c   :  { %vm625_vm6 = vmor %vm623_vm5, %vm624_vm4 }
 0x54d   :  { %v620_v44 = vsub.f32 1.0, %v619_v40 }
 0x54f   :  { %v621_v46 = vmul.f32 %v2015_v41, %v620_v44 }
 0x551   :  { %v622_v47 = vadd.f32 %v2015_v41, %v621_v46 }
 0x553   :  { %v626_v59 = vsel %vm625_vm6, %v2015_v41, %v622_v47  ;;  %v43_v47 = vld [vmem:[%s2858_s2 + $0x28] sm:$0xff] }
 0x554   :  { %v631_v52 = vsel %vm628_vm7, %v630_v42, %v626_v59  ;;  %v2528_v59 = vpop.f32.mrf.mxu2 }
 0x555   :  { %v645_v22 = vsub.f32 1.0, %v631_v52  ;;  %v651_v40 = vmul.f32 %v631_v52, %v2425_v48 }
 0x589   :  { %v571_v2 = vpop.permute.xlu2 %570 }
 0x58a   :  { %v573_v39 = vmul.f32 %v571_v2, %v566_v34 }
 0x58c   :  { %575 = vrot.lane.b32.xlu1 %v573_v39, %s2125_s1 }
 0x594   :  { %656 = vperm.xlu1 %1981, %v654_v35   ;;  %v41_v35 = vld [vmem:[%s2858_s2 + $0x18] sm:$0xff] }
 0x5a9   :  { %v636_v51 = vpop.permute.xlu0 %635 }
 0x5aa   :  { %v638_v53 = vmul.f32 %v636_v51, %v631_v52 }
 0x5ac   :  { %640 = vrot.lane.b32.xlu2 %v638_v53, %s2125_s1  ;;  %v162_v53 = vadd.f32 %v2340_v38, %v2249_v16 }
 0x5fe   :  { %v576_v54 = vpop.permute.xlu1 %575 }
 0x5ff   :  { %v578_v56 = vadd.f32 %v576_v54, %v114_v45  ;;  %v49_v45 = vld [vmem:[%s2853_s3 + $0x20] sm:$0xff] }
 0x600   :  { %210 = vmatpush.msrb.mxu2 %v49_v45 }
 0x601   :  { %2016 = vtanh.f32 %v578_v56 }
 0x602   :  { %749 = vmatpush.msra.mxu2 %v2225_v11 }
 0x604   :  { %750 = vmatpush.msra.mxu2 %v2245_v15 }
 0x606   :  { %v641_v57 = vpop.permute.xlu2 %640  ;;  %751 = vmatpush.msra.mxu2 %v2262_v19  ;;  %v2480_v14 = vpop.permute.xlu1 %656 }
 0x607   :  { %v2017_v60 = vpop.eup %2016  ;;  %v643_v61 = vadd.f32 %v641_v57, %v165_v62  ;;  %v38_v62 = vld [vmem:[%s2858_s2] sm:$0xff]  ;;  %vm658_vm14 = vcmp.eq.s32.totalorder %v2480_v14, 1  ;;  %v126_v14 = vadd.f32 %v2318_v25, %v2209_v8 }
 0x608   :  { %582 = vrot.lane.b32.xlu0 %v2017_v60, %s2123_s27  ;;  %1911 = vmatmul.msk.f32.vlgmr.msrb.gmra.mxu2 %vm65_vm0, %v38_v62  ;;  %v117_v60 = vadd.f32 %v2316_v24, %v2209_v8 }
 0x609   :  { %2018 = vtanh.f32 %v643_v61  ;;  %752 = vmatpush.msra.mxu2 %v2272_v20 }
 0x60b   :  { %1025 = vmatpush.msrb.mxu2 %v2225_v11 }
 0x60d   :  { %1026 = vmatpush.msrb.mxu2 %v2245_v15 }
 0x60f   :  { %v2019_v0 = vpop.eup %2018  ;;  %1027 = vmatpush.msrb.mxu2 %v2262_v19 }
 0x610   :  { %647 = vrot.lane.b32.xlu2 %v2019_v0, %s2123_s27  ;;  %663 = vperm.xlu0 %1982, %v661_v63  }
 0x611   :  { %1912 = vmatmul.msk.f32.gmra.mxu2 %vm65_vm0, %v39_v4 }
 0x612   :  { %1028 = vmatpush.msrb.mxu2 %v2272_v20 }
 0x619   :  { %1913 = vmatmul.msk.f32.gmra.mxu2 %vm65_vm0, %v40_v6 }
 0x621   :  { %1914 = vmatmul.msk.f32.gmra.mxu2 %vm65_vm0, %v41_v35 }
 0x66a   :  { %v648_v17 = vpop.permute.xlu2 %647 }
 0x66b   :  { %v650_v39 = vmul.f32 %v648_v17, %v645_v22 }
 0x66d   :  { %v652_v34 = vadd.f32 %v651_v40, %v650_v39 }
 0x67a   :  { %v583_v12 = vpop.permute.xlu0 %582 }
 0x67b   :  { %v585_v21 = vmul.f32 %v583_v12, %v580_v7 }
 0x67d   :  { %v587_v2 = vadd.f32 %v586_v18, %v585_v21 }
 0x67f   :  { %v2490_v41 = vsel %vm658_vm14, %v587_v2, %v2414_v9  ;;  %v42_v9 = vld [vmem:[%s2858_s2 + $0x20] sm:$0xff] }
 0x680   :  { %668 = vrot.lane.b32.xlu1 %v2490_v41, %s2123_s27  ;;  %1915 = vmatmul.msk.f32.gmra.mxu2 %vm65_vm0, %v42_v9 }
 0x682   :  { %v2496_v44 = vpop.permute.xlu0 %663 }
 0x683   :  { %vm665_vm15 = vcmp.eq.s32.totalorder %v2496_v44, 1 }
 0x684   :  { %v2502_v46 = vsel %vm665_vm15, %v652_v34, %v2425_v48  ;;  %v44_v48 = vld [vmem:[%s2858_s2 + $0x30] sm:$0xff] }
 0x685   :  { %733 = vrot.lane.b32.xlu2 %v2502_v46, %s2123_s27 }
 0x688   :  { %1916 = vmatmul.msk.f32.gmra.mxu2 %vm65_vm0, %v43_v47 }
 0x690   :  { %1917 = vmatmul.msk.f32.gmra.mxu2 %vm65_vm0, %v44_v48 }
 0x6df   :  { %v734_v55 = vpop.permute.xlu2 %733 }
 0x6e0   :  { %1930 = vmatmul.msk.f32.vlgmr.msra.gmra.mxu2 %vm233_vm13, %v734_v55 }
 0x6e1   :  { %1289 = vmatpush.msra.mxu2 %v2225_v11  ;;  %v2530_v11 = vpop.f32.mrf.mxu2 }
 0x6e3   :  { %1290 = vmatpush.msra.mxu2 %v2245_v15 }
 0x6e5   :  { %1291 = vmatpush.msra.mxu2 %v2262_v19 }
 0x6e7   :  { %1292 = vmatpush.msra.mxu2 %v2272_v20 }
 0x6e9   :  { %v2532_v15 = vpop.f32.mrf.mxu2 }
 0x6f1   :  { %v2534_v19 = vpop.f32.mrf.mxu2 }
 0x6f2   :  { %v669_v50 = vpop.permute.xlu1 %668 }
 0x6f3   :  { %1928 = vmatmul.msk.f32.vlgmr.msrb.gmra.mxu3 %vm233_vm13, %v669_v50 }
 0x6f4   :  { %1092 = vmatpush.msrb.mxu3 %v2187_v3 }
 0x6f6   :  { %1093 = vmatpush.msrb.mxu3 %v2197_v5 }
 0x6f8   :  { %1094 = vmatpush.msrb.mxu3 %v2217_v10 }
 0x6f9   :  { %v2536_v20 = vpop.f32.mrf.mxu2 }
 0x6fa   :  { %1095 = vmatpush.msrb.mxu3 %v2235_v13 }
 0x703   :  { %v2538_v42 = vpop.f32.mrf.mxu2 }
 0x70b   :  { %v2540_v51 = vpop.f32.mrf.mxu2 }
 0x713   :  { %v2542_v3 = vpop.f32.mrf.mxu2 }
 0x763   :  { %v754_v5 = vpop.f32.mrf.mxu2 }
 0x764   :  { %v777_v10 = vadd.f32 %v754_v5, %v2330_v32  ;;  %v757_v54 = vadd.f32 %v754_v5, %v162_v53 }
 0x766   :  { %779 = vrot.lane.b32.xlu1 %v777_v10, %s2125_s1  ;;  %v1931_v56 = vmul.f32 -1.442695, %v757_v54 }
 0x768   :  { %2020 = vpow2.f32 %v1931_v56 }
 0x76e   :  { %v2021_v57 = vpop.eup %2020 }
 0x76f   :  { %v761_v61 = vadd.f32 1.0, %v2021_v57 }
 0x771   :  { %2022 = vrcp.f32 %v761_v61  ;;  %v773_v12 = vand.u32 2147483648, %v761_v61  ;;  %vm767_vm1 = vweird.f32 %v761_v61  ;;  %v771_v17 = vand.u32 2147483647, %v761_v61 }
 0x773   :  { %v774_v21 = vor.u32 1.1754944e-38, %v773_v12  ;;  %vm772_vm3 = vcmp.eq.f32.partialorder %v771_v17, 8.507059e+37 }
 0x776   :  { %v689_v13 = vpop.f32.mrf.mxu3 }
 0x777   :  { %v712_v52 = vadd.f32 %v689_v13, %v2324_v28  ;;  %v692_v63 = vadd.f32 %v689_v13, %v117_v60  ;;  %v2023_v1 = vpop.eup %2022 }
 0x778   :  { %v763_v45 = vmul.f32 %v2023_v1, %v761_v61  ;;  %vm768_vm0 = vweird.f32 %v2023_v1 }
 0x779   :  { %714 = vrot.lane.b32.xlu0 %v712_v52, %s2125_s1  ;;  %v1929_v0 = vmul.f32 -1.442695, %v692_v63  ;;  %vm769_vm2 = vmor %vm767_vm1, %vm768_vm0  ;;  %v798_v52 = vsel %vm797_vm8, 1, %v2126_v30  ;;  %vm804_vm0 = vcmp.gt.s32.totalorder %v2353_v23, 4 }
 0x77a   :  { %v764_v4 = vsub.f32 1.0, %v763_v45 }
 0x77b   :  { %2024 = vpow2.f32 %v1929_v0 }
 0x77c   :  { %v765_v7 = vmul.f32 %v2023_v1, %v764_v4 }
 0x77e   :  { %v766_v38 = vadd.f32 %v2023_v1, %v765_v7 }
 0x780   :  { %v770_v24 = vsel %vm769_vm2, %v2023_v1, %v766_v38  ;;  %v805_v1 = vsel %vm804_vm0, 1, %v2126_v30 }
 0x781   :  { %v2025_v62 = vpop.eup %2024  ;;  %v775_v22 = vsel %vm772_vm3, %v774_v21, %v770_v24 }
 0x782   :  { %v696_v6 = vadd.f32 1.0, %v2025_v62  ;;  %v789_v7 = vsub.f32 1.0, %v775_v22  ;;  %v795_v30 = vmul.f32 %v775_v22, %v2502_v46 }
 0x784   :  { %2026 = vrcp.f32 %v696_v6  ;;  %v708_v47 = vand.u32 2147483648, %v696_v6  ;;  %vm702_vm5 = vweird.f32 %v696_v6  ;;  %v706_v48 = vand.u32 2147483647, %v696_v6 }
 0x786   :  { %v709_v50 = vor.u32 1.1754944e-38, %v708_v47  ;;  %vm707_vm7 = vcmp.eq.f32.partialorder %v706_v48, 8.507059e+37 }
 0x78a   :  { %v2027_v18 = vpop.eup %2026 }
 0x78b   :  { %v698_v39 = vmul.f32 %v2027_v18, %v696_v6  ;;  %vm703_vm4 = vweird.f32 %v2027_v18 }
 0x78c   :  { %vm704_vm6 = vmor %vm702_vm5, %vm703_vm4 }
 0x78d   :  { %v699_v40 = vsub.f32 1.0, %v698_v39 }
 0x78f   :  { %v700_v34 = vmul.f32 %v2027_v18, %v699_v40  ;;  %v120_v40 = vadd.f32 %v2320_v26, %v2209_v8 }
 0x791   :  { %v701_v9 = vadd.f32 %v2027_v18, %v700_v34 }
 0x793   :  { %v705_v55 = vsel %vm704_vm6, %v2027_v18, %v701_v9 }
 0x794   :  { %v710_v10 = vsel %vm707_vm7, %v709_v50, %v705_v55 }
 0x795   :  { %v724_v45 = vsub.f32 1.0, %v710_v10 }
 0x7d8   :  { %v780_v2 = vpop.permute.xlu1 %779 }
 0x7d9   :  { %v782_v35 = vmul.f32 %v780_v2, %v775_v22 }
 0x7db   :  { %784 = vrot.lane.b32.xlu0 %v782_v35, %s2125_s1 }
 0x7eb   :  { %v715_v5 = vpop.permute.xlu0 %714 }
 0x7ec   :  { %v717_v13 = vmul.f32 %v715_v5, %v710_v10 }
 0x7ee   :  { %719 = vrot.lane.b32.xlu2 %v717_v13, %s2125_s1 }
 0x7f6   :  { %800 = vperm.xlu2 %1983, %v798_v52  }
 0x848   :  { %v720_v54 = vpop.permute.xlu2 %719 }
 0x849   :  { %v722_v56 = vadd.f32 %v720_v54, %v117_v60  ;;  %v730_v60 = vmul.f32 %v710_v10, %v2490_v41 }
 0x84b   :  { %2028 = vtanh.f32 %v722_v56 }
 0x84d   :  { %v785_v57 = vpop.permute.xlu0 %784 }
 0x84e   :  { %v787_v61 = vadd.f32 %v785_v57, %v162_v53 }
 0x850   :  { %2030 = vtanh.f32 %v787_v61  ;;  %v2560_v4 = vpop.permute.xlu2 %800 }
 0x851   :  { %v2029_v63 = vpop.eup %2028  ;;  %vm802_vm1 = vcmp.eq.s32.totalorder %v2560_v4, 1  ;;  %v123_v4 = vadd.f32 %v2528_v59, %v2209_v8 }
 0x852   :  { %726 = vrot.lane.b32.xlu1 %v2029_v63, %s2123_s27 }
 0x856   :  { %v2031_v0 = vpop.eup %2030 }
 0x857   :  { %791 = vrot.lane.b32.xlu0 %v2031_v0, %s2123_s27 }
 0x85a   :  { %807 = vperm.xlu1 %1981, %v805_v1  }
 0x8c4   :  { %v727_v62 = vpop.permute.xlu1 %726 }
 0x8c5   :  { %v729_v6 = vmul.f32 %v727_v62, %v724_v45 }
 0x8c7   :  { %v731_v53 = vadd.f32 %v730_v60, %v729_v6 }
 0x8c9   :  { %v792_v38 = vpop.permute.xlu0 %791  ;;  %v2567_v23 = vsel %vm802_vm1, %v731_v53, %v2490_v41 }
 0x8ca   :  { %v794_v12 = vmul.f32 %v792_v38, %v789_v7  ;;  %812 = vrot.lane.b32.xlu2 %v2567_v23, %s2123_s27 }
 0x8cc   :  { %v796_v17 = vadd.f32 %v795_v30, %v794_v12  ;;  %v2572_v18 = vpop.permute.xlu1 %807 }
 0x8cd   :  { %vm809_vm2 = vcmp.eq.s32.totalorder %v2572_v18, 1 }
 0x8ce   :  { %v2578_v24 = vsel %vm809_vm2, %v796_v17, %v2502_v46  ;;  %v159_v46 = vadd.f32 %v2338_v37, %v2249_v16 }
 0x8cf   :  { %877 = vrot.lane.b32.xlu0 %v2578_v24, %s2123_s27 }
 0x924   :  { %v813_v41 = vpop.permute.xlu2 %812 }
 0x925   :  { %1932 = vmatmul.msk.f32.vlgmr.msra.gmra.mxu3 %vm233_vm13, %v813_v41 }
 0x941   :  { %v878_v21 = vpop.permute.xlu0 %877 }
 0x942   :  { %1934 = vmatmul.msk.f32.vlgmr.msrb.gmra.mxu0 %vm233_vm13, %v878_v21 }
 0x9a8   :  { %v833_v22 = vpop.f32.mrf.mxu3 }
 0x9a9   :  { %v856_v2 = vadd.f32 %v833_v22, %v2324_v28  ;;  %v836_v9 = vadd.f32 %v833_v22, %v120_v40 }
 0x9ab   :  { %858 = vrot.lane.b32.xlu1 %v856_v2, %s2125_s1  ;;  %v1933_v48 = vmul.f32 -1.442695, %v836_v9 }
 0x9bf   :  { %v898_v39 = vpop.f32.mrf.mxu0 }
 0x9c0   :  { %v921_v35 = vadd.f32 %v898_v39, %v2330_v32  ;;  %v901_v34 = vadd.f32 %v898_v39, %v159_v46 }
 0x9c2   :  { %923 = vrot.lane.b32.xlu2 %v921_v35, %s2125_s1  ;;  %v1935_v47 = vmul.f32 -1.442695, %v901_v34 }
 0x9c4   :  { %2032 = vpow2.f32 %v1935_v47 }
 0x9c5   :  { %2034 = vpow2.f32 %v1933_v48 }
 0x9ca   :  { %v2033_v55 = vpop.eup %2032 }
 0x9cb   :  { %v2035_v50 = vpop.eup %2034  ;;  %v905_v5 = vadd.f32 1.0, %v2033_v55 }
 0x9cc   :  { %v840_v10 = vadd.f32 1.0, %v2035_v50 }
 0x9cd   :  { %2036 = vrcp.f32 %v905_v5  ;;  %v917_v0 = vand.u32 2147483648, %v905_v5  ;;  %vm911_vm5 = vweird.f32 %v905_v5  ;;  %v915_v45 = vand.u32 2147483647, %v905_v5 }
 0x9ce   :  { %2038 = vrcp.f32 %v840_v10  ;;  %v852_v62 = vand.u32 2147483648, %v840_v10  ;;  %vm846_vm7 = vweird.f32 %v840_v10  ;;  %v850_v60 = vand.u32 2147483647, %v840_v10 }
 0x9cf   :  { %v918_v53 = vor.u32 1.1754944e-38, %v917_v0  ;;  %vm916_vm0 = vcmp.eq.f32.partialorder %v915_v45, 8.507059e+37  ;;  %v156_v0 = vadd.f32 %v2336_v36, %v2249_v16 }
 0x9d0   :  { %v853_v38 = vor.u32 1.1754944e-38, %v852_v62  ;;  %vm851_vm11 = vcmp.eq.f32.partialorder %v850_v60, 8.507059e+37 }
 0x9d3   :  { %v2037_v13 = vpop.eup %2036 }
 0x9d4   :  { %v2039_v52 = vpop.eup %2038  ;;  %v907_v54 = vmul.f32 %v2037_v13, %v905_v5  ;;  %vm912_vm3 = vweird.f32 %v2037_v13 }
 0x9d5   :  { %v842_v56 = vmul.f32 %v2039_v52, %v840_v10  ;;  %vm847_vm4 = vweird.f32 %v2039_v52  ;;  %vm913_vm6 = vmor %vm911_vm5, %vm912_vm3 }
 0x9d6   :  { %v908_v37 = vsub.f32 1.0, %v907_v54  ;;  %vm848_vm8 = vmor %vm846_vm7, %vm847_vm4 }
 0x9d7   :  { %v843_v57 = vsub.f32 1.0, %v842_v56 }
 0x9d8   :  { %v909_v61 = vmul.f32 %v2037_v13, %v908_v37 }
 0x9d9   :  { %v844_v26 = vmul.f32 %v2039_v52, %v843_v57 }
 0x9da   :  { %v910_v63 = vadd.f32 %v2037_v13, %v909_v61 }
 0x9db   :  { %v845_v1 = vadd.f32 %v2039_v52, %v844_v26 }
 0x9dc   :  { %v914_v6 = vsel %vm913_vm6, %v2037_v13, %v910_v63 }
 0x9dd   :  { %v849_v7 = vsel %vm848_vm8, %v2039_v52, %v845_v1  ;;  %v919_v12 = vsel %vm916_vm0, %v918_v53, %v914_v6 }
 0x9de   :  { %v854_v41 = vsel %vm851_vm11, %v853_v38, %v849_v7  ;;  %v939_v52 = vmul.f32 %v919_v12, %v2578_v24 }
 0x9df   :  { %v868_v48 = vsub.f32 1.0, %v854_v41  ;;  %v874_v50 = vmul.f32 %v854_v41, %v2567_v23 }
 0xa1c   :  { %v924_v30 = vpop.permute.xlu2 %923 }
 0xa1d   :  { %v926_v17 = vmul.f32 %v924_v30, %v919_v12  ;;  %v859_v21 = vpop.permute.xlu1 %858 }
 0xa1e   :  { %v861_v22 = vmul.f32 %v859_v21, %v854_v41 }
 0xa1f   :  { %928 = vrot.lane.b32.xlu1 %v926_v17, %s2125_s1 }
 0xa20   :  { %863 = vrot.lane.b32.xlu0 %v861_v22, %s2125_s1 }
 0xa91   :  { %v929_v2 = vpop.permute.xlu1 %928 }
 0xa92   :  { %v931_v39 = vadd.f32 %v929_v2, %v159_v46  ;;  %v864_v35 = vpop.permute.xlu0 %863 }
 0xa93   :  { %v866_v34 = vadd.f32 %v864_v35, %v120_v40  ;;  %v933_v40 = vsub.f32 1.0, %v919_v12 }
 0xa94   :  { %2040 = vtanh.f32 %v931_v39 }
 0xa95   :  { %2042 = vtanh.f32 %v866_v34 }
 0xa9a   :  { %v2041_v9 = vpop.eup %2040 }
 0xa9b   :  { %v2043_v47 = vpop.eup %2042  ;;  %935 = vrot.lane.b32.xlu0 %v2041_v9, %s2123_s27 }
 0xa9c   :  { %870 = vrot.lane.b32.xlu2 %v2043_v47, %s2123_s27 }
 0xaf6   :  { %v871_v55 = vpop.permute.xlu2 %870 }
 0xaf7   :  { %v873_v5 = vmul.f32 %v871_v55, %v868_v48 }
 0xaf9   :  { %v875_v10 = vadd.f32 %v874_v50, %v873_v5 }
 0xafb   :  { %v2600_v46 = vsel %vm809_vm2, %v875_v10, %v2567_v23 }
 0xafc   :  { %944 = vrot.lane.b32.xlu1 %v2600_v46, %s2123_s27 }
 0xb0d   :  { %v936_v13 = vpop.permute.xlu0 %935 }
 0xb0e   :  { %v938_v54 = vmul.f32 %v936_v13, %v933_v40 }
 0xb10   :  { %v940_v56 = vadd.f32 %v939_v52, %v938_v54 }
 0xb12   :  { %v2608_v37 = vsel %vm802_vm1, %v940_v56, %v2578_v24 }
 0xb13   :  { %1009 = vrot.lane.b32.xlu2 %v2608_v37, %s2123_s27 }
 0xb6d   :  { %v1010_v18 = vpop.permute.xlu2 %1009 }
 0xb6e   :  { %1938 = vmatmul.msk.f32.vlgmr.msrb.gmra.mxu2 %vm233_vm13, %v1010_v18  ;;  %v945_v23 = vpop.permute.xlu1 %944 }
 0xb6f   :  { %1936 = vmatmul.msk.f32.vlgmr.msra.gmra.mxu1 %vm233_vm13, %v945_v23 }
 0xbec   :  { %v965_v57 = vpop.f32.mrf.mxu1 }
 0xbed   :  { %v988_v61 = vadd.f32 %v965_v57, %v2324_v28  ;;  %v968_v24 = vadd.f32 %v965_v57, %v123_v4 }
 0xbef   :  { %990 = vrot.lane.b32.xlu0 %v988_v61, %s2125_s1  ;;  %v1937_v1 = vmul.f32 -1.442695, %v968_v24 }
 0xbf1   :  { %v1030_v26 = vpop.f32.mrf.mxu2  ;;  %2044 = vpow2.f32 %v1937_v1 }
 0xbf2   :  { %v1053_v63 = vadd.f32 %v1030_v26, %v2330_v32  ;;  %v1033_v45 = vadd.f32 %v1030_v26, %v156_v0 }
 0xbf4   :  { %1055 = vrot.lane.b32.xlu1 %v1053_v63, %s2125_s1  ;;  %v1939_v62 = vmul.f32 -1.442695, %v1033_v45 }
 0xbf6   :  { %2046 = vpow2.f32 %v1939_v62 }
 0xbf7   :  { %v2045_v60 = vpop.eup %2044 }
 0xbf8   :  { %v972_v6 = vadd.f32 1.0, %v2045_v60 }
 0xbfa   :  { %2048 = vrcp.f32 %v972_v6  ;;  %v984_v36 = vand.u32 2147483648, %v972_v6  ;;  %vm978_vm1 = vweird.f32 %v972_v6  ;;  %v982_v39 = vand.u32 2147483647, %v972_v6 }
 0xbfc   :  { %v2047_v53 = vpop.eup %2046  ;;  %v985_v34 = vor.u32 1.1754944e-38, %v984_v36  ;;  %vm983_vm4 = vcmp.eq.f32.partialorder %v982_v39, 8.507059e+37  ;;  %v153_v36 = vadd.f32 %v2332_v33, %v2249_v16 }
 0xbfd   :  { %v1037_v7 = vadd.f32 1.0, %v2047_v53 }
 0xbff   :  { %2050 = vrcp.f32 %v1037_v7  ;;  %v1049_v47 = vand.u32 2147483648, %v1037_v7  ;;  %vm1043_vm5 = vweird.f32 %v1037_v7  ;;  %v1047_v50 = vand.u32 2147483647, %v1037_v7 }
 0xc00   :  { %v2049_v38 = vpop.eup %2048 }
 0xc01   :  { %v974_v30 = vmul.f32 %v2049_v38, %v972_v6  ;;  %vm979_vm11 = vweird.f32 %v2049_v38  ;;  %v1050_v40 = vor.u32 1.1754944e-38, %v1049_v47  ;;  %vm1048_vm7 = vcmp.eq.f32.partialorder %v1047_v50, 8.507059e+37 }
 0xc02   :  { %vm980_vm2 = vmor %vm978_vm1, %vm979_vm11 }
 0xc03   :  { %v975_v17 = vsub.f32 1.0, %v974_v30 }
 0xc05   :  { %v2051_v12 = vpop.eup %2050  ;;  %v976_v41 = vmul.f32 %v2049_v38, %v975_v17 }
 0xc06   :  { %v1039_v59 = vmul.f32 %v2051_v12, %v1037_v7  ;;  %vm1044_vm3 = vweird.f32 %v2051_v12 }
 0xc07   :  { %v977_v22 = vadd.f32 %v2049_v38, %v976_v41  ;;  %vm1045_vm6 = vmor %vm1043_vm5, %vm1044_vm3 }
 0xc08   :  { %v1040_v21 = vsub.f32 1.0, %v1039_v59 }
 0xc09   :  { %v981_v35 = vsel %vm980_vm2, %v2049_v38, %v977_v22 }
 0xc0a   :  { %v1041_v2 = vmul.f32 %v2051_v12, %v1040_v21  ;;  %v986_v55 = vsel %vm983_vm4, %v985_v34, %v981_v35 }
 0xc0b   :  { %v1000_v63 = vsub.f32 1.0, %v986_v55  ;;  %v1006_v1 = vmul.f32 %v986_v55, %v2600_v46 }
 0xc0c   :  { %v1042_v9 = vadd.f32 %v2051_v12, %v1041_v2 }
 0xc0e   :  { %v1046_v10 = vsel %vm1045_vm6, %v2051_v12, %v1042_v9 }
 0xc0f   :  { %v1051_v13 = vsel %vm1048_vm7, %v1050_v40, %v1046_v10 }
 0xc10   :  { %v1065_v60 = vsub.f32 1.0, %v1051_v13  ;;  %v1071_v53 = vmul.f32 %v1051_v13, %v2608_v37 }
 0xc61   :  { %v991_v48 = vpop.permute.xlu0 %990 }
 0xc62   :  { %v993_v5 = vmul.f32 %v991_v48, %v986_v55 }
 0xc64   :  { %995 = vrot.lane.b32.xlu2 %v993_v5, %s2125_s1 }
 0xc66   :  { %v1056_v52 = vpop.permute.xlu1 %1055 }
 0xc67   :  { %v1058_v54 = vmul.f32 %v1056_v52, %v1051_v13 }
 0xc69   :  { %1060 = vrot.lane.b32.xlu0 %v1058_v54, %s2125_s1 }
 0xcbe   :  { %v996_v56 = vpop.permute.xlu2 %995 }
 0xcbf   :  { %v998_v18 = vadd.f32 %v996_v56, %v123_v4 }
 0xcc1   :  { %2052 = vtanh.f32 %v998_v18 }
 0xcc7   :  { %v2053_v23 = vpop.eup %2052 }
 0xcc8   :  { %1002 = vrot.lane.b32.xlu1 %v2053_v23, %s2123_s27 }
 0xcdb   :  { %v1061_v57 = vpop.permute.xlu0 %1060 }
 0xcdc   :  { %v1063_v61 = vadd.f32 %v1061_v57, %v156_v0 }
 0xcde   :  { %2054 = vtanh.f32 %v1063_v61 }
 0xce4   :  { %v2055_v26 = vpop.eup %2054 }
 0xce5   :  { %1067 = vrot.lane.b32.xlu2 %v2055_v26, %s2123_s27 }
 0xd3a   :  { %v1003_v24 = vpop.permute.xlu1 %1002 }
 0xd3b   :  { %v1005_v45 = vmul.f32 %v1003_v24, %v1000_v63 }
 0xd3d   :  { %v1007_v62 = vadd.f32 %v1006_v1, %v1005_v45 }
 0xd3f   :  { %v1068_v6 = vpop.permute.xlu2 %1067  ;;  %v2630_v4 = vsel %vm665_vm15, %v1007_v62, %v2600_v46 }
 0xd40   :  { %v1070_v0 = vmul.f32 %v1068_v6, %v1065_v60  ;;  %1076 = vrot.lane.b32.xlu0 %v2630_v4, %s2123_s27 }
 0xd42   :  { %v1072_v7 = vadd.f32 %v1071_v53, %v1070_v0 }
 0xd44   :  { %v2638_v38 = vsel %vm658_vm14, %v1072_v7, %v2608_v37 }
 0xd45   :  { %1141 = vrot.lane.b32.xlu1 %v2638_v38, %s2123_s27 }
 0xdb2   :  { %v1077_v30 = vpop.permute.xlu0 %1076 }
 0xdb3   :  { %1940 = vmatmul.msk.f32.vlgmr.msrb.gmra.mxu3 %vm233_vm13, %v1077_v30 }
 0xdb7   :  { %v1142_v44 = vpop.permute.xlu1 %1141 }
 0xdb8   :  { %1942 = vmatmul.msk.f32.vlgmr.msra.gmra.mxu0 %vm233_vm13, %v1142_v44 }
 0xe35   :  { %v1162_v46 = vpop.f32.mrf.mxu0 }
 0xe36   :  { %v1185_v12 = vadd.f32 %v1162_v46, %v2330_v32  ;;  %v1097_v17 = vpop.f32.mrf.mxu3  ;;  %v1165_v2 = vadd.f32 %v1162_v46, %v153_v36 }
 0xe37   :  { %v1120_v59 = vadd.f32 %v1097_v17, %v2324_v28  ;;  %v1100_v37 = vadd.f32 %v1097_v17, %v126_v14 }
 0xe38   :  { %1187 = vrot.lane.b32.xlu0 %v1185_v12, %s2125_s1  ;;  %v1943_v35 = vmul.f32 -1.442695, %v1165_v2 }
 0xe39   :  { %1122 = vrot.lane.b32.xlu2 %v1120_v59, %s2125_s1  ;;  %v1941_v41 = vmul.f32 -1.442695, %v1100_v37 }
 0xe3b   :  { %2056 = vpow2.f32 %v1941_v41 }
 0xe41   :  { %v2057_v21 = vpop.eup %2056 }
 0xe42   :  { %v1104_v22 = vadd.f32 1.0, %v2057_v21 }
 0xe44   :  { %2058 = vrcp.f32 %v1104_v22  ;;  %v1116_v25 = vand.u32 2147483648, %v1104_v22  ;;  %vm1110_vm15 = vweird.f32 %v1104_v22  ;;  %v1114_v5 = vand.u32 2147483647, %v1104_v22 }
 0xe45   :  { %2060 = vpow2.f32 %v1943_v35 }
 0xe46   :  { %v1117_v40 = vor.u32 1.1754944e-38, %v1116_v25  ;;  %vm1115_vm0 = vcmp.eq.f32.partialorder %v1114_v5, 8.507059e+37 }
 0xe4a   :  { %v2059_v39 = vpop.eup %2058 }
 0xe4b   :  { %v1106_v34 = vmul.f32 %v2059_v39, %v1104_v22  ;;  %v2061_v47 = vpop.eup %2060  ;;  %vm1111_vm14 = vweird.f32 %v2059_v39 }
 0xe4c   :  { %v1169_v55 = vadd.f32 1.0, %v2061_v47  ;;  %vm1112_vm8 = vmor %vm1110_vm15, %vm1111_vm14  ;;  %v150_v47 = vadd.f32 %v2326_v29, %v2249_v16 }
 0xe4d   :  { %v1107_v9 = vsub.f32 1.0, %v1106_v34 }
 0xe4e   :  { %2062 = vrcp.f32 %v1169_v55  ;;  %v1181_v61 = vand.u32 2147483648, %v1169_v55  ;;  %vm1175_vm1 = vweird.f32 %v1169_v55  ;;  %v1179_v26 = vand.u32 2147483647, %v1169_v55 }
 0xe4f   :  { %v1108_v48 = vmul.f32 %v2059_v39, %v1107_v9 }
 0xe50   :  { %v1182_v24 = vor.u32 1.1754944e-38, %v1181_v61  ;;  %vm1180_vm3 = vcmp.eq.f32.partialorder %v1179_v26, 8.507059e+37 }
 0xe51   :  { %v1109_v50 = vadd.f32 %v2059_v39, %v1108_v48 }
 0xe53   :  { %v1113_v10 = vsel %vm1112_vm8, %v2059_v39, %v1109_v50  ;;  %vm2863_vm8 = vcmp.eq.s32.totalorder %v2364_v49, 1 }
 0xe54   :  { %v1118_v13 = vsel %vm1115_vm0, %v1117_v40, %v1113_v10  ;;  %v2063_v52 = vpop.eup %2062 }
 0xe55   :  { %v1171_v56 = vmul.f32 %v2063_v52, %v1169_v55  ;;  %vm1176_vm11 = vweird.f32 %v2063_v52  ;;  %v1132_v12 = vsub.f32 1.0, %v1118_v13  ;;  %v1138_v41 = vmul.f32 %v1118_v13, %v2630_v4 }
 0xe56   :  { %vm1177_vm2 = vmor %vm1175_vm1, %vm1176_vm11 }
 0xe57   :  { %v1172_v18 = vsub.f32 1.0, %v1171_v56 }
 0xe59   :  { %v1173_v23 = vmul.f32 %v2063_v52, %v1172_v18 }
 0xe5b   :  { %v1174_v57 = vadd.f32 %v2063_v52, %v1173_v23 }
 0xe5d   :  { %v1178_v63 = vsel %vm1177_vm2, %v2063_v52, %v1174_v57 }
 0xe5e   :  { %v1183_v45 = vsel %vm1180_vm3, %v1182_v24, %v1178_v63 }
 0xe5f   :  { %v1197_v44 = vsub.f32 1.0, %v1183_v45  ;;  %v1203_v17 = vmul.f32 %v1183_v45, %v2638_v38 }
 0xe93   :  { %v1123_v33 = vpop.permute.xlu2 %1122 }
 0xe94   :  { %v1125_v54 = vmul.f32 %v1123_v33, %v1118_v13 }
 0xe96   :  { %1127 = vrot.lane.b32.xlu1 %v1125_v54, %s2125_s1 }
 0xeaa   :  { %v1188_v1 = vpop.permute.xlu0 %1187 }
 0xeab   :  { %v1190_v62 = vmul.f32 %v1188_v1, %v1183_v45 }
 0xead   :  { %1192 = vrot.lane.b32.xlu2 %v1190_v62, %s2125_s1 }
 0xf07   :  { %v1193_v60 = vpop.permute.xlu2 %1192 }
 0xf08   :  { %v1195_v6 = vadd.f32 %v1193_v60, %v153_v36  ;;  %v1128_v53 = vpop.permute.xlu1 %1127 }
 0xf09   :  { %v1130_v0 = vadd.f32 %v1128_v53, %v126_v14 }
 0xf0a   :  { %2064 = vtanh.f32 %v1195_v6 }
 0xf0b   :  { %2066 = vtanh.f32 %v1130_v0 }
 0xf10   :  { %v2065_v7 = vpop.eup %2064 }
 0xf11   :  { %v2067_v30 = vpop.eup %2066  ;;  %1199 = vrot.lane.b32.xlu1 %v2065_v7, %s2123_s27 }
 0xf12   :  { %1134 = vrot.lane.b32.xlu0 %v2067_v30, %s2123_s27 }
 0xf83   :  { %v1200_v46 = vpop.permute.xlu1 %1199 }
 0xf84   :  { %v1202_v59 = vmul.f32 %v1200_v46, %v1197_v44  ;;  %v1135_v37 = vpop.permute.xlu0 %1134 }
 0xf85   :  { %v1137_v21 = vmul.f32 %v1135_v37, %v1132_v12 }
 0xf86   :  { %v1204_v22 = vadd.f32 %v1203_v17, %v1202_v59  ;;  %v2122_v17 = vld [vmem:[%s2856_s5] sm:$0x7] }
 0xf87   :  { %v1139_v14 = vadd.f32 %v1138_v41, %v1137_v21  ;;  %v2692_v59 = vperm.slane %v2122_v17, 2  ;;  %v1351_v21 = vld [vmem:[%s2859_s6 + $0x38] sm:$0xff] }
 0xf88   :  { %v2661_v36 = vsel %vm514_vm9, %v1204_v22, %v2638_v38  ;;  %v1350_v22 = vld [vmem:[%s2859_s6 + $0x30] sm:$0xff]  ;;  %1364 = vmatpush.msra.mxu3 %v1351_v21 }
 0xf89   :  { %1273 = vrot.lane.b32.xlu0 %v2661_v36, %s2123_s27  ;;  %v2668_v2 = vsel %vm521_vm10, %v1139_v14, %v2630_v4  ;;  %v213_v49 = vadd.f32 %v2530_v11, %v2692_v59  ;;  %v216_v21 = vadd.f32 %v2532_v15, %v2692_v59 }
 0xf8a   :  { %1208 = vrot.lane.b32.xlu2 %v2668_v2, %s2123_s27  ;;  %1365 = vmatpush.msra.mxu3 %v1350_v22 }
 0xfe4   :  { %v1209_v39 = vpop.permute.xlu2 %1208 }
 0xfe5   :  { %1944 = vmatmul.msk.f32.vlgmr.msrb.gmra.mxu1 %vm233_vm13, %v1209_v39 }
 0xffb   :  { %v1274_v35 = vpop.permute.xlu0 %1273 }
 0xffc   :  { %1946 = vmatmul.msk.f32.vlgmr.msra.gmra.mxu2 %vm233_vm13, %v1274_v35  ;;  %v1349_v35 = vld [vmem:[%s2859_s6 + $0x28] sm:$0xff] }
 0xffd   :  { %1366 = vmatpush.msra.mxu3 %v1349_v35 }
0x1062   :  { %v1229_v31 = vpop.f32.mrf.mxu1 }
0x1063   :  { %v1252_v38 = vadd.f32 %v1229_v31, %v2324_v28  ;;  %v1232_v4 = vadd.f32 %v1229_v31, %v129_v43 }
0x1065   :  { %1254 = vrot.lane.b32.xlu1 %v1252_v38, %s2125_s1  ;;  %v1945_v48 = vmul.f32 -1.442695, %v1232_v4  ;;  %v1348_v38 = vld [vmem:[%s2859_s6 + $0x20] sm:$0xff]  ;;  %v1345_v4 = vld [vmem:[%s2859_s6 + $0x8] sm:$0xff] }
0x1066   :  { %1367 = vmatpush.msra.mxu3 %v1348_v38 }
0x1067   :  { %2068 = vpow2.f32 %v1945_v48  ;;  %v60_v48 = vld [vmem:[%s2855_s4 + $0x48] sm:$0xff] }
0x106d   :  { %v2069_v28 = vpop.eup %2068 }
0x106e   :  { %v1236_v25 = vadd.f32 1.0, %v2069_v28 }
0x1070   :  { %v1248_v16 = vand.u32 2147483648, %v1236_v25  ;;  %vm1242_vm10 = vweird.f32 %v1236_v25  ;;  %v1246_v56 = vand.u32 2147483647, %v1236_v25 }
0x1072   :  { %v1249_v23 = vor.u32 1.1754944e-38, %v1248_v16  ;;  %vm1247_vm6 = vcmp.eq.f32.partialorder %v1246_v56, 8.507059e+37 }
0x107f   :  { %v1294_v34 = vpop.f32.mrf.mxu2 }
0x1080   :  { %v1317_v9 = vadd.f32 %v1294_v34, %v2330_v32  ;;  %v1297_v55 = vadd.f32 %v1294_v34, %v150_v47 }
0x1082   :  { %1319 = vrot.lane.b32.xlu2 %v1317_v9, %s2125_s1  ;;  %v1947_v50 = vmul.f32 -1.442695, %v1297_v55  ;;  %v1347_v9 = vld [vmem:[%s2859_s6 + $0x18] sm:$0xff]  ;;  %v59_v55 = vld [vmem:[%s2855_s4 + $0x40] sm:$0xff] }
0x1083   :  { %1368 = vmatpush.msra.mxu3 %v1347_v9 }
0x1084   :  { %2070 = vpow2.f32 %v1947_v50 }
0x1085   :  { %2072 = vrcp.f32 %v1236_v25 }
0x108a   :  { %v2071_v5 = vpop.eup %2070 }
0x108b   :  { %v1301_v10 = vadd.f32 1.0, %v2071_v5  ;;  %v2073_v32 = vpop.eup %2072 }
0x108c   :  { %v1238_v40 = vmul.f32 %v2073_v32, %v1236_v25  ;;  %vm1243_vm9 = vweird.f32 %v2073_v32 }
0x108d   :  { %2074 = vrcp.f32 %v1301_v10  ;;  %vm1244_vm4 = vmor %vm1242_vm10, %vm1243_vm9  ;;  %v1313_v61 = vand.u32 2147483648, %v1301_v10  ;;  %vm1307_vm7 = vweird.f32 %v1301_v10  ;;  %v1311_v24 = vand.u32 2147483647, %v1301_v10 }
0x108e   :  { %v1239_v13 = vsub.f32 1.0, %v1238_v40 }
0x108f   :  { %v1314_v62 = vor.u32 1.1754944e-38, %v1313_v61  ;;  %vm1312_vm15 = vcmp.eq.f32.partialorder %v1311_v24, 8.507059e+37 }
0x1090   :  { %v1240_v27 = vmul.f32 %v2073_v32, %v1239_v13 }
0x1092   :  { %v1241_v54 = vadd.f32 %v2073_v32, %v1240_v27 }
0x1093   :  { %v2075_v33 = vpop.eup %2074 }
0x1094   :  { %v1303_v8 = vmul.f32 %v2075_v33, %v1301_v10  ;;  %v1245_v18 = vsel %vm1244_vm4, %v2073_v32, %v1241_v54  ;;  %vm1308_vm5 = vweird.f32 %v2075_v33 }
0x1095   :  { %v1250_v26 = vsel %vm1247_vm6, %v1249_v23, %v1245_v18  ;;  %vm1309_vm14 = vmor %vm1307_vm7, %vm1308_vm5 }
0x1096   :  { %v1304_v52 = vsub.f32 1.0, %v1303_v8  ;;  %v1264_v37 = vsub.f32 1.0, %v1250_v26  ;;  %v1270_v14 = vmul.f32 %v1250_v26, %v2668_v2 }
0x1098   :  { %v1305_v29 = vmul.f32 %v2075_v33, %v1304_v52 }
0x109a   :  { %v1306_v57 = vadd.f32 %v2075_v33, %v1305_v29 }
0x109c   :  { %v1310_v45 = vsel %vm1309_vm14, %v2075_v33, %v1306_v57 }
0x109d   :  { %v2683_v6 = vsel %vm1312_vm15, %v1314_v62, %v1310_v45  ;;  %vm1883_vm15 = vcmask 392192  }
0x109e   :  { %v1329_v28 = vsub.f32 1.0, %v2683_v6  ;;  %v1335_v5 = vmul.f32 %v2683_v6, %v2661_v36 }
0x10d7   :  { %v1255_v63 = vpop.permute.xlu1 %1254 }
0x10d8   :  { %v1257_v1 = vmul.f32 %v1255_v63, %v1250_v26 }
0x10da   :  { %1259 = vrot.lane.b32.xlu0 %v1257_v1, %s2125_s1 }
0x10dc   :  { %v1320_v60 = vpop.permute.xlu2 %1319 }
0x10dd   :  { %v1322_v53 = vmul.f32 %v1320_v60, %v2683_v6 }
0x10df   :  { %1324 = vrot.lane.b32.xlu1 %v1322_v53, %s2125_s1 }
0x114c   :  { %v1260_v0 = vpop.permute.xlu0 %1259 }
0x114d   :  { %v1262_v7 = vadd.f32 %v1260_v0, %v129_v43  ;;  %v1346_v43 = vld [vmem:[%s2859_s6 + $0x10] sm:$0xff] }
0x114e   :  { %1369 = vmatpush.msra.mxu3 %v1346_v43 }
0x114f   :  { %2076 = vtanh.f32 %v1262_v7 }
0x1150   :  { %1370 = vmatpush.msra.mxu3 %v1345_v4 }
0x1151   :  { %v1325_v30 = vpop.permute.xlu1 %1324 }
0x1152   :  { %v1327_v44 = vadd.f32 %v1325_v30, %v150_v47  ;;  %1371 = vmatpush.msra.mxu3 %v1344_v58  ;;  %v61_v47 = vld [vmem:[%s2855_s4 + $0x50] sm:$0xff] }
0x1154   :  { %2078 = vtanh.f32 %v1327_v44 }
0x1155   :  { %v2077_v46 = vpop.eup %2076 }
0x1156   :  { %1266 = vrot.lane.b32.xlu2 %v2077_v46, %s2123_s27 }
0x115a   :  { %v2079_v12 = vpop.eup %2078 }
0x115b   :  { %1331 = vrot.lane.b32.xlu0 %v2079_v12, %s2123_s27 }
0x115e   :  { %1420 = vrot.lane.b32.xlu2 %v2692_v59, %s2123_s27 }
0x11b0   :  { %v1267_v41 = vpop.permute.xlu2 %1266 }
0x11b1   :  { %v1269_v39 = vmul.f32 %v1267_v41, %v1264_v37 }
0x11b3   :  { %v1271_v31 = vadd.f32 %v1270_v14, %v1269_v39 }
0x11b5   :  { %v1337_v34 = vsel %vm377_vm12, %v1271_v31, %v2668_v2  ;;  %v62_v2 = vld [vmem:[%s2855_s4 + $0x58] sm:$0xff]  ;;  %vm1352_vm12 = vcmask 523264   ;;  %s2127_s4 = smov 32  }
0x11b6   :  { %1340 = vrot.lane.b32.xlu1 %v1337_v34, %s2123_s27  ;;  %1391 = vmatpush.msrb.mxu0 %v62_v2 }
0x11b7   :  { %1463 = vmatpush.msra.mxu1 %v62_v2  ;;  %1528 = vmatpush.msrb.mxu2 %v62_v2 }
0x11b8   :  { %1788 = vmatpush.msrb.mxu3 %v62_v2  ;;  %1392 = vmatpush.msrb.mxu0 %v61_v47  ;;  %v2745_v8 = vpop.permute.xlu2 %1420 }
0x11b9   :  { %1464 = vmatpush.msra.mxu1 %v61_v47  ;;  %1529 = vmatpush.msrb.mxu2 %v61_v47 }
0x11ba   :  { %1789 = vmatpush.msrb.mxu3 %v61_v47  ;;  %1393 = vmatpush.msrb.mxu0 %v60_v48 }
0x11bb   :  { %1465 = vmatpush.msra.mxu1 %v60_v48  ;;  %1530 = vmatpush.msrb.mxu2 %v60_v48 }
0x11bc   :  { %1790 = vmatpush.msrb.mxu3 %v60_v48  ;;  %1394 = vmatpush.msrb.mxu0 %v59_v55 }
0x11bd   :  { %1466 = vmatpush.msra.mxu1 %v59_v55  ;;  %1531 = vmatpush.msrb.mxu2 %v59_v55 }
0x11be   :  { %1593 = vmatpush.msra.mxu0 %v62_v2  ;;  %1791 = vmatpush.msrb.mxu3 %v59_v55 }
0x11bf   :  { %1658 = vmatpush.msrb.mxu1 %v62_v2  ;;  %1723 = vmatpush.msra.mxu2 %v62_v2 }
0x11c0   :  { %1594 = vmatpush.msra.mxu0 %v61_v47 }
0x11c1   :  { %1659 = vmatpush.msrb.mxu1 %v61_v47  ;;  %1724 = vmatpush.msra.mxu2 %v61_v47 }
0x11c2   :  { %1595 = vmatpush.msra.mxu0 %v60_v48 }
0x11c3   :  { %1660 = vmatpush.msrb.mxu1 %v60_v48  ;;  %1725 = vmatpush.msra.mxu2 %v60_v48 }
0x11c4   :  { %1596 = vmatpush.msra.mxu0 %v59_v55 }
0x11c5   :  { %1661 = vmatpush.msrb.mxu1 %v59_v55  ;;  %1726 = vmatpush.msra.mxu2 %v59_v55 }
0x11cd   :  { %v1332_v50 = vpop.permute.xlu0 %1331 }
0x11ce   :  { %v1334_v25 = vmul.f32 %v1332_v50, %v1329_v28 }
0x11d0   :  { %v1336_v10 = vadd.f32 %v1335_v5, %v1334_v25 }
0x11d2   :  { %v1338_v32 = vsel %vm2863_vm8, %v1336_v10, %v2661_v36 }
0x1228   :  { %v1341_v40 = vpop.permute.xlu1 %1340 }
0x1229   :  { %v1343_v33 = vsel %vm233_vm13, %v1341_v40, %v1338_v32 }
0x122a   :  { %1948 = vmatmul.msk.f32.vlgmr.msra.gmra.mxu3 %vm1352_vm12, %v1343_v33 }
0x12ad   :  { %v1373_v13 = vpop.f32.mrf.mxu3 }
0x12ae   :  { %1949 = vmatmul.msk.f32.vlgmr.msrb.gmra.mxu0 %vm233_vm13, %v1373_v13 }
0x132b   :  { %v1396_v27 = vpop.f32.mrf.mxu0 }
0x132c   :  { %v1423_v52 = vadd.f32 %v2745_v8, %v1396_v27  ;;  %v1399_v36 = vadd.f32 %v1396_v27, %v213_v49 }
0x132e   :  { %1425 = vrot.lane.b32.xlu0 %v1423_v52, %s2125_s1  ;;  %v1950_v54 = vmul.f32 -1.442695, %v1399_v36 }
0x1330   :  { %2080 = vpow2.f32 %v1950_v54 }
0x1336   :  { %1441 = vrot.lane.b32.xlu0 %v1373_v13, %s2127_s4  ;;  %v2081_v16 = vpop.eup %2080 }
0x1337   :  { %v1403_v29 = vadd.f32 1.0, %v2081_v16 }
0x1339   :  { %2082 = vrcp.f32 %v1403_v29  ;;  %v1415_v26 = vand.u32 2147483648, %v1403_v29  ;;  %vm1409_vm11 = vweird.f32 %v1403_v29  ;;  %v1413_v63 = vand.u32 2147483647, %v1403_v29 }
0x133b   :  { %v1416_v1 = vor.u32 1.1754944e-38, %v1415_v26  ;;  %vm1414_vm2 = vcmp.eq.f32.partialorder %v1413_v63, 8.507059e+37 }
0x133f   :  { %v2083_v56 = vpop.eup %2082 }
0x1340   :  { %v1405_v18 = vmul.f32 %v2083_v56, %v1403_v29  ;;  %vm1410_vm0 = vweird.f32 %v2083_v56 }
0x1341   :  { %vm1411_vm1 = vmor %vm1409_vm11, %vm1410_vm0 }
0x1342   :  { %v1406_v23 = vsub.f32 1.0, %v1405_v18 }
0x1344   :  { %v1407_v57 = vmul.f32 %v2083_v56, %v1406_v23 }
0x1346   :  { %v1408_v61 = vadd.f32 %v2083_v56, %v1407_v57 }
0x1348   :  { %v1412_v24 = vsel %vm1411_vm1, %v2083_v56, %v1408_v61 }
0x1349   :  { %v1417_v45 = vsel %vm1414_vm2, %v1416_v1, %v1412_v24 }
0x134a   :  { %v1435_v7 = vsub.f32 1.0, %v1417_v45 }
0x13a0   :  { %v1426_v11 = vpop.permute.xlu0 %1425 }
0x13a1   :  { %v1428_v62 = vmul.f32 %v1426_v11, %v1417_v45 }
0x13a3   :  { %1430 = vrot.lane.b32.xlu1 %v1428_v62, %s2125_s1 }
0x13a8   :  { %v1442_v0 = vpop.permute.xlu0 %1441 }
0x13a9   :  { %v1444_v44 = vmul.f32 %v1442_v0, %v1417_v45 }
0x1415   :  { %v1431_v60 = vpop.permute.xlu1 %1430 }
0x1416   :  { %v1433_v6 = vadd.f32 %v1431_v60, %v213_v49  ;;  %v219_v49 = vadd.f32 %v2534_v19, %v2692_v59 }
0x1418   :  { %2084 = vtanh.f32 %v1433_v6 }
0x141e   :  { %v2085_v53 = vpop.eup %2084 }
0x141f   :  { %1437 = vrot.lane.b32.xlu2 %v2085_v53, %s2123_s27 }
0x1479   :  { %v1438_v30 = vpop.permute.xlu2 %1437 }
0x147a   :  { %v1440_v46 = vmul.f32 %v1438_v30, %v1435_v7 }
0x147c   :  { %v1445_v12 = vadd.f32 %v1444_v44, %v1440_v46  ;;  %v1839_v46 = vld [vmem:[%s2860_s7 + $0x18] sm:$0xff] }
0x147d   :  { %1857 = vmatpush.msrb.mxu0 %v1839_v46 }
0x147e   :  { %1447 = vrot.lane.b32.xlu1 %v1445_v12, %s2123_s27 }
0x14f0   :  { %v2754_v17 = vpop.permute.xlu1 %1447 }
0x14f1   :  { %1951 = vmatmul.msk.f32.vlgmr.msra.gmra.mxu1 %vm233_vm13, %v2754_v17 }
0x156e   :  { %v1468_v37 = vpop.f32.mrf.mxu1 }
0x156f   :  { %v1491_v41 = vadd.f32 %v1468_v37, %v2745_v8  ;;  %v1471_v22 = vadd.f32 %v1468_v37, %v216_v21  ;;  %v1837_v37 = vld [vmem:[%s2860_s7 + $0x8] sm:$0xff] }
0x1571   :  { %1493 = vrot.lane.b32.xlu2 %v1491_v41, %s2125_s1  ;;  %v1952_v14 = vmul.f32 -1.442695, %v1471_v22  ;;  %v1836_v41 = vld [vmem:[%s2860_s7] sm:$0xff] }
0x1573   :  { %2086 = vpow2.f32 %v1952_v14 }
0x1579   :  { %v2087_v39 = vpop.eup %2086 }
0x157a   :  { %v1475_v35 = vadd.f32 1.0, %v2087_v39 }
0x157c   :  { %2088 = vrcp.f32 %v1475_v35  ;;  %v1487_v4 = vand.u32 2147483648, %v1475_v35  ;;  %vm1481_vm9 = vweird.f32 %v1475_v35  ;;  %v1485_v58 = vand.u32 2147483647, %v1475_v35 }
0x157e   :  { %v1488_v47 = vor.u32 1.1754944e-38, %v1487_v4  ;;  %vm1486_vm4 = vcmp.eq.f32.partialorder %v1485_v58, 8.507059e+37 }
0x1582   :  { %v2089_v31 = vpop.eup %2088 }
0x1583   :  { %v1477_v38 = vmul.f32 %v2089_v31, %v1475_v35  ;;  %vm1482_vm3 = vweird.f32 %v2089_v31 }
0x1584   :  { %vm1483_vm10 = vmor %vm1481_vm9, %vm1482_vm3 }
0x1585   :  { %v1478_v34 = vsub.f32 1.0, %v1477_v38 }
0x1587   :  { %v1479_v9 = vmul.f32 %v2089_v31, %v1478_v34 }
0x1589   :  { %v1480_v43 = vadd.f32 %v2089_v31, %v1479_v9 }
0x158b   :  { %v1484_v2 = vsel %vm1483_vm10, %v2089_v31, %v1480_v43  ;;  %v222_v31 = vadd.f32 %v2536_v20, %v2692_v59 }
0x158c   :  { %v1489_v48 = vsel %vm1486_vm4, %v1488_v47, %v1484_v2 }
0x158d   :  { %v1503_v5 = vsub.f32 1.0, %v1489_v48  ;;  %v1509_v32 = vmul.f32 %v1489_v48, %v1445_v12  ;;  %v1838_v12 = vld [vmem:[%s2860_s7 + $0x10] sm:$0xff] }
0x158e   :  { %1858 = vmatpush.msrb.mxu0 %v1838_v12 }
0x1590   :  { %1859 = vmatpush.msrb.mxu0 %v1837_v37 }
0x1592   :  { %1860 = vmatpush.msrb.mxu0 %v1836_v41 }
0x15cb   :  { %v1494_v15 = vpop.permute.xlu2 %1493 }
0x15cc   :  { %v1496_v55 = vmul.f32 %v1494_v15, %v1489_v48 }
0x15ce   :  { %1498 = vrot.lane.b32.xlu0 %v1496_v55, %s2125_s1 }
0x1640   :  { %v1499_v50 = vpop.permute.xlu0 %1498 }
0x1641   :  { %v1501_v28 = vadd.f32 %v1499_v50, %v216_v21 }
0x1643   :  { %2090 = vtanh.f32 %v1501_v28 }
0x1649   :  { %v2091_v25 = vpop.eup %2090 }
0x164a   :  { %1505 = vrot.lane.b32.xlu1 %v2091_v25, %s2123_s27 }
0x16bc   :  { %v1506_v10 = vpop.permute.xlu1 %1505 }
0x16bd   :  { %v1508_v40 = vmul.f32 %v1506_v10, %v1503_v5 }
0x16bf   :  { %v1510_v33 = vadd.f32 %v1509_v32, %v1508_v40 }
0x16c1   :  { %1512 = vrot.lane.b32.xlu2 %v1510_v33, %s2123_s27 }
0x171b   :  { %v1513_v13 = vpop.permute.xlu2 %1512 }
0x171c   :  { %1953 = vmatmul.msk.f32.vlgmr.msrb.gmra.mxu2 %vm233_vm13, %v1513_v13 }
0x179f   :  { %v1533_v27 = vpop.f32.mrf.mxu2 }
0x17a0   :  { %v1556_v52 = vadd.f32 %v1533_v27, %v2745_v8  ;;  %v1536_v36 = vadd.f32 %v1533_v27, %v219_v49 }
0x17a2   :  { %1558 = vrot.lane.b32.xlu0 %v1556_v52, %s2125_s1  ;;  %v1954_v54 = vmul.f32 -1.442695, %v1536_v36 }
0x17a4   :  { %2092 = vpow2.f32 %v1954_v54 }
0x17aa   :  { %v2093_v16 = vpop.eup %2092 }
0x17ab   :  { %v1540_v29 = vadd.f32 1.0, %v2093_v16 }
0x17ad   :  { %2094 = vrcp.f32 %v1540_v29  ;;  %v1552_v26 = vand.u32 2147483648, %v1540_v29  ;;  %vm1546_vm6 = vweird.f32 %v1540_v29  ;;  %v1550_v63 = vand.u32 2147483647, %v1540_v29 }
0x17af   :  { %v1553_v1 = vor.u32 1.1754944e-38, %v1552_v26  ;;  %vm1551_vm14 = vcmp.eq.f32.partialorder %v1550_v63, 8.507059e+37 }
0x17b3   :  { %v2095_v56 = vpop.eup %2094 }
0x17b4   :  { %v1542_v18 = vmul.f32 %v2095_v56, %v1540_v29  ;;  %vm1547_vm5 = vweird.f32 %v2095_v56 }
0x17b5   :  { %vm1548_vm7 = vmor %vm1546_vm6, %vm1547_vm5 }
0x17b6   :  { %v1543_v23 = vsub.f32 1.0, %v1542_v18 }
0x17b8   :  { %v1544_v57 = vmul.f32 %v2095_v56, %v1543_v23 }
0x17ba   :  { %v1545_v61 = vadd.f32 %v2095_v56, %v1544_v57 }
0x17bc   :  { %v1549_v24 = vsel %vm1548_vm7, %v2095_v56, %v1545_v61  ;;  %v225_v56 = vadd.f32 %v2538_v42, %v2692_v59 }
0x17bd   :  { %v1554_v11 = vsel %vm1551_vm14, %v1553_v1, %v1549_v24 }
0x17be   :  { %v1568_v53 = vsub.f32 1.0, %v1554_v11  ;;  %v1574_v7 = vmul.f32 %v1554_v11, %v1510_v33 }
0x1814   :  { %v1559_v19 = vpop.permute.xlu0 %1558 }
0x1815   :  { %v1561_v45 = vmul.f32 %v1559_v19, %v1554_v11 }
0x1817   :  { %1563 = vrot.lane.b32.xlu1 %v1561_v45, %s2125_s1 }
0x1889   :  { %v1564_v62 = vpop.permute.xlu1 %1563 }
0x188a   :  { %v1566_v60 = vadd.f32 %v1564_v62, %v219_v49 }
0x188c   :  { %2096 = vtanh.f32 %v1566_v60 }
0x1892   :  { %v2097_v6 = vpop.eup %2096 }
0x1893   :  { %1570 = vrot.lane.b32.xlu2 %v2097_v6, %s2123_s27 }
0x18ed   :  { %v1571_v0 = vpop.permute.xlu2 %1570 }
0x18ee   :  { %v1573_v30 = vmul.f32 %v1571_v0, %v1568_v53 }
0x18f0   :  { %v1575_v44 = vadd.f32 %v1574_v7, %v1573_v30 }
0x18f2   :  { %1577 = vrot.lane.b32.xlu0 %v1575_v44, %s2123_s27 }
0x1964   :  { %v1578_v21 = vpop.permute.xlu0 %1577 }
0x1965   :  { %1955 = vmatmul.msk.f32.vlgmr.msra.gmra.mxu0 %vm233_vm13, %v1578_v21 }
0x196d   :  { %1963 = vmatmul.msk.f32.vlgmr.msrb.gmra.mxu0 %vm233_vm13, %v2754_v17 }
0x1975   :  { %1964 = vmatmul.msk.f32.gmra.mxu0 %vm233_vm13, %v1513_v13 }
0x197d   :  { %1965 = vmatmul.msk.f32.gmra.mxu0 %vm233_vm13, %v1578_v21 }
0x19e2   :  { %v1598_v22 = vpop.f32.mrf.mxu0 }
0x19e3   :  { %v1621_v14 = vadd.f32 %v1598_v22, %v2745_v8  ;;  %v1601_v38 = vadd.f32 %v1598_v22, %v222_v31 }
0x19e5   :  { %1623 = vrot.lane.b32.xlu1 %v1621_v14, %s2125_s1  ;;  %v1956_v34 = vmul.f32 -1.442695, %v1601_v38 }
0x19e7   :  { %2098 = vpow2.f32 %v1956_v34 }
0x19ea   :  { %v1862_v39 = vpop.f32.mrf.mxu0 }
0x19eb   :  { %1884 = vst.msk [vmem:[%s2861_s8] sm:$0xff] %vm1883_vm15, %v1862_v39 }
0x19ed   :  { %v2099_v9 = vpop.eup %2098 }
0x19ee   :  { %v1605_v43 = vadd.f32 1.0, %v2099_v9 }
0x19f0   :  { %2100 = vrcp.f32 %v1605_v43  ;;  %v1617_v48 = vand.u32 2147483648, %v1605_v43  ;;  %vm1611_vm8 = vweird.f32 %v1605_v43  ;;  %v1615_v55 = vand.u32 2147483647, %v1605_v43 }
0x19f2   :  { %v1865_v35 = vpop.f32.mrf.mxu0  ;;  %v1618_v28 = vor.u32 1.1754944e-38, %v1617_v48  ;;  %vm1616_vm11 = vcmp.eq.f32.partialorder %v1615_v55, 8.507059e+37 }
0x19f3   :  { %1885 = vst.msk [vmem:[%s2861_s8 + $0x8] sm:$0xff] %vm1883_vm15, %v1865_v35  ;;  %v228_v35 = vadd.f32 %v2540_v51, %v2692_v59 }
0x19f6   :  { %v2101_v4 = vpop.eup %2100 }
0x19f7   :  { %v1607_v58 = vmul.f32 %v2101_v4, %v1605_v43  ;;  %vm1612_vm12 = vweird.f32 %v2101_v4 }
0x19f8   :  { %vm1613_vm0 = vmor %vm1611_vm8, %vm1612_vm12 }
0x19f9   :  { %v1608_v2 = vsub.f32 1.0, %v1607_v58 }
0x19fa   :  { %v1868_v17 = vpop.f32.mrf.mxu0 }
0x19fb   :  { %1886 = vst.msk [vmem:[%s2861_s8 + $0x10] sm:$0xff] %vm1883_vm15, %v1868_v17  ;;  %v1609_v47 = vmul.f32 %v2101_v4, %v1608_v2 }
0x19fd   :  { %v1610_v15 = vadd.f32 %v2101_v4, %v1609_v47 }
0x19ff   :  { %v1614_v50 = vsel %vm1613_vm0, %v2101_v4, %v1610_v15 }
0x1a00   :  { %v1619_v25 = vsel %vm1616_vm11, %v1618_v28, %v1614_v50 }
0x1a01   :  { %v1633_v33 = vsub.f32 1.0, %v1619_v25  ;;  %v1639_v27 = vmul.f32 %v1619_v25, %v1575_v44 }
0x1a57   :  { %v1624_v20 = vpop.permute.xlu1 %1623 }
0x1a58   :  { %v1626_v5 = vmul.f32 %v1624_v20, %v1619_v25 }
0x1a5a   :  { %1628 = vrot.lane.b32.xlu2 %v1626_v5, %s2125_s1 }
0x1ab4   :  { %v1629_v10 = vpop.permute.xlu2 %1628 }
0x1ab5   :  { %v1631_v32 = vadd.f32 %v1629_v10, %v222_v31 }
0x1ab7   :  { %2102 = vtanh.f32 %v1631_v32 }
0x1abd   :  { %v2103_v40 = vpop.eup %2102 }
0x1abe   :  { %1635 = vrot.lane.b32.xlu0 %v2103_v40, %s2123_s27 }
0x1b30   :  { %v1636_v13 = vpop.permute.xlu0 %1635 }
0x1b31   :  { %v1638_v52 = vmul.f32 %v1636_v13, %v1633_v33 }
0x1b33   :  { %v1640_v49 = vadd.f32 %v1639_v27, %v1638_v52 }
0x1b35   :  { %1642 = vrot.lane.b32.xlu1 %v1640_v49, %s2123_s27 }
0x1ba7   :  { %v1643_v36 = vpop.permute.xlu1 %1642 }
0x1ba8   :  { %1957 = vmatmul.msk.f32.vlgmr.msrb.gmra.mxu1 %vm233_vm13, %v1643_v36  ;;  %1966 = vmatmul.msk.f32.gmra.mxu0 %vm233_vm13, %v1643_v36 }
0x1c25   :  { %v1663_v54 = vpop.f32.mrf.mxu1  ;;  %v1871_v16 = vpop.f32.mrf.mxu0 }
0x1c26   :  { %v1686_v29 = vadd.f32 %v1663_v54, %v2745_v8  ;;  %1887 = vst.msk [vmem:[%s2861_s8 + $0x18] sm:$0xff] %vm1883_vm15, %v1871_v16  ;;  %v1666_v18 = vadd.f32 %v1663_v54, %v225_v56  ;;  %v231_v54 = vadd.f32 %v2542_v3, %v2692_v59 }
0x1c28   :  { %1688 = vrot.lane.b32.xlu2 %v1686_v29, %s2125_s1  ;;  %v1958_v23 = vmul.f32 -1.442695, %v1666_v18 }
0x1c2a   :  { %2104 = vpow2.f32 %v1958_v23 }
0x1c30   :  { %v2105_v57 = vpop.eup %2104 }
0x1c31   :  { %v1670_v61 = vadd.f32 1.0, %v2105_v57 }
0x1c33   :  { %2106 = vrcp.f32 %v1670_v61  ;;  %v1682_v11 = vand.u32 2147483648, %v1670_v61  ;;  %vm1676_vm2 = vweird.f32 %v1670_v61  ;;  %v1680_v45 = vand.u32 2147483647, %v1670_v61 }
0x1c35   :  { %v1683_v60 = vor.u32 1.1754944e-38, %v1682_v11  ;;  %vm1681_vm9 = vcmp.eq.f32.partialorder %v1680_v45, 8.507059e+37 }
0x1c39   :  { %v2107_v26 = vpop.eup %2106 }
0x1c3a   :  { %v1672_v63 = vmul.f32 %v2107_v26, %v1670_v61  ;;  %vm1677_vm1 = vweird.f32 %v2107_v26 }
0x1c3b   :  { %vm1678_vm3 = vmor %vm1676_vm2, %vm1677_vm1 }
0x1c3c   :  { %v1673_v24 = vsub.f32 1.0, %v1672_v63 }
0x1c3e   :  { %v1674_v1 = vmul.f32 %v2107_v26, %v1673_v24 }
0x1c40   :  { %v1675_v19 = vadd.f32 %v2107_v26, %v1674_v1 }
0x1c42   :  { %v1679_v62 = vsel %vm1678_vm3, %v2107_v26, %v1675_v19 }
0x1c43   :  { %v1684_v6 = vsel %vm1681_vm9, %v1683_v60, %v1679_v62 }
0x1c44   :  { %v1698_v44 = vsub.f32 1.0, %v1684_v6  ;;  %v1704_v12 = vmul.f32 %v1684_v6, %v1640_v49 }
0x1c82   :  { %v1689_v42 = vpop.permute.xlu2 %1688 }
0x1c83   :  { %v1691_v53 = vmul.f32 %v1689_v42, %v1684_v6 }
0x1c85   :  { %1693 = vrot.lane.b32.xlu0 %v1691_v53, %s2125_s1 }
0x1cf7   :  { %v1694_v0 = vpop.permute.xlu0 %1693 }
0x1cf8   :  { %v1696_v7 = vadd.f32 %v1694_v0, %v225_v56 }
0x1cfa   :  { %2108 = vtanh.f32 %v1696_v7 }
0x1d00   :  { %v2109_v30 = vpop.eup %2108 }
0x1d01   :  { %1700 = vrot.lane.b32.xlu1 %v2109_v30, %s2123_s27 }
0x1d73   :  { %v1701_v46 = vpop.permute.xlu1 %1700 }
0x1d74   :  { %v1703_v37 = vmul.f32 %v1701_v46, %v1698_v44 }
0x1d76   :  { %v1705_v41 = vadd.f32 %v1704_v12, %v1703_v37 }
0x1d78   :  { %1707 = vrot.lane.b32.xlu2 %v1705_v41, %s2123_s27 }
0x1dd2   :  { %v1708_v21 = vpop.permute.xlu2 %1707 }
0x1dd3   :  { %1959 = vmatmul.msk.f32.vlgmr.msra.gmra.mxu2 %vm233_vm13, %v1708_v21  ;;  %1967 = vmatmul.msk.f32.gmra.mxu0 %vm233_vm13, %v1708_v21 }
0x1e50   :  { %v1874_v22 = vpop.f32.mrf.mxu0 }
0x1e51   :  { %1888 = vst.msk [vmem:[%s2861_s8 + $0x20] sm:$0xff] %vm1883_vm15, %v1874_v22 }
0x1e56   :  { %v1728_v14 = vpop.f32.mrf.mxu2 }
0x1e57   :  { %v1751_v39 = vadd.f32 %v1728_v14, %v2745_v8  ;;  %v1731_v17 = vadd.f32 %v1728_v14, %v228_v35 }
0x1e59   :  { %1753 = vrot.lane.b32.xlu0 %v1751_v39, %s2125_s1  ;;  %v1960_v31 = vmul.f32 -1.442695, %v1731_v17 }
0x1e5b   :  { %2110 = vpow2.f32 %v1960_v31 }
0x1e61   :  { %v2111_v38 = vpop.eup %2110 }
0x1e62   :  { %v1735_v34 = vadd.f32 1.0, %v2111_v38 }
0x1e64   :  { %2112 = vrcp.f32 %v1735_v34  ;;  %v1747_v47 = vand.u32 2147483648, %v1735_v34  ;;  %vm1741_vm4 = vweird.f32 %v1735_v34  ;;  %v1745_v15 = vand.u32 2147483647, %v1735_v34 }
0x1e66   :  { %v1748_v55 = vor.u32 1.1754944e-38, %v1747_v47  ;;  %vm1746_vm6 = vcmp.eq.f32.partialorder %v1745_v15, 8.507059e+37 }
0x1e6a   :  { %v2113_v9 = vpop.eup %2112 }
0x1e6b   :  { %v1737_v43 = vmul.f32 %v2113_v9, %v1735_v34  ;;  %vm1742_vm10 = vweird.f32 %v2113_v9 }
0x1e6c   :  { %vm1743_vm5 = vmor %vm1741_vm4, %vm1742_vm10 }
0x1e6d   :  { %v1738_v4 = vsub.f32 1.0, %v1737_v43 }
0x1e6f   :  { %v1739_v58 = vmul.f32 %v2113_v9, %v1738_v4 }
0x1e71   :  { %v1740_v2 = vadd.f32 %v2113_v9, %v1739_v58 }
0x1e73   :  { %v1744_v48 = vsel %vm1743_vm5, %v2113_v9, %v1740_v2 }
0x1e74   :  { %v1749_v50 = vsel %vm1746_vm6, %v1748_v55, %v1744_v48 }
0x1e75   :  { %v1763_v10 = vsub.f32 1.0, %v1749_v50  ;;  %v1769_v40 = vmul.f32 %v1749_v50, %v1705_v41 }
0x1ecb   :  { %v1754_v51 = vpop.permute.xlu0 %1753 }
0x1ecc   :  { %v1756_v28 = vmul.f32 %v1754_v51, %v1749_v50 }
0x1ece   :  { %1758 = vrot.lane.b32.xlu1 %v1756_v28, %s2125_s1 }
0x1f40   :  { %v1759_v20 = vpop.permute.xlu1 %1758 }
0x1f41   :  { %v1761_v25 = vadd.f32 %v1759_v20, %v228_v35 }
0x1f43   :  { %2114 = vtanh.f32 %v1761_v25 }
0x1f49   :  { %v2115_v5 = vpop.eup %2114 }
0x1f4a   :  { %1765 = vrot.lane.b32.xlu2 %v2115_v5, %s2123_s27 }
0x1fa4   :  { %v1766_v32 = vpop.permute.xlu2 %1765 }
0x1fa5   :  { %v1768_v33 = vmul.f32 %v1766_v32, %v1763_v10 }
0x1fa7   :  { %v1770_v13 = vadd.f32 %v1769_v40, %v1768_v33 }
0x1fa9   :  { %1772 = vrot.lane.b32.xlu0 %v1770_v13, %s2123_s27 }
0x201b   :  { %v1773_v27 = vpop.permute.xlu0 %1772 }
0x201c   :  { %1961 = vmatmul.msk.f32.vlgmr.msrb.gmra.mxu3 %vm233_vm13, %v1773_v27  ;;  %1968 = vmatmul.msk.f32.gmra.mxu0 %vm233_vm13, %v1773_v27 }
0x2099   :  { %v1877_v52 = vpop.f32.mrf.mxu0 }
0x209a   :  { %1889 = vst.msk [vmem:[%s2861_s8 + $0x28] sm:$0xff] %vm1883_vm15, %v1877_v52 }
0x209f   :  { %v1793_v49 = vpop.f32.mrf.mxu3 }
0x20a0   :  { %v1816_v36 = vadd.f32 %v1793_v49, %v2745_v8  ;;  %v1796_v16 = vadd.f32 %v1793_v49, %v231_v54 }
0x20a2   :  { %1818 = vrot.lane.b32.xlu1 %v1816_v36, %s2125_s1  ;;  %v1962_v29 = vmul.f32 -1.442695, %v1796_v16 }
0x20a4   :  { %2116 = vpow2.f32 %v1962_v29 }
0x20aa   :  { %v2117_v56 = vpop.eup %2116 }
0x20ab   :  { %v1800_v18 = vadd.f32 1.0, %v2117_v56 }
0x20ad   :  { %2118 = vrcp.f32 %v1800_v18  ;;  %v1812_v24 = vand.u32 2147483648, %v1800_v18  ;;  %vm1806_vm14 = vweird.f32 %v1800_v18  ;;  %v1810_v8 = vand.u32 2147483647, %v1800_v18 }
0x20af   :  { %v1813_v19 = vor.u32 1.1754944e-38, %v1812_v24  ;;  %vm1811_vm8 = vcmp.eq.f32.partialorder %v1810_v8, 8.507059e+37 }
0x20b3   :  { %v2119_v23 = vpop.eup %2118 }
0x20b4   :  { %v1802_v57 = vmul.f32 %v2119_v23, %v1800_v18  ;;  %vm1807_vm7 = vweird.f32 %v2119_v23 }
0x20b5   :  { %vm1808_vm12 = vmor %vm1806_vm14, %vm1807_vm7 }
0x20b6   :  { %v1803_v61 = vsub.f32 1.0, %v1802_v57 }
0x20b8   :  { %v1804_v26 = vmul.f32 %v2119_v23, %v1803_v61 }
0x20ba   :  { %v1805_v63 = vadd.f32 %v2119_v23, %v1804_v26 }
0x20bc   :  { %v1809_v1 = vsel %vm1808_vm12, %v2119_v23, %v1805_v63 }
0x20bd   :  { %v1814_v59 = vsel %vm1811_vm8, %v1813_v19, %v1809_v1 }
0x20be   :  { %v1828_v42 = vsub.f32 1.0, %v1814_v59  ;;  %v1834_v53 = vmul.f32 %v1814_v59, %v1770_v13 }
0x2114   :  { %v1819_v3 = vpop.permute.xlu1 %1818 }
0x2115   :  { %v1821_v11 = vmul.f32 %v1819_v3, %v1814_v59 }
0x2117   :  { %1823 = vrot.lane.b32.xlu2 %v1821_v11, %s2125_s1 }
0x2171   :  { %v1824_v45 = vpop.permute.xlu2 %1823 }
0x2172   :  { %v1826_v62 = vadd.f32 %v1824_v45, %v231_v54 }
0x2174   :  { %2120 = vtanh.f32 %v1826_v62 }
0x217a   :  { %v2121_v60 = vpop.eup %2120 }
0x217b   :  { %1830 = vrot.lane.b32.xlu0 %v2121_v60, %s2123_s27 }
0x21ed   :  { %v1831_v6 = vpop.permute.xlu0 %1830 }
0x21ee   :  { %v1833_v0 = vmul.f32 %v1831_v6, %v1828_v42 }
0x21f0   :  { %v1835_v7 = vadd.f32 %v1834_v53, %v1833_v0 }
0x21f2   :  { %1841 = vrot.lane.b32.xlu1 %v1835_v7, %s2123_s27 }
0x2264   :  { %v1842_v30 = vpop.permute.xlu1 %1841 }
0x2265   :  { %1969 = vmatmul.msk.f32.gmra.mxu0 %vm233_vm13, %v1842_v30 }
0x22e2   :  { %v1880_v44 = vpop.f32.mrf.mxu0 }
0x22e3   :  { %1890 = vst.msk [vmem:[%s2861_s8 + $0x30] sm:$0xff] %vm1883_vm15, %v1880_v44 }

</bundles_post_ra>
